<compile_context>
chip_gen: v6e
topology: v6e:2x2x1
jax: 0.10.0
libtpu: 0.0.40
codegen_flags: <defaults>
</compile_context>

<pallas_src>
import functools

import jax
import jax.numpy as jnp
from jax.experimental import pallas as pl
from jax.experimental.pallas import tpu as pltpu


# ----------------------------------------------------------------------------
# Fused kernel: one grid step == one TH-row tile of one image.
# ----------------------------------------------------------------------------
def _dilated_block_kernel(x_ref, w1_ref, w2_ref, b1_ref, b2_ref, out_ref,
                          xpad_ref, midpad_ref,
                          *, d, TH, W, Cin, Cmid, Cout, compute_dtype):
    # x_ref      : (H, W, Cin)            full image, resident across the row-tile axis
    # w1_ref     : (9, Cin,  Cmid)        conv1 weights (BN1 scale folded in), tap-major
    # w2_ref     : (9, Cmid, Cout)        conv2 weights (BN2 scale folded in)
    # b1_ref/b2  : (1, C)                 folded BatchNorm biases
    # out_ref    : (TH, W, Cout)          output row-tile
    # xpad_ref   : (TH+4d, W+2d, Cin)     conv1 input window incl. zero halo
    # midpad_ref : (TH+2d, W+2d, Cmid)    conv2 input window incl. zero halo
    t = pl.program_id(1)
    T = pl.num_programs(1)
    row0 = t * TH
    if TH % 8 == 0:
        row0 = pl.multiple_of(row0, 8)

    # ---------------- build conv1 input window (border-only zeroing) ----------------
    # W borders == the conv zero-padding in W.
    xpad_ref[:, 0:d, :] = jnp.zeros((TH + 4 * d, d, Cin), xpad_ref.dtype)
    xpad_ref[:, d + W:, :] = jnp.zeros((TH + 4 * d, d, Cin), xpad_ref.dtype)
    # Interior rows of this tile (always inside the image).
    xpad_ref[2 * d:2 * d + TH, d:d + W, :] = \
        x_ref[pl.ds(row0, TH), :, :].astype(xpad_ref.dtype)

    # Top halo: real rows unless this is the first tile (then it's conv zero padding in H).
    @pl.when(t > 0)
    def _():
        xpad_ref[0:2 * d, d:d + W, :] = \
            x_ref[pl.ds(row0 - 2 * d, 2 * d), :, :].astype(xpad_ref.dtype)

    @pl.when(t == 0)
    def _():
        xpad_ref[0:2 * d, d:d + W, :] = jnp.zeros((2 * d, W, Cin), xpad_ref.dtype)

    # Bottom halo.
    @pl.when(t < T - 1)
    def _():
        xpad_ref[2 * d + TH:, d:d + W, :] = \
            x_ref[pl.ds(row0 + TH, 2 * d), :, :].astype(xpad_ref.dtype)

    @pl.when(t == T - 1)
    def _():
        xpad_ref[2 * d + TH:, d:d + W, :] = jnp.zeros((2 * d, W, Cin), xpad_ref.dtype)

    # ---------------- conv1 (BN1 scale folded into w1) + bias + ReLU ----------------
    # 9 accumulated K=Cin matmuls reading shifted windows directly (no im2col buffer).
    h = jnp.zeros((TH + 2 * d, W, Cmid), jnp.float32)
    for ky in range(3):
        for kx in range(3):
            k = ky * 3 + kx
            lhs = xpad_ref[ky * d:ky * d + TH + 2 * d, kx * d:kx * d + W, :]
            h = h + jax.lax.dot_general(
                lhs.astype(compute_dtype), w1_ref[k].astype(compute_dtype),
                dimension_numbers=(((2,), (0,)), ((), ())),
                preferred_element_type=jnp.float32)
    h = jnp.maximum(h + b1_ref[0], 0.0)                     # BN1 bias + ReLU (f32)

    # ---------------- build conv2 input window ----------------
    midpad_ref[:, 0:d, :] = jnp.zeros((TH + 2 * d, d, Cmid), midpad_ref.dtype)
    midpad_ref[:, d + W:, :] = jnp.zeros((TH + 2 * d, d, Cmid), midpad_ref.dtype)
    midpad_ref[:, d:d + W, :] = h.astype(midpad_ref.dtype)
    # Intermediate rows that fall outside the image are conv2's zero padding in H.
    @pl.when(t == 0)
    def _():
        midpad_ref[0:d, d:d + W, :] = jnp.zeros((d, W, Cmid), midpad_ref.dtype)

    @pl.when(t == T - 1)
    def _():
        midpad_ref[TH + d:, d:d + W, :] = jnp.zeros((d, W, Cmid), midpad_ref.dtype)

    # ---------------- conv2 (BN2 scale folded) + bias + residual + ReLU ----------------
    y = jnp.zeros((TH, W, Cout), jnp.float32)
    for ky in range(3):
        for kx in range(3):
            k = ky * 3 + kx
            lhs = midpad_ref[ky * d:ky * d + TH, kx * d:kx * d + W, :]
            y = y + jax.lax.dot_general(
                lhs.astype(compute_dtype), w2_ref[k].astype(compute_dtype),
                dimension_numbers=(((2,), (0,)), ((), ())),
                preferred_element_type=jnp.float32)
    y = y + b2_ref[0]                                        # BN2 bias
    y = y + x_ref[pl.ds(row0, TH), :, :].astype(jnp.float32) # identity residual
    out_ref[...] = jnp.maximum(y, 0.0).astype(out_ref.dtype)


# ----------------------------------------------------------------------------
# Host-side helpers
# ----------------------------------------------------------------------------
def _bn_fold(gamma, beta, running_mean, running_var, eps=1e-5):
    scale = gamma / jnp.sqrt(running_var + eps)
    bias = beta - running_mean * scale
    return scale, bias


def _vmem_budget_bytes():
    # Per-generation budget: ~75% of physical VMEM (v5e/v6e 128 MiB -> 96 MiB,
    # v7x 64 MiB -> 48 MiB).  Conservative 64 MiB fallback if the query fails.
    try:
        cap = int(pltpu.get_tpu_info().vmem_capacity_bytes)
    except Exception:
        cap = 64 * 1024 * 1024
    return (cap * 3) // 4


def _pick_row_tile(N, H, W, d, Cin, Cmid, Cout, itemsize, budget_bytes):
    """Largest divisor of H that fits the per-step VMEM budget, preferring >=4 grid steps."""
    def est(TH):
        return itemsize * (
            (TH + 4 * d) * (W + 2 * d) * Cin          # xpad scratch
            + (TH + 2 * d) * (W + 2 * d) * Cmid       # midpad scratch
            + 2 * H * W * Cin                         # resident (double-buffered) input image
            + 2 * TH * W * Cout                       # double-buffered output tile
            + 2 * 9 * (Cin * Cmid + Cmid * Cout))     # double-buffered weights
    cands = [t for t in range(H, 0, -1) if H % t == 0 and (t == H or t >= 2 * d)]
    fitting = [t for t in cands if est(t) <= budget_bytes]
    if not fitting:
        return min(cands)                             # best effort
    deep = [t for t in fitting if N * (H // t) >= 4]  # enough steps to pipeline DMA
    return max(deep) if deep else max(fitting)


def dilated_basic_block_nhwc(x_nhwc, params, *, dilation=1, row_tile=None,
                             compute_dtype=jnp.float32):
    N, H, W, Cin = x_nhwc.shape
    w1 = params["w1"]                    # (3, 3, Cin,  Cmid)  HWIO
    w2 = params["w2"]                    # (3, 3, Cmid, Cout)
    Cmid, Cout = w1.shape[-1], w2.shape[-1]
    assert Cout == Cin, "downsample=None requires inplanes == planes"
    d = dilation

    s1, b1 = _bn_fold(params["bn1_gamma"], params["bn1_beta"],
                      params["bn1_mean"], params["bn1_var"])
    s2, b2 = _bn_fold(params["bn2_gamma"], params["bn2_beta"],
                      params["bn2_mean"], params["bn2_var"])

    # Fold the per-output-channel BN scale into the conv weights (scale commutes with conv).
    w1_f = (w1 * s1[None, None, None, :]).reshape(9, Cin, Cmid)
    w2_f = (w2 * s2[None, None, None, :]).reshape(9, Cmid, Cout)

    budget = _vmem_budget_bytes()
    itemsize = jnp.dtype(compute_dtype).itemsize
    TH = row_tile if row_tile is not None else _pick_row_tile(
        N, H, W, d, Cin, Cmid, Cout, itemsize, budget)
    assert H % TH == 0, "row tile must divide H"
    T = H // TH
    assert T == 1 or TH >= 2 * d, "row tile must be >= 2*dilation when H is tiled"

    kernel = functools.partial(
        _dilated_block_kernel,
        d=d, TH=TH, W=W, Cin=Cin, Cmid=Cmid, Cout=Cout, compute_dtype=compute_dtype)

    flops = 2 * N * 9 * (T * (TH + 2 * d) * W * Cin * Cmid + H * W * Cmid * Cout)
    bytes_accessed = 4 * (x_nhwc.size + N * H * W * Cout
                          + w1_f.size + w2_f.size + Cmid + Cout)

    return pl.pallas_call(
        kernel,
        out_shape=jax.ShapeDtypeStruct((N, H, W, Cout), x_nhwc.dtype),
        grid=(N, T),
        in_specs=[
            # Full image, resident across the row-tile axis (doubles as the residual).
            pl.BlockSpec((None, H, W, Cin), lambda n, t: (n, 0, 0, 0)),
            pl.BlockSpec((9, Cin, Cmid), lambda n, t: (0, 0, 0)),     # w1 (BN1 folded)
            pl.BlockSpec((9, Cmid, Cout), lambda n, t: (0, 0, 0)),    # w2 (BN2 folded)
            pl.BlockSpec((1, Cmid), lambda n, t: (0, 0)),             # bn1 bias
            pl.BlockSpec((1, Cout), lambda n, t: (0, 0)),             # bn2 bias
        ],
        out_specs=pl.BlockSpec((None, TH, W, Cout), lambda n, t: (n, t, 0, 0)),
        scratch_shapes=[
            pltpu.VMEM((TH + 4 * d, W + 2 * d, Cin), compute_dtype),   # conv1 halo window
            pltpu.VMEM((TH + 2 * d, W + 2 * d, Cmid), compute_dtype),  # conv2 halo window
        ],
        compiler_params=pltpu.CompilerParams(
            dimension_semantics=("parallel", "arbitrary"),
            vmem_limit_bytes=int(budget)),
        cost_estimate=pl.CostEstimate(
            flops=int(flops), transcendentals=0, bytes_accessed=int(bytes_accessed)),
    )(x_nhwc, w1_f, w2_f, b1.reshape(1, Cmid), b2.reshape(1, Cout))


def dilated_basic_block(x_nchw, params, *, dilation=1, row_tile=None,
                        compute_dtype=jnp.float32):
    # NCHW <-> NHWC only at the block boundary (PyTorch external semantics).
    x = jnp.transpose(x_nchw, (0, 2, 3, 1))
    out = dilated_basic_block_nhwc(x, params, dilation=dilation, row_tile=row_tile,
                                   compute_dtype=compute_dtype)
    return jnp.transpose(out, (0, 3, 1, 2))


# ----------------------------------------------------------------------------
# Pure-JAX reference (correctness check)
# ----------------------------------------------------------------------------
def _ref_block(x_nchw, params, *, dilation=1, eps=1e-5):
    x = jnp.transpose(x_nchw, (0, 2, 3, 1))
    d = dilation

    def conv(inp, w):
        return jax.lax.conv_general_dilated(
            inp, w, window_strides=(1, 1), padding=((d, d), (d, d)),
            rhs_dilation=(d, d), dimension_numbers=("NHWC", "HWIO", "NHWC"))

    def bn(y, g, b, m, v):
        return (y - m) / jnp.sqrt(v + eps) * g + b

    out = conv(x, params["w1"])
    out = bn(out, params["bn1_gamma"], params["bn1_beta"],
             params["bn1_mean"], params["bn1_var"])
    out = jnp.maximum(out, 0.0)
    out = conv(out, params["w2"])
    out = bn(out, params["bn2_gamma"], params["bn2_beta"],
             params["bn2_mean"], params["bn2_var"])
    out = jnp.maximum(out + x, 0.0)
    return jnp.transpose(out, (0, 3, 1, 2))


# ----------------------------------------------------------------------------
if __name__ == "__main__":
    N, C, H, W = 2, 8, 16, 16          # inplanes = planes = 8, spatial 16x16 (toy self-test)
    dilation = 2

    key = jax.random.PRNGKey(0)
    k = jax.random.split(key, 9)

    params = {
        # conv weights stored HWIO (3,3,Cin,Cout); Cout == Cin == planes
        "w1": 0.1 * jax.random.normal(k[0], (3, 3, C, C), jnp.float32),
        "w2": 0.1 * jax.random.normal(k[1], (3, 3, C, C), jnp.float32),
        # BatchNorm (inference-mode running statistics)
        "bn1_gamma": 1.0 + 0.1 * jax.random.normal(k[2], (C,), jnp.float32),
        "bn1_beta":  0.1 * jax.random.normal(k[3], (C,), jnp.float32),
        "bn1_mean":  0.1 * jax.random.normal(k[4], (C,), jnp.float32),
        "bn1_var":   1.0 + 0.5 * jax.random.uniform(k[5], (C,), jnp.float32),
        "bn2_gamma": 1.0 + 0.1 * jax.random.normal(k[6], (C,), jnp.float32),
        "bn2_beta":  0.1 * jax.random.normal(k[7], (C,), jnp.float32),
        "bn2_mean":  jnp.zeros((C,), jnp.float32),
        "bn2_var":   jnp.ones((C,), jnp.float32),
    }

    x = jax.random.normal(k[8], (N, C, H, W), jnp.float32)

    out = jax.block_until_ready(dilated_basic_block(x, params, dilation=dilation))
    ref = jax.block_until_ready(_ref_block(x, params, dilation=dilation))

    assert out.shape == (N, C, H, W)
    assert jnp.allclose(out, ref, atol=1e-4, rtol=1e-4), \
        f"max abs err {jnp.max(jnp.abs(out - ref))}"

    print("KERNEL_OK")
</pallas_src>

<mosaic_0001>
module attributes {stable_mosaic.version = 11 : i64} {
  func.func @_dilated_block_kernel(%arg0: i32, %arg1: i32, %arg2: memref<1x16x16x8xf32, #tpu.memory_space<vmem>>, %arg3: memref<9x8x8xf32, #tpu.memory_space<vmem>>, %arg4: memref<9x8x8xf32, #tpu.memory_space<vmem>>, %arg5: memref<1x8xf32, #tpu.memory_space<vmem>>, %arg6: memref<1x8xf32, #tpu.memory_space<vmem>>, %arg7: memref<1x8x16x8xf32, #tpu.memory_space<vmem>>, %arg8: memref<16x20x8xf32, #tpu.memory_space<vmem>>, %arg9: memref<12x20x8xf32, #tpu.memory_space<vmem>>) attributes {dimension_semantics = [#tpu.dimension_semantics<parallel>, #tpu.dimension_semantics<arbitrary>], iteration_bounds = array<i64: 2, 2>, scalar_prefetch = 0 : i64, scratch_operands = 2 : i64, tpu.core_type = #tpu.core_type<tc>, window_params = [{transform_indices = @transform_0, window_bounds = array<i64: 1, 16, 16, 8>}, {pipeline_mode = #tpu.pipeline_mode<synchronous>, transform_indices = @transform_1, window_bounds = array<i64: 9, 8, 8>}, {pipeline_mode = #tpu.pipeline_mode<synchronous>, transform_indices = @transform_2, window_bounds = array<i64: 9, 8, 8>}, {pipeline_mode = #tpu.pipeline_mode<synchronous>, transform_indices = @transform_3, window_bounds = array<i64: 1, 8>}, {pipeline_mode = #tpu.pipeline_mode<synchronous>, transform_indices = @transform_4, window_bounds = array<i64: 1, 8>}, {transform_indices = @transform_5, window_bounds = array<i64: 1, 8, 16, 8>}]} {
    %c8_i32 = arith.constant 8 : i32
    %0 = arith.muli %arg1, %c8_i32 : i32
    %1 = tpu.assume_multiple %0, 8 : i32
    %cst = arith.constant 0.000000e+00 : f32
    %2 = vector.broadcast %cst : f32 to vector<16x2x8xf32>
    %c0 = arith.constant 0 : index
    %c0_0 = arith.constant 0 : index
    %c0_1 = arith.constant 0 : index
    %3 = vector.load %arg8[%c0, %c0_0, %c0_1] : memref<16x20x8xf32, #tpu.memory_space<vmem>>, vector<16x2x8xf32>
    tpu.vector_store %arg8[%c0, %c0_0, %c0_1], %2 {strides = array<i32>} : memref<16x20x8xf32, #tpu.memory_space<vmem>>, vector<16x2x8xf32>,
    %cst_2 = arith.constant 0.000000e+00 : f32
    %4 = vector.broadcast %cst_2 : f32 to vector<16x2x8xf32>
    %c0_3 = arith.constant 0 : index
    %c18 = arith.constant 18 : index
    %c0_4 = arith.constant 0 : index
    %5 = vector.load %arg8[%c0_3, %c18, %c0_4] : memref<16x20x8xf32, #tpu.memory_space<vmem>>, vector<16x2x8xf32>
    tpu.vector_store %arg8[%c0_3, %c18, %c0_4], %4 {strides = array<i32>} : memref<16x20x8xf32, #tpu.memory_space<vmem>>, vector<16x2x8xf32>,
    %c0_5 = arith.constant 0 : index
    %6 = arith.index_cast %1 : i32 to index
    %c0_6 = arith.constant 0 : index
    %c0_7 = arith.constant 0 : index
    %7 = vector.load %arg2[%c0_5, %6, %c0_6, %c0_7] : memref<1x16x16x8xf32, #tpu.memory_space<vmem>>, vector<1x8x16x8xf32>
    %8 = vector.shape_cast %7 : vector<1x8x16x8xf32> to vector<8x16x8xf32>
    %c4 = arith.constant 4 : index
    %c2 = arith.constant 2 : index
    %c0_8 = arith.constant 0 : index
    %9 = vector.load %arg8[%c4, %c2, %c0_8] : memref<16x20x8xf32, #tpu.memory_space<vmem>>, vector<8x16x8xf32>
    tpu.vector_store %arg8[%c4, %c2, %c0_8], %8 {strides = array<i32>} : memref<16x20x8xf32, #tpu.memory_space<vmem>>, vector<8x16x8xf32>,
    %c0_i32 = arith.constant 0 : i32
    %10 = arith.cmpi sgt, %arg1, %c0_i32 : i32
    %11 = arith.extui %10 : i1 to i32
    %c0_i32_9 = arith.constant 0 : i32
    %12 = arith.cmpi ne, %11, %c0_i32_9 : i32
    scf.if %12 {
      %c4_i32 = arith.constant 4 : i32
      %146 = arith.subi %1, %c4_i32 : i32
      %c0_165 = arith.constant 0 : index
      %147 = arith.index_cast %146 : i32 to index
      %c0_166 = arith.constant 0 : index
      %c0_167 = arith.constant 0 : index
      %148 = vector.load %arg2[%c0_165, %147, %c0_166, %c0_167] : memref<1x16x16x8xf32, #tpu.memory_space<vmem>>, vector<1x4x16x8xf32>
      %149 = vector.shape_cast %148 : vector<1x4x16x8xf32> to vector<4x16x8xf32>
      %c0_168 = arith.constant 0 : index
      %c2_169 = arith.constant 2 : index
      %c0_170 = arith.constant 0 : index
      %150 = vector.load %arg8[%c0_168, %c2_169, %c0_170] : memref<16x20x8xf32, #tpu.memory_space<vmem>>, vector<4x16x8xf32>
      tpu.vector_store %arg8[%c0_168, %c2_169, %c0_170], %149 {strides = array<i32>} : memref<16x20x8xf32, #tpu.memory_space<vmem>>, vector<4x16x8xf32>,
    } else {
    }
    %c0_i32_10 = arith.constant 0 : i32
    %13 = arith.cmpi eq, %arg1, %c0_i32_10 : i32
    %14 = arith.extui %13 : i1 to i32
    %c0_i32_11 = arith.constant 0 : i32
    %15 = arith.cmpi ne, %14, %c0_i32_11 : i32
    scf.if %15 {
      %cst_165 = arith.constant 0.000000e+00 : f32
      %146 = vector.broadcast %cst_165 : f32 to vector<4x16x8xf32>
      %c0_166 = arith.constant 0 : index
      %c2_167 = arith.constant 2 : index
      %c0_168 = arith.constant 0 : index
      %147 = vector.load %arg8[%c0_166, %c2_167, %c0_168] : memref<16x20x8xf32, #tpu.memory_space<vmem>>, vector<4x16x8xf32>
      tpu.vector_store %arg8[%c0_166, %c2_167, %c0_168], %146 {strides = array<i32>} : memref<16x20x8xf32, #tpu.memory_space<vmem>>, vector<4x16x8xf32>,
    } else {
    }
    %c1_i32 = arith.constant 1 : i32
    %16 = arith.cmpi slt, %arg1, %c1_i32 : i32
    %17 = arith.extui %16 : i1 to i32
    %c0_i32_12 = arith.constant 0 : i32
    %18 = arith.cmpi ne, %17, %c0_i32_12 : i32
    scf.if %18 {
      %c8_i32_165 = arith.constant 8 : i32
      %146 = arith.addi %1, %c8_i32_165 : i32
      %c0_166 = arith.constant 0 : index
      %147 = arith.index_cast %146 : i32 to index
      %c0_167 = arith.constant 0 : index
      %c0_168 = arith.constant 0 : index
      %148 = vector.load %arg2[%c0_166, %147, %c0_167, %c0_168] : memref<1x16x16x8xf32, #tpu.memory_space<vmem>>, vector<1x4x16x8xf32>
      %149 = vector.shape_cast %148 : vector<1x4x16x8xf32> to vector<4x16x8xf32>
      %c12 = arith.constant 12 : index
      %c2_169 = arith.constant 2 : index
      %c0_170 = arith.constant 0 : index
      %150 = vector.load %arg8[%c12, %c2_169, %c0_170] : memref<16x20x8xf32, #tpu.memory_space<vmem>>, vector<4x16x8xf32>
      tpu.vector_store %arg8[%c12, %c2_169, %c0_170], %149 {strides = array<i32>} : memref<16x20x8xf32, #tpu.memory_space<vmem>>, vector<4x16x8xf32>,
    } else {
    }
    %c1_i32_13 = arith.constant 1 : i32
    %19 = arith.cmpi eq, %arg1, %c1_i32_13 : i32
    %20 = arith.extui %19 : i1 to i32
    %c0_i32_14 = arith.constant 0 : i32
    %21 = arith.cmpi ne, %20, %c0_i32_14 : i32
    scf.if %21 {
      %cst_165 = arith.constant 0.000000e+00 : f32
      %146 = vector.broadcast %cst_165 : f32 to vector<4x16x8xf32>
      %c12 = arith.constant 12 : index
      %c2_166 = arith.constant 2 : index
      %c0_167 = arith.constant 0 : index
      %147 = vector.load %arg8[%c12, %c2_166, %c0_167] : memref<16x20x8xf32, #tpu.memory_space<vmem>>, vector<4x16x8xf32>
      tpu.vector_store %arg8[%c12, %c2_166, %c0_167], %146 {strides = array<i32>} : memref<16x20x8xf32, #tpu.memory_space<vmem>>, vector<4x16x8xf32>,
    } else {
    }
    %cst_15 = arith.constant 0.000000e+00 : f32
    %22 = vector.broadcast %cst_15 : f32 to vector<12x16x8xf32>
    %c0_16 = arith.constant 0 : index
    %c0_17 = arith.constant 0 : index
    %c0_18 = arith.constant 0 : index
    %23 = vector.load %arg8[%c0_16, %c0_17, %c0_18] : memref<16x20x8xf32, #tpu.memory_space<vmem>>, vector<12x16x8xf32>
    %c0_19 = arith.constant 0 : index
    %c0_20 = arith.constant 0 : index
    %c0_21 = arith.constant 0 : index
    %24 = vector.load %arg3[%c0_19, %c0_20, %c0_21] : memref<9x8x8xf32, #tpu.memory_space<vmem>>, vector<1x8x8xf32>
    %25 = vector.shape_cast %24 : vector<1x8x8xf32> to vector<8x8xf32>
    %cst_22 = arith.constant dense<0.000000e+00> : vector<12x16x8xf32>
    %26 = tpu.matmul %23, %25, %cst_22 {dimension_numbers = #tpu.dot_dimension_numbers<[2], [0], [0, 1], [1], [0, 0, 0, 1, 1, 1], [], []>} : vector<12x16x8xf32>, vector<8x8xf32>, vector<12x16x8xf32> -> vector<12x16x8xf32>
    %27 = arith.addf %22, %26 : vector<12x16x8xf32>
    %c0_23 = arith.constant 0 : index
    %c2_24 = arith.constant 2 : index
    %c0_25 = arith.constant 0 : index
    %28 = vector.load %arg8[%c0_23, %c2_24, %c0_25] : memref<16x20x8xf32, #tpu.memory_space<vmem>>, vector<12x16x8xf32>
    %c1 = arith.constant 1 : index
    %c0_26 = arith.constant 0 : index
    %c0_27 = arith.constant 0 : index
    %29 = vector.load %arg3[%c1, %c0_26, %c0_27] : memref<9x8x8xf32, #tpu.memory_space<vmem>>, vector<1x8x8xf32>
    %30 = vector.shape_cast %29 : vector<1x8x8xf32> to vector<8x8xf32>
    %cst_28 = arith.constant dense<0.000000e+00> : vector<12x16x8xf32>
    %31 = tpu.matmul %28, %30, %cst_28 {dimension_numbers = #tpu.dot_dimension_numbers<[2], [0], [0, 1], [1], [0, 0, 0, 1, 1, 1], [], []>} : vector<12x16x8xf32>, vector<8x8xf32>, vector<12x16x8xf32> -> vector<12x16x8xf32>
    %32 = arith.addf %27, %31 : vector<12x16x8xf32>
    %c0_29 = arith.constant 0 : index
    %c4_30 = arith.constant 4 : index
    %c0_31 = arith.constant 0 : index
    %33 = vector.load %arg8[%c0_29, %c4_30, %c0_31] : memref<16x20x8xf32, #tpu.memory_space<vmem>>, vector<12x16x8xf32>
    %c2_32 = arith.constant 2 : index
    %c0_33 = arith.constant 0 : index
    %c0_34 = arith.constant 0 : index
    %34 = vector.load %arg3[%c2_32, %c0_33, %c0_34] : memref<9x8x8xf32, #tpu.memory_space<vmem>>, vector<1x8x8xf32>
    %35 = vector.shape_cast %34 : vector<1x8x8xf32> to vector<8x8xf32>
    %cst_35 = arith.constant dense<0.000000e+00> : vector<12x16x8xf32>
    %36 = tpu.matmul %33, %35, %cst_35 {dimension_numbers = #tpu.dot_dimension_numbers<[2], [0], [0, 1], [1], [0, 0, 0, 1, 1, 1], [], []>} : vector<12x16x8xf32>, vector<8x8xf32>, vector<12x16x8xf32> -> vector<12x16x8xf32>
    %37 = arith.addf %32, %36 : vector<12x16x8xf32>
    %c2_36 = arith.constant 2 : index
    %c0_37 = arith.constant 0 : index
    %c0_38 = arith.constant 0 : index
    %38 = vector.load %arg8[%c2_36, %c0_37, %c0_38] : memref<16x20x8xf32, #tpu.memory_space<vmem>>, vector<12x16x8xf32>
    %c3 = arith.constant 3 : index
    %c0_39 = arith.constant 0 : index
    %c0_40 = arith.constant 0 : index
    %39 = vector.load %arg3[%c3, %c0_39, %c0_40] : memref<9x8x8xf32, #tpu.memory_space<vmem>>, vector<1x8x8xf32>
    %40 = vector.shape_cast %39 : vector<1x8x8xf32> to vector<8x8xf32>
    %cst_41 = arith.constant dense<0.000000e+00> : vector<12x16x8xf32>
    %41 = tpu.matmul %38, %40, %cst_41 {dimension_numbers = #tpu.dot_dimension_numbers<[2], [0], [0, 1], [1], [0, 0, 0, 1, 1, 1], [], []>} : vector<12x16x8xf32>, vector<8x8xf32>, vector<12x16x8xf32> -> vector<12x16x8xf32>
    %42 = arith.addf %37, %41 : vector<12x16x8xf32>
    %c2_42 = arith.constant 2 : index
    %c2_43 = arith.constant 2 : index
    %c0_44 = arith.constant 0 : index
    %43 = vector.load %arg8[%c2_42, %c2_43, %c0_44] : memref<16x20x8xf32, #tpu.memory_space<vmem>>, vector<12x16x8xf32>
    %c4_45 = arith.constant 4 : index
    %c0_46 = arith.constant 0 : index
    %c0_47 = arith.constant 0 : index
    %44 = vector.load %arg3[%c4_45, %c0_46, %c0_47] : memref<9x8x8xf32, #tpu.memory_space<vmem>>, vector<1x8x8xf32>
    %45 = vector.shape_cast %44 : vector<1x8x8xf32> to vector<8x8xf32>
    %cst_48 = arith.constant dense<0.000000e+00> : vector<12x16x8xf32>
    %46 = tpu.matmul %43, %45, %cst_48 {dimension_numbers = #tpu.dot_dimension_numbers<[2], [0], [0, 1], [1], [0, 0, 0, 1, 1, 1], [], []>} : vector<12x16x8xf32>, vector<8x8xf32>, vector<12x16x8xf32> -> vector<12x16x8xf32>
    %47 = arith.addf %42, %46 : vector<12x16x8xf32>
    %c2_49 = arith.constant 2 : index
    %c4_50 = arith.constant 4 : index
    %c0_51 = arith.constant 0 : index
    %48 = vector.load %arg8[%c2_49, %c4_50, %c0_51] : memref<16x20x8xf32, #tpu.memory_space<vmem>>, vector<12x16x8xf32>
    %c5 = arith.constant 5 : index
    %c0_52 = arith.constant 0 : index
    %c0_53 = arith.constant 0 : index
    %49 = vector.load %arg3[%c5, %c0_52, %c0_53] : memref<9x8x8xf32, #tpu.memory_space<vmem>>, vector<1x8x8xf32>
    %50 = vector.shape_cast %49 : vector<1x8x8xf32> to vector<8x8xf32>
    %cst_54 = arith.constant dense<0.000000e+00> : vector<12x16x8xf32>
    %51 = tpu.matmul %48, %50, %cst_54 {dimension_numbers = #tpu.dot_dimension_numbers<[2], [0], [0, 1], [1], [0, 0, 0, 1, 1, 1], [], []>} : vector<12x16x8xf32>, vector<8x8xf32>, vector<12x16x8xf32> -> vector<12x16x8xf32>
    %52 = arith.addf %47, %51 : vector<12x16x8xf32>
    %c4_55 = arith.constant 4 : index
    %c0_56 = arith.constant 0 : index
    %c0_57 = arith.constant 0 : index
    %53 = vector.load %arg8[%c4_55, %c0_56, %c0_57] : memref<16x20x8xf32, #tpu.memory_space<vmem>>, vector<12x16x8xf32>
    %c6 = arith.constant 6 : index
    %c0_58 = arith.constant 0 : index
    %c0_59 = arith.constant 0 : index
    %54 = vector.load %arg3[%c6, %c0_58, %c0_59] : memref<9x8x8xf32, #tpu.memory_space<vmem>>, vector<1x8x8xf32>
    %55 = vector.shape_cast %54 : vector<1x8x8xf32> to vector<8x8xf32>
    %cst_60 = arith.constant dense<0.000000e+00> : vector<12x16x8xf32>
    %56 = tpu.matmul %53, %55, %cst_60 {dimension_numbers = #tpu.dot_dimension_numbers<[2], [0], [0, 1], [1], [0, 0, 0, 1, 1, 1], [], []>} : vector<12x16x8xf32>, vector<8x8xf32>, vector<12x16x8xf32> -> vector<12x16x8xf32>
    %57 = arith.addf %52, %56 : vector<12x16x8xf32>
    %c4_61 = arith.constant 4 : index
    %c2_62 = arith.constant 2 : index
    %c0_63 = arith.constant 0 : index
    %58 = vector.load %arg8[%c4_61, %c2_62, %c0_63] : memref<16x20x8xf32, #tpu.memory_space<vmem>>, vector<12x16x8xf32>
    %c7 = arith.constant 7 : index
    %c0_64 = arith.constant 0 : index
    %c0_65 = arith.constant 0 : index
    %59 = vector.load %arg3[%c7, %c0_64, %c0_65] : memref<9x8x8xf32, #tpu.memory_space<vmem>>, vector<1x8x8xf32>
    %60 = vector.shape_cast %59 : vector<1x8x8xf32> to vector<8x8xf32>
    %cst_66 = arith.constant dense<0.000000e+00> : vector<12x16x8xf32>
    %61 = tpu.matmul %58, %60, %cst_66 {dimension_numbers = #tpu.dot_dimension_numbers<[2], [0], [0, 1], [1], [0, 0, 0, 1, 1, 1], [], []>} : vector<12x16x8xf32>, vector<8x8xf32>, vector<12x16x8xf32> -> vector<12x16x8xf32>
    %62 = arith.addf %57, %61 : vector<12x16x8xf32>
    %c4_67 = arith.constant 4 : index
    %c4_68 = arith.constant 4 : index
    %c0_69 = arith.constant 0 : index
    %63 = vector.load %arg8[%c4_67, %c4_68, %c0_69] : memref<16x20x8xf32, #tpu.memory_space<vmem>>, vector<12x16x8xf32>
    %c8 = arith.constant 8 : index
    %c0_70 = arith.constant 0 : index
    %c0_71 = arith.constant 0 : index
    %64 = vector.load %arg3[%c8, %c0_70, %c0_71] : memref<9x8x8xf32, #tpu.memory_space<vmem>>, vector<1x8x8xf32>
    %65 = vector.shape_cast %64 : vector<1x8x8xf32> to vector<8x8xf32>
    %cst_72 = arith.constant dense<0.000000e+00> : vector<12x16x8xf32>
    %66 = tpu.matmul %63, %65, %cst_72 {dimension_numbers = #tpu.dot_dimension_numbers<[2], [0], [0, 1], [1], [0, 0, 0, 1, 1, 1], [], []>} : vector<12x16x8xf32>, vector<8x8xf32>, vector<12x16x8xf32> -> vector<12x16x8xf32>
    %67 = arith.addf %62, %66 : vector<12x16x8xf32>
    %c0_73 = arith.constant 0 : index
    %c0_74 = arith.constant 0 : index
    %68 = vector.load %arg5[%c0_73, %c0_74] : memref<1x8xf32, #tpu.memory_space<vmem>>, vector<1x8xf32>
    %69 = vector.shape_cast %68 : vector<1x8xf32> to vector<8xf32>
    %70 = vector.shape_cast %69 : vector<8xf32> to vector<1x1x8xf32>
    %71 = vector.broadcast %70 : vector<1x1x8xf32> to vector<12x16x8xf32>
    %72 = arith.addf %67, %71 : vector<12x16x8xf32>
    %cst_75 = arith.constant 0.000000e+00 : f32
    %73 = vector.broadcast %cst_75 : f32 to vector<12x16x8xf32>
    %74 = arith.maximumf %72, %73 : vector<12x16x8xf32>
    %cst_76 = arith.constant 0.000000e+00 : f32
    %75 = vector.broadcast %cst_76 : f32 to vector<12x2x8xf32>
    %c0_77 = arith.constant 0 : index
    %c0_78 = arith.constant 0 : index
    %c0_79 = arith.constant 0 : index
    %76 = vector.load %arg9[%c0_77, %c0_78, %c0_79] : memref<12x20x8xf32, #tpu.memory_space<vmem>>, vector<12x2x8xf32>
    tpu.vector_store %arg9[%c0_77, %c0_78, %c0_79], %75 {strides = array<i32>} : memref<12x20x8xf32, #tpu.memory_space<vmem>>, vector<12x2x8xf32>,
    %cst_80 = arith.constant 0.000000e+00 : f32
    %77 = vector.broadcast %cst_80 : f32 to vector<12x2x8xf32>
    %c0_81 = arith.constant 0 : index
    %c18_82 = arith.constant 18 : index
    %c0_83 = arith.constant 0 : index
    %78 = vector.load %arg9[%c0_81, %c18_82, %c0_83] : memref<12x20x8xf32, #tpu.memory_space<vmem>>, vector<12x2x8xf32>
    tpu.vector_store %arg9[%c0_81, %c18_82, %c0_83], %77 {strides = array<i32>} : memref<12x20x8xf32, #tpu.memory_space<vmem>>, vector<12x2x8xf32>,
    %c0_84 = arith.constant 0 : index
    %c2_85 = arith.constant 2 : index
    %c0_86 = arith.constant 0 : index
    %79 = vector.load %arg9[%c0_84, %c2_85, %c0_86] : memref<12x20x8xf32, #tpu.memory_space<vmem>>, vector<12x16x8xf32>
    tpu.vector_store %arg9[%c0_84, %c2_85, %c0_86], %74 {strides = array<i32>} : memref<12x20x8xf32, #tpu.memory_space<vmem>>, vector<12x16x8xf32>,
    %c0_i32_87 = arith.constant 0 : i32
    %80 = arith.cmpi eq, %arg1, %c0_i32_87 : i32
    %81 = arith.extui %80 : i1 to i32
    %c0_i32_88 = arith.constant 0 : i32
    %82 = arith.cmpi ne, %81, %c0_i32_88 : i32
    scf.if %82 {
      %cst_165 = arith.constant 0.000000e+00 : f32
      %146 = vector.broadcast %cst_165 : f32 to vector<2x16x8xf32>
      %c0_166 = arith.constant 0 : index
      %c2_167 = arith.constant 2 : index
      %c0_168 = arith.constant 0 : index
      %147 = vector.load %arg9[%c0_166, %c2_167, %c0_168] : memref<12x20x8xf32, #tpu.memory_space<vmem>>, vector<2x16x8xf32>
      tpu.vector_store %arg9[%c0_166, %c2_167, %c0_168], %146 {strides = array<i32>} : memref<12x20x8xf32, #tpu.memory_space<vmem>>, vector<2x16x8xf32>,
    } else {
    }
    %c1_i32_89 = arith.constant 1 : i32
    %83 = arith.cmpi eq, %arg1, %c1_i32_89 : i32
    %84 = arith.extui %83 : i1 to i32
    %c0_i32_90 = arith.constant 0 : i32
    %85 = arith.cmpi ne, %84, %c0_i32_90 : i32
    scf.if %85 {
      %cst_165 = arith.constant 0.000000e+00 : f32
      %146 = vector.broadcast %cst_165 : f32 to vector<2x16x8xf32>
      %c10 = arith.constant 10 : index
      %c2_166 = arith.constant 2 : index
      %c0_167 = arith.constant 0 : index
      %147 = vector.load %arg9[%c10, %c2_166, %c0_167] : memref<12x20x8xf32, #tpu.memory_space<vmem>>, vector<2x16x8xf32>
      tpu.vector_store %arg9[%c10, %c2_166, %c0_167], %146 {strides = array<i32>} : memref<12x20x8xf32, #tpu.memory_space<vmem>>, vector<2x16x8xf32>,
    } else {
    }
    %cst_91 = arith.constant 0.000000e+00 : f32
    %86 = vector.broadcast %cst_91 : f32 to vector<8x16x8xf32>
    %c0_92 = arith.constant 0 : index
    %c0_93 = arith.constant 0 : index
    %c0_94 = arith.constant 0 : index
    %87 = vector.load %arg9[%c0_92, %c0_93, %c0_94] : memref<12x20x8xf32, #tpu.memory_space<vmem>>, vector<8x16x8xf32>
    %c0_95 = arith.constant 0 : index
    %c0_96 = arith.constant 0 : index
    %c0_97 = arith.constant 0 : index
    %88 = vector.load %arg4[%c0_95, %c0_96, %c0_97] : memref<9x8x8xf32, #tpu.memory_space<vmem>>, vector<1x8x8xf32>
    %89 = vector.shape_cast %88 : vector<1x8x8xf32> to vector<8x8xf32>
    %cst_98 = arith.constant dense<0.000000e+00> : vector<8x16x8xf32>
    %90 = tpu.matmul %87, %89, %cst_98 {dimension_numbers = #tpu.dot_dimension_numbers<[2], [0], [0, 1], [1], [0, 0, 0, 1, 1, 1], [], []>} : vector<8x16x8xf32>, vector<8x8xf32>, vector<8x16x8xf32> -> vector<8x16x8xf32>
    %91 = arith.addf %86, %90 : vector<8x16x8xf32>
    %c0_99 = arith.constant 0 : index
    %c2_100 = arith.constant 2 : index
    %c0_101 = arith.constant 0 : index
    %92 = vector.load %arg9[%c0_99, %c2_100, %c0_101] : memref<12x20x8xf32, #tpu.memory_space<vmem>>, vector<8x16x8xf32>
    %c1_102 = arith.constant 1 : index
    %c0_103 = arith.constant 0 : index
    %c0_104 = arith.constant 0 : index
    %93 = vector.load %arg4[%c1_102, %c0_103, %c0_104] : memref<9x8x8xf32, #tpu.memory_space<vmem>>, vector<1x8x8xf32>
    %94 = vector.shape_cast %93 : vector<1x8x8xf32> to vector<8x8xf32>
    %cst_105 = arith.constant dense<0.000000e+00> : vector<8x16x8xf32>
    %95 = tpu.matmul %92, %94, %cst_105 {dimension_numbers = #tpu.dot_dimension_numbers<[2], [0], [0, 1], [1], [0, 0, 0, 1, 1, 1], [], []>} : vector<8x16x8xf32>, vector<8x8xf32>, vector<8x16x8xf32> -> vector<8x16x8xf32>
    %96 = arith.addf %91, %95 : vector<8x16x8xf32>
    %c0_106 = arith.constant 0 : index
    %c4_107 = arith.constant 4 : index
    %c0_108 = arith.constant 0 : index
    %97 = vector.load %arg9[%c0_106, %c4_107, %c0_108] : memref<12x20x8xf32, #tpu.memory_space<vmem>>, vector<8x16x8xf32>
    %c2_109 = arith.constant 2 : index
    %c0_110 = arith.constant 0 : index
    %c0_111 = arith.constant 0 : index
    %98 = vector.load %arg4[%c2_109, %c0_110, %c0_111] : memref<9x8x8xf32, #tpu.memory_space<vmem>>, vector<1x8x8xf32>
    %99 = vector.shape_cast %98 : vector<1x8x8xf32> to vector<8x8xf32>
    %cst_112 = arith.constant dense<0.000000e+00> : vector<8x16x8xf32>
    %100 = tpu.matmul %97, %99, %cst_112 {dimension_numbers = #tpu.dot_dimension_numbers<[2], [0], [0, 1], [1], [0, 0, 0, 1, 1, 1], [], []>} : vector<8x16x8xf32>, vector<8x8xf32>, vector<8x16x8xf32> -> vector<8x16x8xf32>
    %101 = arith.addf %96, %100 : vector<8x16x8xf32>
    %c2_113 = arith.constant 2 : index
    %c0_114 = arith.constant 0 : index
    %c0_115 = arith.constant 0 : index
    %102 = vector.load %arg9[%c2_113, %c0_114, %c0_115] : memref<12x20x8xf32, #tpu.memory_space<vmem>>, vector<8x16x8xf32>
    %c3_116 = arith.constant 3 : index
    %c0_117 = arith.constant 0 : index
    %c0_118 = arith.constant 0 : index
    %103 = vector.load %arg4[%c3_116, %c0_117, %c0_118] : memref<9x8x8xf32, #tpu.memory_space<vmem>>, vector<1x8x8xf32>
    %104 = vector.shape_cast %103 : vector<1x8x8xf32> to vector<8x8xf32>
    %cst_119 = arith.constant dense<0.000000e+00> : vector<8x16x8xf32>
    %105 = tpu.matmul %102, %104, %cst_119 {dimension_numbers = #tpu.dot_dimension_numbers<[2], [0], [0, 1], [1], [0, 0, 0, 1, 1, 1], [], []>} : vector<8x16x8xf32>, vector<8x8xf32>, vector<8x16x8xf32> -> vector<8x16x8xf32>
    %106 = arith.addf %101, %105 : vector<8x16x8xf32>
    %c2_120 = arith.constant 2 : index
    %c2_121 = arith.constant 2 : index
    %c0_122 = arith.constant 0 : index
    %107 = vector.load %arg9[%c2_120, %c2_121, %c0_122] : memref<12x20x8xf32, #tpu.memory_space<vmem>>, vector<8x16x8xf32>
    %c4_123 = arith.constant 4 : index
    %c0_124 = arith.constant 0 : index
    %c0_125 = arith.constant 0 : index
    %108 = vector.load %arg4[%c4_123, %c0_124, %c0_125] : memref<9x8x8xf32, #tpu.memory_space<vmem>>, vector<1x8x8xf32>
    %109 = vector.shape_cast %108 : vector<1x8x8xf32> to vector<8x8xf32>
    %cst_126 = arith.constant dense<0.000000e+00> : vector<8x16x8xf32>
    %110 = tpu.matmul %107, %109, %cst_126 {dimension_numbers = #tpu.dot_dimension_numbers<[2], [0], [0, 1], [1], [0, 0, 0, 1, 1, 1], [], []>} : vector<8x16x8xf32>, vector<8x8xf32>, vector<8x16x8xf32> -> vector<8x16x8xf32>
    %111 = arith.addf %106, %110 : vector<8x16x8xf32>
    %c2_127 = arith.constant 2 : index
    %c4_128 = arith.constant 4 : index
    %c0_129 = arith.constant 0 : index
    %112 = vector.load %arg9[%c2_127, %c4_128, %c0_129] : memref<12x20x8xf32, #tpu.memory_space<vmem>>, vector<8x16x8xf32>
    %c5_130 = arith.constant 5 : index
    %c0_131 = arith.constant 0 : index
    %c0_132 = arith.constant 0 : index
    %113 = vector.load %arg4[%c5_130, %c0_131, %c0_132] : memref<9x8x8xf32, #tpu.memory_space<vmem>>, vector<1x8x8xf32>
    %114 = vector.shape_cast %113 : vector<1x8x8xf32> to vector<8x8xf32>
    %cst_133 = arith.constant dense<0.000000e+00> : vector<8x16x8xf32>
    %115 = tpu.matmul %112, %114, %cst_133 {dimension_numbers = #tpu.dot_dimension_numbers<[2], [0], [0, 1], [1], [0, 0, 0, 1, 1, 1], [], []>} : vector<8x16x8xf32>, vector<8x8xf32>, vector<8x16x8xf32> -> vector<8x16x8xf32>
    %116 = arith.addf %111, %115 : vector<8x16x8xf32>
    %c4_134 = arith.constant 4 : index
    %c0_135 = arith.constant 0 : index
    %c0_136 = arith.constant 0 : index
    %117 = vector.load %arg9[%c4_134, %c0_135, %c0_136] : memref<12x20x8xf32, #tpu.memory_space<vmem>>, vector<8x16x8xf32>
    %c6_137 = arith.constant 6 : index
    %c0_138 = arith.constant 0 : index
    %c0_139 = arith.constant 0 : index
    %118 = vector.load %arg4[%c6_137, %c0_138, %c0_139] : memref<9x8x8xf32, #tpu.memory_space<vmem>>, vector<1x8x8xf32>
    %119 = vector.shape_cast %118 : vector<1x8x8xf32> to vector<8x8xf32>
    %cst_140 = arith.constant dense<0.000000e+00> : vector<8x16x8xf32>
    %120 = tpu.matmul %117, %119, %cst_140 {dimension_numbers = #tpu.dot_dimension_numbers<[2], [0], [0, 1], [1], [0, 0, 0, 1, 1, 1], [], []>} : vector<8x16x8xf32>, vector<8x8xf32>, vector<8x16x8xf32> -> vector<8x16x8xf32>
    %121 = arith.addf %116, %120 : vector<8x16x8xf32>
    %c4_141 = arith.constant 4 : index
    %c2_142 = arith.constant 2 : index
    %c0_143 = arith.constant 0 : index
    %122 = vector.load %arg9[%c4_141, %c2_142, %c0_143] : memref<12x20x8xf32, #tpu.memory_space<vmem>>, vector<8x16x8xf32>
    %c7_144 = arith.constant 7 : index
    %c0_145 = arith.constant 0 : index
    %c0_146 = arith.constant 0 : index
    %123 = vector.load %arg4[%c7_144, %c0_145, %c0_146] : memref<9x8x8xf32, #tpu.memory_space<vmem>>, vector<1x8x8xf32>
    %124 = vector.shape_cast %123 : vector<1x8x8xf32> to vector<8x8xf32>
    %cst_147 = arith.constant dense<0.000000e+00> : vector<8x16x8xf32>
    %125 = tpu.matmul %122, %124, %cst_147 {dimension_numbers = #tpu.dot_dimension_numbers<[2], [0], [0, 1], [1], [0, 0, 0, 1, 1, 1], [], []>} : vector<8x16x8xf32>, vector<8x8xf32>, vector<8x16x8xf32> -> vector<8x16x8xf32>
    %126 = arith.addf %121, %125 : vector<8x16x8xf32>
    %c4_148 = arith.constant 4 : index
    %c4_149 = arith.constant 4 : index
    %c0_150 = arith.constant 0 : index
    %127 = vector.load %arg9[%c4_148, %c4_149, %c0_150] : memref<12x20x8xf32, #tpu.memory_space<vmem>>, vector<8x16x8xf32>
    %c8_151 = arith.constant 8 : index
    %c0_152 = arith.constant 0 : index
    %c0_153 = arith.constant 0 : index
    %128 = vector.load %arg4[%c8_151, %c0_152, %c0_153] : memref<9x8x8xf32, #tpu.memory_space<vmem>>, vector<1x8x8xf32>
    %129 = vector.shape_cast %128 : vector<1x8x8xf32> to vector<8x8xf32>
    %cst_154 = arith.constant dense<0.000000e+00> : vector<8x16x8xf32>
    %130 = tpu.matmul %127, %129, %cst_154 {dimension_numbers = #tpu.dot_dimension_numbers<[2], [0], [0, 1], [1], [0, 0, 0, 1, 1, 1], [], []>} : vector<8x16x8xf32>, vector<8x8xf32>, vector<8x16x8xf32> -> vector<8x16x8xf32>
    %131 = arith.addf %126, %130 : vector<8x16x8xf32>
    %c0_155 = arith.constant 0 : index
    %c0_156 = arith.constant 0 : index
    %132 = vector.load %arg6[%c0_155, %c0_156] : memref<1x8xf32, #tpu.memory_space<vmem>>, vector<1x8xf32>
    %133 = vector.shape_cast %132 : vector<1x8xf32> to vector<8xf32>
    %134 = vector.shape_cast %133 : vector<8xf32> to vector<1x1x8xf32>
    %135 = vector.broadcast %134 : vector<1x1x8xf32> to vector<8x16x8xf32>
    %136 = arith.addf %131, %135 : vector<8x16x8xf32>
    %c0_157 = arith.constant 0 : index
    %137 = arith.index_cast %1 : i32 to index
    %c0_158 = arith.constant 0 : index
    %c0_159 = arith.constant 0 : index
    %138 = vector.load %arg2[%c0_157, %137, %c0_158, %c0_159] : memref<1x16x16x8xf32, #tpu.memory_space<vmem>>, vector<1x8x16x8xf32>
    %139 = vector.shape_cast %138 : vector<1x8x16x8xf32> to vector<8x16x8xf32>
    %140 = arith.addf %136, %139 : vector<8x16x8xf32>
    %cst_160 = arith.constant 0.000000e+00 : f32
    %141 = vector.broadcast %cst_160 : f32 to vector<8x16x8xf32>
    %142 = arith.maximumf %140, %141 : vector<8x16x8xf32>
    %c0_161 = arith.constant 0 : index
    %c0_162 = arith.constant 0 : index
    %c0_163 = arith.constant 0 : index
    %c0_164 = arith.constant 0 : index
    %143 = vector.load %arg7[%c0_161, %c0_162, %c0_163, %c0_164] : memref<1x8x16x8xf32, #tpu.memory_space<vmem>>, vector<1x8x16x8xf32>
    %144 = vector.shape_cast %143 : vector<1x8x16x8xf32> to vector<8x16x8xf32>
    %145 = vector.shape_cast %142 : vector<8x16x8xf32> to vector<1x8x16x8xf32>
    tpu.vector_store %arg7[%c0_161, %c0_162, %c0_163, %c0_164], %145 {strides = array<i32>} : memref<1x8x16x8xf32, #tpu.memory_space<vmem>>, vector<1x8x16x8xf32>,
    return
  }
  func.func @transform_0(%arg0: i32, %arg1: i32) -> (i32, i32, i32, i32) {
    %c0_i32 = arith.constant 0 : i32
    %c0_i32_0 = arith.constant 0 : i32
    %c0_i32_1 = arith.constant 0 : i32
    %c0_i32_2 = arith.constant 0 : i32
    return %arg0, %c0_i32, %c0_i32_0, %c0_i32_1 : i32, i32, i32, i32
  }
  func.func @transform_1(%arg0: i32, %arg1: i32) -> (i32, i32, i32) {
    %c0_i32 = arith.constant 0 : i32
    %c0_i32_0 = arith.constant 0 : i32
    %c0_i32_1 = arith.constant 0 : i32
    %c0_i32_2 = arith.constant 0 : i32
    return %c0_i32, %c0_i32_0, %c0_i32_1 : i32, i32, i32
  }
  func.func @transform_2(%arg0: i32, %arg1: i32) -> (i32, i32, i32) {
    %c0_i32 = arith.constant 0 : i32
    %c0_i32_0 = arith.constant 0 : i32
    %c0_i32_1 = arith.constant 0 : i32
    %c0_i32_2 = arith.constant 0 : i32
    return %c0_i32, %c0_i32_0, %c0_i32_1 : i32, i32, i32
  }
  func.func @transform_3(%arg0: i32, %arg1: i32) -> (i32, i32) {
    %c0_i32 = arith.constant 0 : i32
    %c0_i32_0 = arith.constant 0 : i32
    %c0_i32_1 = arith.constant 0 : i32
    return %c0_i32, %c0_i32_0 : i32, i32
  }
  func.func @transform_4(%arg0: i32, %arg1: i32) -> (i32, i32) {
    %c0_i32 = arith.constant 0 : i32
    %c0_i32_0 = arith.constant 0 : i32
    %c0_i32_1 = arith.constant 0 : i32
    return %c0_i32, %c0_i32_0 : i32, i32
  }
  func.func @transform_5(%arg0: i32, %arg1: i32) -> (i32, i32, i32, i32) {
    %c0_i32 = arith.constant 0 : i32
    %c0_i32_0 = arith.constant 0 : i32
    %c0_i32_1 = arith.constant 0 : i32
    return %arg0, %arg1, %c0_i32, %c0_i32_0 : i32, i32, i32, i32
  }
}

</mosaic_0001>

<bundles_post_ra>
// kernel: tpu_custom_call.1
= control target key start
LH: loop header
LB: loop body
LE: loop exit
PB: predicated region body
PF: predicated region fallthrough
CT: control target
= control target key end

     0   :  { %s6912_s18 = smov 0   ;;  %s6914_s19 = smov 0   ;;  %s8758_s0 = inlined_call_operand.vmem [shape: f32[2,16,16,8], index: 0, kind: input, shape index: {}]   ;;  %s8759_s1 = inlined_call_operand.vmem [shape: f32[9,8,8], index: 1, kind: input, shape index: {}]   ;;  %s8760_s2 = inlined_call_operand.vmem [shape: f32[9,8,8], index: 2, kind: input, shape index: {}]   ;;  %s8761_s3 = inlined_call_operand.vmem [shape: f32[1,8], index: 3, kind: input, shape index: {}]   ;;  %s8762_s4 = inlined_call_operand.vmem [shape: f32[1,8], index: 4, kind: input, shape index: {}]   ;;  %s8763_s5 = inlined_call_operand.vmem [shape: f32[2,16,16,8], index: 5, kind: output, shape index: {}]  }
   0x1   :  { %s6916_s20 = smov 0   ;;  %s6918_s21 = smov 0  }
   0x2   :  { %s6920_s22 = smov 0  }
   0x3 LB: > { %s24_s23 = sadd.s32 1, %s6867_s20  ;;  %s27_s24 = sadd.s32 1, %s6871_s21  ;;  %s6875_s22 = sphi %s6920_s22, %s15_s22   ;;  %s6871_s21 = sphi %s6918_s21, %s8885_s21   ;;  %s6867_s20 = sphi %s6916_s20, %s8884_s20   ;;  %s6863_s19 = sphi %s6914_s19, %s8883_s19   ;;  %s6859_s18 = sphi %s6912_s18, %s8882_s18  }
   0x4   : > { %p25_p0 = scmp.ge.s32.totalorder %s24_s23, 2  ;;  %p5426_p1 = scmp.ge.s32.totalorder %s6875_s22, 1 }
   0x5   : > { %p201_p2 = scmp.lt.s32.totalorder %s6875_s22, 5 }
   0x6   : > { %s8887_s23 = smov (%p25_p0, %s24_s23), 0  ;;  %s8889_s24 = smov (!%p25_p0, %s27_s24), %s6871_s21 }
   0x7   : > { %p202_p3 = pnand %p5426_p1, %p201_p2  ;;  %p29_p4 = scmp.ge.s32.totalorder %s8889_s24, 2 }
   0x9   : > { %s8891_s24 = smov (%p29_p4, %s8889_s24), 0  ;;  %205 = sbr.rel (%p202_p3) target bundleno = 890 (0x37a), region = 40 }
   0xe   : > { %vm251_vm0 = vcmask 58368   ;;  %p234_p5 = scmp.lt.s32.totalorder %s6863_s19, 1  ;;  %s6948_s25 = sshll.u32 %s6859_s18, 3  ;;  %v6877_v0 = vmov 0.0   ;;  %vm303_vm1 = vcmask 64512  }
   0xf   : > { %252 = vst.msk [vmem:[#allocation2] sm:$0x3] %vm251_vm0, %v6877_v0  ;;  %253 = vst.msk [vmem:[#allocation2 + $0x18] sm:$0x3] %vm251_vm0, %v6877_v0  ;;  %p242_p6 = scmp.lt.s32.totalorder %s6948_s25, 15  ;;  %s5834_s26 = sshll.u32 %s6859_s18, 7 }
  0x10   : > { %254 = vst.msk [vmem:[#allocation2 + $0x30] sm:$0x3] %vm251_vm0, %v6877_v0  ;;  %255 = vst.msk [vmem:[#allocation2 + $0x48] sm:$0x3] %vm251_vm0, %v6877_v0  ;;  %s8893_s19 = smov (!%p234_p5, %s6863_s19), 1  ;;  %p5435_p7 = scmp.le.s32.totalorder %s6859_s18, 0 }
  0x11   : > { %256 = vst.msk [vmem:[#allocation2 + $0x60] sm:$0x3] %vm251_vm0, %v6877_v0  ;;  %257 = vst.msk [vmem:[#allocation2 + $0x78] sm:$0x3] %vm251_vm0, %v6877_v0  ;;  %s243_s27 = scalar_select %p242_p6, %s6948_s25, 15 }
  0x12   : > { %258 = vst.msk [vmem:[#allocation2 + $0x90] sm:$0x3] %vm251_vm0, %v6877_v0  ;;  %259 = vst.msk [vmem:[#allocation2 + $0xa8] sm:$0x3] %vm251_vm0, %v6877_v0  ;;  %s5833_s28 = sshll.u32 %s8893_s19, 8  ;;  %s5431_s29 = sshll.u32 %s8893_s19, 5 }
  0x13   : > { %260 = vst.msk [vmem:[#allocation2 + $0xc0] sm:$0x3] %vm251_vm0, %v6877_v0  ;;  %261 = vst.msk [vmem:[#allocation2 + $0xd8] sm:$0x3] %vm251_vm0, %v6877_v0  ;;  %s7023_s7 = scalar_lea.vmem %s8758_s0, %s5833_s28  ;;  %s5430_s8 = sshll.u32 %s243_s27, 1 }
  0x14   : > { %262 = vst.msk [vmem:[#allocation2 + $0xf0] sm:$0x3] %vm251_vm0, %v6877_v0  ;;  %263 = vst.msk [vmem:[#allocation2 + $0x108] sm:$0x3] %vm251_vm0, %v6877_v0  ;;  %s246_s9 = sadd.s32 %s5431_s29, %s5430_s8  ;;  %s7026_s10 = scalar_lea.vmem %s7023_s7, %s5834_s26 }
  0x15   : > { %264 = vst.msk [vmem:[#allocation2 + $0x120] sm:$0x3] %vm251_vm0, %v6877_v0  ;;  %265 = vst.msk [vmem:[#allocation2 + $0x138] sm:$0x3] %vm251_vm0, %v6877_v0  ;;  %s5432_s11 = sshll.u32 %s246_s9, 3  ;;  %v286_v1 = vld [vmem:[%s7026_s10] sm:$0xff] }
  0x16   : > { %266 = vst.msk [vmem:[#allocation2 + $0x150] sm:$0x3] %vm251_vm0, %v6877_v0  ;;  %267 = vst.msk [vmem:[#allocation2 + $0x168] sm:$0x3] %vm251_vm0, %v6877_v0  ;;  %v287_v2 = vld [vmem:[%s7026_s10 + $0x8] sm:$0xff]  ;;  %v288_v3 = vld [vmem:[%s7026_s10 + $0x10] sm:$0xff]  ;;  %s7034_s14 = scalar_lea.vmem %s8763_s5, %s5432_s11 }
  0x17   : > { %268 = vst.msk [vmem:[#allocation2 + $0x12] sm:$0x3] %vm251_vm0, %v6877_v0  ;;  %269 = vst.msk [vmem:[#allocation2 + $0x2a] sm:$0x3] %vm251_vm0, %v6877_v0  ;;  %v289_v4 = vld [vmem:[%s7026_s10 + $0x18] sm:$0xff]  ;;  %v290_v5 = vld [vmem:[%s7026_s10 + $0x20] sm:$0xff] }
  0x18   : > { %270 = vst.msk [vmem:[#allocation2 + $0x42] sm:$0x3] %vm251_vm0, %v6877_v0  ;;  %271 = vst.msk [vmem:[#allocation2 + $0x5a] sm:$0x3] %vm251_vm0, %v6877_v0  ;;  %v291_v6 = vld [vmem:[%s7026_s10 + $0x28] sm:$0xff]  ;;  %v292_v7 = vld [vmem:[%s7026_s10 + $0x30] sm:$0xff] }
  0x19   : > { %272 = vst.msk [vmem:[#allocation2 + $0x72] sm:$0x3] %vm251_vm0, %v6877_v0  ;;  %273 = vst.msk [vmem:[#allocation2 + $0x8a] sm:$0x3] %vm251_vm0, %v6877_v0  ;;  %v293_v8 = vld [vmem:[%s7026_s10 + $0x38] sm:$0xff]  ;;  %v294_v9 = vld [vmem:[%s7026_s10 + $0x40] sm:$0xff] }
  0x1a   : > { %274 = vst.msk [vmem:[#allocation2 + $0xa2] sm:$0x3] %vm251_vm0, %v6877_v0  ;;  %275 = vst.msk [vmem:[#allocation2 + $0xba] sm:$0x3] %vm251_vm0, %v6877_v0  ;;  %v295_v10 = vld [vmem:[%s7026_s10 + $0x48] sm:$0xff]  ;;  %v296_v11 = vld [vmem:[%s7026_s10 + $0x50] sm:$0xff] }
  0x1b   : > { %276 = vst.msk [vmem:[#allocation2 + $0xd2] sm:$0x3] %vm251_vm0, %v6877_v0  ;;  %277 = vst.msk [vmem:[#allocation2 + $0xea] sm:$0x3] %vm251_vm0, %v6877_v0  ;;  %v297_v12 = vld [vmem:[%s7026_s10 + $0x58] sm:$0xff]  ;;  %v298_v13 = vld [vmem:[%s7026_s10 + $0x60] sm:$0xff] }
  0x1c   : > { %278 = vst.msk [vmem:[#allocation2 + $0x102] sm:$0x3] %vm251_vm0, %v6877_v0  ;;  %279 = vst.msk [vmem:[#allocation2 + $0x11a] sm:$0x3] %vm251_vm0, %v6877_v0  ;;  %v299_v14 = vld [vmem:[%s7026_s10 + $0x68] sm:$0xff]  ;;  %v300_v15 = vld [vmem:[%s7026_s10 + $0x70] sm:$0xff] }
  0x1d   : > { %280 = vst.msk [vmem:[#allocation2 + $0x132] sm:$0x3] %vm251_vm0, %v6877_v0  ;;  %281 = vst.msk [vmem:[#allocation2 + $0x14a] sm:$0x3] %vm251_vm0, %v6877_v0  ;;  %v301_v16 = vld [vmem:[%s7026_s10 + $0x78] sm:$0xff]  ;;  %s5436_s15 = sadd.s32 (!%p5435_p7), 4294967292, %s6948_s25 }
  0x1e   : > { %282 = vst.msk [vmem:[#allocation2 + $0x162] sm:$0x3] %vm251_vm0, %v6877_v0  ;;  %283 = vst.msk [vmem:[#allocation2 + $0x17a] sm:$0x3] %vm251_vm0, %v6877_v0  ;;  %s5437_s16 = sshll.u32 (!%p5435_p7), %s5436_s15, 4 }
  0x1f   : > { %304 = vst.msk [vmem:[#allocation2 + $0x62] sm:$0xff] %vm303_vm1, %v286_v1  ;;  %305 = vst.msk [vmem:[#allocation2 + $0x6a] sm:$0xff] %vm303_vm1, %v287_v2  ;;  %s326_s17 = scalar_lea.vmem (!%p5435_p7), %s7023_s7, %s5437_s16 }
  0x20   : > { %306 = vst.msk [vmem:[#allocation2 + $0x7a] sm:$0xff] %vm303_vm1, %v288_v3  ;;  %307 = vst.msk [vmem:[#allocation2 + $0x82] sm:$0xff] %vm303_vm1, %v289_v4 }
  0x21   : > { %308 = vst.msk [vmem:[#allocation2 + $0x92] sm:$0xff] %vm303_vm1, %v290_v5  ;;  %309 = vst.msk [vmem:[#allocation2 + $0x9a] sm:$0xff] %vm303_vm1, %v291_v6 }
  0x22   : > { %310 = vst.msk [vmem:[#allocation2 + $0xaa] sm:$0xff] %vm303_vm1, %v292_v7  ;;  %311 = vst.msk [vmem:[#allocation2 + $0xb2] sm:$0xff] %vm303_vm1, %v293_v8  ;;  %323 = sbr.rel (%p5435_p7) target bundleno = 44 (0x2c), region = 44 }
  0x23   : > { %312 = vst.msk [vmem:[#allocation2 + $0xc2] sm:$0xff] %vm303_vm1, %v294_v9  ;;  %313 = vst.msk [vmem:[#allocation2 + $0xca] sm:$0xff] %vm303_vm1, %v295_v10 }
  0x24   : > { %314 = vst.msk [vmem:[#allocation2 + $0xda] sm:$0xff] %vm303_vm1, %v296_v11  ;;  %315 = vst.msk [vmem:[#allocation2 + $0xe2] sm:$0xff] %vm303_vm1, %v297_v12 }
  0x25   : > { %316 = vst.msk [vmem:[#allocation2 + $0xf2] sm:$0xff] %vm303_vm1, %v298_v13  ;;  %317 = vst.msk [vmem:[#allocation2 + $0xfa] sm:$0xff] %vm303_vm1, %v299_v14 }
  0x26   : > { %318 = vst.msk [vmem:[#allocation2 + $0x10a] sm:$0xff] %vm303_vm1, %v300_v15  ;;  %319 = vst.msk [vmem:[#allocation2 + $0x112] sm:$0xff] %vm303_vm1, %v301_v16 }
  0x27   : > { %v327_v17 = vld [vmem:[%s326_s17] sm:$0xff]  ;;  %v328_v18 = vld [vmem:[%s326_s17 + $0x8] sm:$0xff]  ;;  %v329_v19 = vld [vmem:[%s326_s17 + $0x10] sm:$0xff] }
  0x28   : > { %335 = vst.msk [vmem:[#allocation2 + $0x2] sm:$0xff] %vm303_vm1, %v327_v17  ;;  %336 = vst.msk [vmem:[#allocation2 + $0xa] sm:$0xff] %vm303_vm1, %v328_v18  ;;  %v330_v20 = vld [vmem:[%s326_s17 + $0x18] sm:$0xff]  ;;  %v331_v21 = vld [vmem:[%s326_s17 + $0x20] sm:$0xff] }
  0x29   : > { %337 = vst.msk [vmem:[#allocation2 + $0x1a] sm:$0xff] %vm303_vm1, %v329_v19  ;;  %v332_v22 = vld [vmem:[%s326_s17 + $0x28] sm:$0xff]  ;;  %338 = vst.msk [vmem:[#allocation2 + $0x22] sm:$0xff] %vm303_vm1, %v330_v20  ;;  %v333_v23 = vld [vmem:[%s326_s17 + $0x30] sm:$0xff] }
  0x2a   : > { %339 = vst.msk [vmem:[#allocation2 + $0x32] sm:$0xff] %vm303_vm1, %v331_v21  ;;  %340 = vst.msk [vmem:[#allocation2 + $0x3a] sm:$0xff] %vm303_vm1, %v332_v22  ;;  %v334_v24 = vld [vmem:[%s326_s17 + $0x38] sm:$0xff] }
  0x2b   : > { %341 = vst.msk [vmem:[#allocation2 + $0x4a] sm:$0xff] %vm303_vm1, %v333_v23  ;;  %342 = vst.msk [vmem:[#allocation2 + $0x52] sm:$0xff] %vm303_vm1, %v334_v24 }
  0x2c PF: > { %p5438_p8 = scmp.ne.s32.totalorder %s6859_s18, 0 }
  0x2e   : > { %346 = sbr.rel (%p5438_p8) target bundleno = 56 (0x38), region = 48 }
  0x33   : > { %v6878_v25 = vmov 0.0  }
  0x34   : > { %347 = vst.msk [vmem:[#allocation2 + $0x2] sm:$0xff] %vm303_vm1, %v6878_v25  ;;  %348 = vst.msk [vmem:[#allocation2 + $0xa] sm:$0xff] %vm303_vm1, %v6878_v25 }
  0x35   : > { %349 = vst.msk [vmem:[#allocation2 + $0x1a] sm:$0xff] %vm303_vm1, %v6878_v25  ;;  %350 = vst.msk [vmem:[#allocation2 + $0x22] sm:$0xff] %vm303_vm1, %v6878_v25 }
  0x36   : > { %351 = vst.msk [vmem:[#allocation2 + $0x32] sm:$0xff] %vm303_vm1, %v6878_v25  ;;  %352 = vst.msk [vmem:[#allocation2 + $0x3a] sm:$0xff] %vm303_vm1, %v6878_v25 }
  0x37   : > { %353 = vst.msk [vmem:[#allocation2 + $0x4a] sm:$0xff] %vm303_vm1, %v6878_v25  ;;  %354 = vst.msk [vmem:[#allocation2 + $0x52] sm:$0xff] %vm303_vm1, %v6878_v25 }
  0x38 PF: > { %p5439_p9 = scmp.ge.s32.totalorder %s6859_s18, 1 }
  0x3a   : > { %358 = sbr.rel (%p5439_p9) target bundleno = 68 (0x44), region = 52 }
  0x3f   : > { %v5442_v26 = vld [vmem:[%s7026_s10 + $0x80] sm:$0xff]  ;;  %v5443_v27 = vld [vmem:[%s7026_s10 + $0x88] sm:$0xff]  ;;  %v5444_v28 = vld [vmem:[%s7026_s10 + $0x90] sm:$0xff] }
  0x40   : > { %371 = vst.msk [vmem:[#allocation2 + $0x122] sm:$0xff] %vm303_vm1, %v5442_v26  ;;  %372 = vst.msk [vmem:[#allocation2 + $0x12a] sm:$0xff] %vm303_vm1, %v5443_v27  ;;  %v5445_v29 = vld [vmem:[%s7026_s10 + $0x98] sm:$0xff]  ;;  %v5446_v30 = vld [vmem:[%s7026_s10 + $0xa0] sm:$0xff] }
  0x41   : > { %373 = vst.msk [vmem:[#allocation2 + $0x13a] sm:$0xff] %vm303_vm1, %v5444_v28  ;;  %v5447_v31 = vld [vmem:[%s7026_s10 + $0xa8] sm:$0xff]  ;;  %374 = vst.msk [vmem:[#allocation2 + $0x142] sm:$0xff] %vm303_vm1, %v5445_v29  ;;  %v5448_v32 = vld [vmem:[%s7026_s10 + $0xb0] sm:$0xff] }
  0x42   : > { %375 = vst.msk [vmem:[#allocation2 + $0x152] sm:$0xff] %vm303_vm1, %v5446_v30  ;;  %376 = vst.msk [vmem:[#allocation2 + $0x15a] sm:$0xff] %vm303_vm1, %v5447_v31  ;;  %v5449_v33 = vld [vmem:[%s7026_s10 + $0xb8] sm:$0xff] }
  0x43   : > { %377 = vst.msk [vmem:[#allocation2 + $0x16a] sm:$0xff] %vm303_vm1, %v5448_v32  ;;  %378 = vst.msk [vmem:[#allocation2 + $0x172] sm:$0xff] %vm303_vm1, %v5449_v33 }
  0x44 PF: > { %p5450_p10 = scmp.ne.s32.totalorder %s6859_s18, 1 }
  0x46   : > { %382 = sbr.rel (%p5450_p10) target bundleno = 80 (0x50), region = 56 }
  0x4b   : > { %v6879_v34 = vmov 0.0  }
  0x4c   : > { %384 = vst.msk [vmem:[#allocation2 + $0x122] sm:$0xff] %vm303_vm1, %v6879_v34  ;;  %385 = vst.msk [vmem:[#allocation2 + $0x12a] sm:$0xff] %vm303_vm1, %v6879_v34 }
  0x4d   : > { %386 = vst.msk [vmem:[#allocation2 + $0x13a] sm:$0xff] %vm303_vm1, %v6879_v34  ;;  %387 = vst.msk [vmem:[#allocation2 + $0x142] sm:$0xff] %vm303_vm1, %v6879_v34 }
  0x4e   : > { %388 = vst.msk [vmem:[#allocation2 + $0x152] sm:$0xff] %vm303_vm1, %v6879_v34  ;;  %389 = vst.msk [vmem:[#allocation2 + $0x15a] sm:$0xff] %vm303_vm1, %v6879_v34 }
  0x4f   : > { %390 = vst.msk [vmem:[#allocation2 + $0x16a] sm:$0xff] %vm303_vm1, %v6879_v34  ;;  %391 = vst.msk [vmem:[#allocation2 + $0x172] sm:$0xff] %vm303_vm1, %v6879_v34 }
  0x50 PF: > { %v5451_v35 = vld [vmem:[%s8759_s1 + $0x8] sm:$0xff]  ;;  %v7118_v37 = vld [vmem:[#allocation2 + $0xf2] sm:$0xff]  ;;  %3162 = vst.msk [vmem:[#allocation3] sm:$0x3] %vm251_vm0, %v6877_v0  ;;  %3163 = vst.msk [vmem:[#allocation3 + $0x18] sm:$0x3] %vm251_vm0, %v6877_v0 }
  0x51   : > { %v417_v36 = vld [vmem:[#allocation2 + $0x2] sm:$0xff]  ;;  %3164 = vst.msk [vmem:[#allocation3 + $0x30] sm:$0x3] %vm251_vm0, %v6877_v0  ;;  %3165 = vst.msk [vmem:[#allocation3 + $0x48] sm:$0x3] %vm251_vm0, %v6877_v0  ;;  %6214 = vmatprep.subr.mxu0 %v5451_v35  ;;  %6790 = vmatprep.subr.mxu1 %v5451_v35  ;;  %v418_v38 = vld [vmem:[#allocation2 + $0xa] sm:$0xff] }
  0x52   : > { %3166 = vst.msk [vmem:[#allocation3 + $0x60] sm:$0x3] %vm251_vm0, %v6877_v0  ;;  %3167 = vst.msk [vmem:[#allocation3 + $0x78] sm:$0x3] %vm251_vm0, %v6877_v0  ;;  %v7168_v39 = vld [vmem:[#allocation2 + $0xfa] sm:$0xff]  ;;  %6215 = vmatpush3.msra.mxu0 %v5451_v35  ;;  %6791 = vmatpush3.msra.mxu1 %v5451_v35  ;;  %v5500_v40 = vld [vmem:[%s8759_s1 + $0x10] sm:$0xff] }
  0x53   : > { %3168 = vst.msk [vmem:[#allocation3 + $0x90] sm:$0x3] %vm251_vm0, %v6877_v0  ;;  %3169 = vst.msk [vmem:[#allocation3 + $0xa8] sm:$0x3] %vm251_vm0, %v6877_v0  ;;  %v419_v41 = vld [vmem:[#allocation2 + $0x1a] sm:$0xff]  ;;  %6216 = vmatprep.mubr.msk.f32.mxu0 %vm303_vm1, %v417_v36  ;;  %6246 = vmatprep.mubr.msk.f32.mxu1 %vm303_vm1, %v7118_v37  ;;  %v7176_v42 = vld [vmem:[#allocation2 + $0x10a] sm:$0xff] }
  0x54   : > { %3170 = vst.msk [vmem:[#allocation3 + $0xc0] sm:$0x3] %vm251_vm0, %v6877_v0  ;;  %3171 = vst.msk [vmem:[#allocation3 + $0xd8] sm:$0x3] %vm251_vm0, %v6877_v0  ;;  %6217 = vmatmul.mubr.msk.f32.vlgmr.msra.gmra.mxu0 %vm303_vm1, %v418_v38  ;;  %6247 = vmatmul.mubr.msk.f32.vlgmr.msra.gmra.mxu1 %vm303_vm1, %v7168_v39  ;;  %v416_v43 = vld [vmem:[%s8759_s1] sm:$0xff]  ;;  %v7185_v45 = vld [vmem:[#allocation2 + $0x112] sm:$0xff] }
  0x55   : > { %3172 = vst.msk [vmem:[#allocation3 + $0xf0] sm:$0x3] %vm251_vm0, %v6877_v0  ;;  %3173 = vst.msk [vmem:[#allocation3 + $0x108] sm:$0x3] %vm251_vm0, %v6877_v0  ;;  %6290 = vmatprep.subr.mxu0 %v5500_v40  ;;  %6219 = vmatprep.mubr.msk.f32.mxu0 %vm303_vm1, %v419_v41  ;;  %v420_v44 = vld [vmem:[#allocation2 + $0x22] sm:$0xff]  ;;  %v7189_v46 = vld [vmem:[#allocation2 + $0x32] sm:$0xff] }
  0x56   : > { %3174 = vst.msk [vmem:[#allocation3 + $0x12] sm:$0x3] %vm251_vm0, %v6877_v0  ;;  %3175 = vst.msk [vmem:[#allocation3 + $0x2a] sm:$0x3] %vm251_vm0, %v6877_v0  ;;  %6291 = vmatpush3.msra.mxu0 %v5500_v40  ;;  %6249 = vmatprep.mubr.msk.f32.mxu1 %vm303_vm1, %v7176_v42  ;;  %v392_v47 = vld [vmem:[#allocation2] sm:$0xff]  ;;  %v393_v49 = vld [vmem:[#allocation2 + $0x8] sm:$0xff] }
  0x57   : > { %3176 = vst.msk [vmem:[#allocation3 + $0x42] sm:$0x3] %vm251_vm0, %v6877_v0  ;;  %3177 = vst.msk [vmem:[#allocation3 + $0x5a] sm:$0x3] %vm251_vm0, %v6877_v0  ;;  %6252 = vmatprep.subr.mxu1 %v416_v43  ;;  %v7196_v48 = vld [vmem:[#allocation2 + $0x3a] sm:$0xff]  ;;  %v7199_v50 = vld [vmem:[#allocation2 + $0x4a] sm:$0xff] }
  0x58   : > { %3178 = vst.msk [vmem:[#allocation3 + $0x72] sm:$0x3] %vm251_vm0, %v6877_v0  ;;  %3179 = vst.msk [vmem:[#allocation3 + $0x8a] sm:$0x3] %vm251_vm0, %v6877_v0  ;;  %6220 = vmatmul.mubr.msk.f32.gmra.mxu0 %vm303_vm1, %v420_v44  ;;  %6250 = vmatmul.mubr.msk.f32.gmra.mxu1 %vm303_vm1, %v7185_v45  ;;  %v394_v51 = vld [vmem:[#allocation2 + $0x18] sm:$0xff]  ;;  %v395_v53 = vld [vmem:[#allocation2 + $0x20] sm:$0xff] }
  0x59   : > { %3180 = vst.msk [vmem:[#allocation3 + $0xa2] sm:$0x3] %vm251_vm0, %v6877_v0  ;;  %3181 = vst.msk [vmem:[#allocation3 + $0xba] sm:$0x3] %vm251_vm0, %v6877_v0  ;;  %6222 = vmatprep.mubr.msk.f32.mxu0 %vm303_vm1, %v7189_v46  ;;  %6253 = vmatpush3.msra.mxu1 %v416_v43  ;;  %v7207_v52 = vld [vmem:[#allocation2 + $0x52] sm:$0xff]  ;;  %v7209_v54 = vld [vmem:[#allocation2 + $0x62] sm:$0xff] }
  0x5a   : > { %3182 = vst.msk [vmem:[#allocation3 + $0xd2] sm:$0x3] %vm251_vm0, %v6877_v0  ;;  %3183 = vst.msk [vmem:[#allocation3 + $0xea] sm:$0x3] %vm251_vm0, %v6877_v0  ;;  %6254 = vmatprep.mubr.msk.f32.mxu1 %vm303_vm1, %v392_v47  ;;  %v7211_v55 = vld [vmem:[#allocation2 + $0x30] sm:$0xff]  ;;  %v5525_v56 = vld [vmem:[%s8759_s1 + $0x18] sm:$0xff] }
  0x5b   : > { %3184 = vst.msk [vmem:[#allocation3 + $0x102] sm:$0x3] %vm251_vm0, %v6877_v0  ;;  %3185 = vst.msk [vmem:[#allocation3 + $0x11a] sm:$0x3] %vm251_vm0, %v6877_v0  ;;  %6328 = vmatprep.subr.mxu1 %v5525_v56  ;;  %v5550_v57 = vld [vmem:[%s8759_s1 + $0x20] sm:$0xff]  ;;  %v7226_v58 = vld [vmem:[#allocation2 + $0x6a] sm:$0xff] }
  0x5c   : > { %6223 = vmatmul.mubr.msk.f32.gmra.mxu0 %vm303_vm1, %v7196_v48  ;;  %6255 = vmatmul.mubr.msk.f32.vlgmr.msra.gmra.mxu1 %vm303_vm1, %v393_v49  ;;  %v7228_v59 = vld [vmem:[#allocation2 + $0x38] sm:$0xff]  ;;  %v7232_v61 = vld [vmem:[#allocation2 + $0x48] sm:$0xff]  ;;  %v7244_v63 = vld [vmem:[#allocation2 + $0x50] sm:$0xff] }
  0x5d   : > { %6225 = vmatprep.mubr.msk.f32.mxu0 %vm303_vm1, %v7199_v50  ;;  %6257 = vmatprep.mubr.msk.f32.mxu1 %vm303_vm1, %v394_v51  ;;  %v7230_v60 = vld [vmem:[#allocation2 + $0x7a] sm:$0xff]  ;;  %v7242_v62 = vld [vmem:[#allocation2 + $0x82] sm:$0xff]  ;;  %v7246_v0 = vld [vmem:[#allocation2 + $0x92] sm:$0xff] }
  0x5e   : > { %6329 = vmatpush3.msra.mxu1 %v5525_v56  ;;  %6366 = vmatprep.subr.mxu0 %v5550_v57  ;;  %v7248_v1 = vld [vmem:[#allocation2 + $0x60] sm:$0xff]  ;;  %v7260_v3 = vld [vmem:[#allocation2 + $0x68] sm:$0xff]  ;;  %v7269_v6 = vld [vmem:[#allocation2 + $0x78] sm:$0xff] }
  0x5f   : > { %v7258_v2 = vld [vmem:[#allocation2 + $0x9a] sm:$0xff]  ;;  %v7265_v4 = vld [vmem:[%s8759_s1 + $0x28] sm:$0xff]  ;;  %v7280_v7 = vld [vmem:[#allocation2 + $0xb2] sm:$0xff] }
  0x60   : > { %6226 = vmatmul.mubr.msk.f32.gmra.mxu0 %vm303_vm1, %v7207_v52  ;;  %6258 = vmatmul.mubr.msk.f32.gmra.mxu1 %vm303_vm1, %v395_v53  ;;  %v7267_v5 = vld [vmem:[#allocation2 + $0xaa] sm:$0xff]  ;;  %v7282_v8 = vld [vmem:[#allocation2 + $0x80] sm:$0xff]  ;;  %v7298_v12 = vld [vmem:[#allocation2 + $0x98] sm:$0xff] }
  0x61   : > { %6228 = vmatprep.mubr.msk.f32.mxu0 %vm303_vm1, %v7209_v54  ;;  %6260 = vmatprep.mubr.msk.f32.mxu1 %vm303_vm1, %v7211_v55  ;;  %v7284_v9 = vld [vmem:[#allocation2 + $0xc2] sm:$0xff]  ;;  %v7286_v10 = vld [vmem:[#allocation2 + $0x90] sm:$0xff]  ;;  %v7300_v13 = vld [vmem:[#allocation2 + $0xda] sm:$0xff] }
  0x62   : > { %6404 = vmatprep.subr.mxu1 %v7265_v4  ;;  %v7296_v11 = vld [vmem:[#allocation2 + $0xca] sm:$0xff]  ;;  %v7312_v15 = vld [vmem:[#allocation2 + $0xe2] sm:$0xff]  ;;  %v7327_v21 = vld [vmem:[#allocation2 + $0xd8] sm:$0xff] }
  0x63   : > { %v7302_v14 = vld [vmem:[#allocation2 + $0xa8] sm:$0xff]  ;;  %v7314_v16 = vld [vmem:[#allocation2 + $0xb0] sm:$0xff]  ;;  %v7316_v17 = vld [vmem:[#allocation2 + $0xc0] sm:$0xff] }
  0x64   : > { %6229 = vmatmul.mubr.msk.f32.gmra.mxu0 %vm303_vm1, %v7226_v58  ;;  %6261 = vmatmul.mubr.msk.f32.gmra.mxu1 %vm303_vm1, %v7228_v59  ;;  %v957_v18 = vld [vmem:[#allocation2 + $0x4] sm:$0xff]  ;;  %v958_v20 = vld [vmem:[#allocation2 + $0xc] sm:$0xff]  ;;  %v959_v22 = vld [vmem:[#allocation2 + $0x1c] sm:$0xff] }
  0x65   : > { %6231 = vmatprep.mubr.msk.f32.mxu0 %vm303_vm1, %v7230_v60  ;;  %6263 = vmatprep.mubr.msk.f32.mxu1 %vm303_vm1, %v7232_v61  ;;  %v7325_v19 = vld [vmem:[#allocation2 + $0xc8] sm:$0xff]  ;;  %v7332_v23 = vld [vmem:[%s8759_s1 + $0x30] sm:$0xff]  ;;  %v7339_v24 = vld [vmem:[#allocation2 + $0xe0] sm:$0xff] }
  0x66   : > { %v960_v25 = vld [vmem:[#allocation2 + $0x24] sm:$0xff]  ;;  %v7342_v26 = vld [vmem:[#allocation2 + $0xf0] sm:$0xff]  ;;  %v7354_v28 = vld [vmem:[#allocation2 + $0xf8] sm:$0xff] }
  0x67   : > { %v7344_v27 = vld [vmem:[#allocation2 + $0x34] sm:$0xff]  ;;  %v7356_v29 = vld [vmem:[#allocation2 + $0x3c] sm:$0xff]  ;;  %v7358_v30 = vld [vmem:[#allocation2 + $0x108] sm:$0xff] }
  0x68   : > { %6232 = vmatmul.mubr.msk.f32.gmra.mxu0 %vm303_vm1, %v7242_v62  ;;  %6264 = vmatmul.mubr.msk.f32.gmra.mxu1 %vm303_vm1, %v7244_v63  ;;  %v7360_v31 = vld [vmem:[#allocation2 + $0x4c] sm:$0xff]  ;;  %v7372_v33 = vld [vmem:[#allocation2 + $0x54] sm:$0xff]  ;;  %v7374_v34 = vld [vmem:[#allocation2 + $0x64] sm:$0xff] }
  0x69   : > { %6234 = vmatprep.mubr.msk.f32.mxu0 %vm303_vm1, %v7246_v0  ;;  %6266 = vmatprep.mubr.msk.f32.mxu1 %vm303_vm1, %v7248_v1  ;;  %v7370_v32 = vld [vmem:[#allocation2 + $0x110] sm:$0xff]  ;;  %v7386_v36 = vld [vmem:[#allocation2 + $0x7c] sm:$0xff]  ;;  %v7401_v40 = vld [vmem:[#allocation2 + $0x84] sm:$0xff] }
  0x6a   : > { %v7384_v35 = vld [vmem:[#allocation2 + $0x6c] sm:$0xff]  ;;  %v7395_v38 = vld [vmem:[%s8759_s1 + $0x38] sm:$0xff]  ;;  %v7429_v49 = vld [vmem:[#allocation2 + $0xc4] sm:$0xff] }
  0x6b   : > { %v7403_v41 = vld [vmem:[#allocation2 + $0x94] sm:$0xff]  ;;  %v7415_v43 = vld [vmem:[#allocation2 + $0x9c] sm:$0xff]  ;;  %v7417_v44 = vld [vmem:[#allocation2 + $0xac] sm:$0xff] }
  0x6c   : > { %6235 = vmatmul.mubr.msk.f32.gmra.mxu0 %vm303_vm1, %v7258_v2  ;;  %6267 = vmatmul.mubr.msk.f32.gmra.mxu1 %vm303_vm1, %v7260_v3  ;;  %v7427_v47 = vld [vmem:[#allocation2 + $0xb4] sm:$0xff]  ;;  %v7439_v51 = vld [vmem:[#allocation2 + $0xcc] sm:$0xff]  ;;  %v7441_v53 = vld [vmem:[#allocation2 + $0xdc] sm:$0xff] }
  0x6d   : > { %6237 = vmatprep.mubr.msk.f32.mxu0 %vm303_vm1, %v7267_v5  ;;  %6269 = vmatprep.mubr.msk.f32.mxu1 %vm303_vm1, %v7269_v6  ;;  %v7453_v56 = vld [vmem:[#allocation2 + $0xf4] sm:$0xff] }
  0x70   : > { %6238 = vmatmul.mubr.msk.f32.gmra.mxu0 %vm303_vm1, %v7280_v7  ;;  %6270 = vmatmul.mubr.msk.f32.gmra.mxu1 %vm303_vm1, %v7282_v8 }
  0x71   : > { %6240 = vmatprep.mubr.msk.f32.mxu0 %vm303_vm1, %v7284_v9  ;;  %6272 = vmatprep.mubr.msk.f32.mxu1 %vm303_vm1, %v7286_v10 }
  0x74   : > { %6241 = vmatmul.mubr.msk.f32.gmra.mxu0 %vm303_vm1, %v7296_v11  ;;  %6273 = vmatmul.mubr.msk.f32.gmra.mxu1 %vm303_vm1, %v7298_v12 }
  0x75   : > { %6243 = vmatprep.mubr.msk.f32.mxu0 %vm303_vm1, %v7300_v13  ;;  %6275 = vmatprep.mubr.msk.f32.mxu1 %vm303_vm1, %v7302_v14 }
  0x78   : > { %6244 = vmatmul.mubr.msk.f32.gmra.mxu0 %vm303_vm1, %v7312_v15  ;;  %6276 = vmatmul.mubr.msk.f32.gmra.mxu1 %vm303_vm1, %v7314_v16 }
  0x79   : > { %6278 = vmatprep.mubr.msk.f32.mxu1 %vm303_vm1, %v7316_v17  ;;  %6292 = vmatprep.mubr.msk.f32.mxu0 %vm303_vm1, %v957_v18  ;;  %v7580_v18 = vld [vmem:[#allocation2 + $0x12a] sm:$0xff] }
  0x7c   : > { %6279 = vmatmul.mubr.msk.f32.gmra.mxu1 %vm303_vm1, %v7325_v19  ;;  %6293 = vmatmul.mubr.msk.f32.vlgmr.msra.gmra.mxu0 %vm303_vm1, %v958_v20  ;;  %v7582_v20 = vld [vmem:[#allocation2 + $0x13a] sm:$0xff] }
  0x7d   : > { %6367 = vmatpush3.msra.mxu0 %v5550_v57  ;;  %6281 = vmatprep.mubr.msk.f32.mxu1 %vm303_vm1, %v7327_v21  ;;  %v7463_v57 = vld [vmem:[#allocation2 + $0xfc] sm:$0xff] }
  0x7e   : > { %6295 = vmatprep.mubr.msk.f32.mxu0 %vm303_vm1, %v959_v22  ;;  %6442 = vmatprep.subr.mxu0 %v7332_v23  ;;  %v7592_v22 = vld [vmem:[#allocation2 + $0x142] sm:$0xff] }
  0x80   : > { %6282 = vmatmul.mubr.msk.f32.gmra.mxu1 %vm303_vm1, %v7339_v24  ;;  %6296 = vmatmul.mubr.msk.f32.gmra.mxu0 %vm303_vm1, %v960_v25 }
  0x81   : > { %6284 = vmatprep.mubr.msk.f32.mxu1 %vm303_vm1, %v7342_v26  ;;  %6298 = vmatprep.mubr.msk.f32.mxu0 %vm303_vm1, %v7344_v27 }
  0x84   : > { %6285 = vmatmul.mubr.msk.f32.gmra.mxu1 %vm303_vm1, %v7354_v28  ;;  %6299 = vmatmul.mubr.msk.f32.gmra.mxu0 %vm303_vm1, %v7356_v29 }
  0x85   : > { %6287 = vmatprep.mubr.msk.f32.mxu1 %vm303_vm1, %v7358_v30  ;;  %6301 = vmatprep.mubr.msk.f32.mxu0 %vm303_vm1, %v7360_v31 }
  0x88   : > { %6288 = vmatmul.mubr.msk.f32.gmra.mxu1 %vm303_vm1, %v7370_v32  ;;  %6302 = vmatmul.mubr.msk.f32.gmra.mxu0 %vm303_vm1, %v7372_v33 }
  0x89   : > { %6304 = vmatprep.mubr.msk.f32.mxu0 %vm303_vm1, %v7374_v34  ;;  %6330 = vmatprep.mubr.msk.f32.mxu1 %vm303_vm1, %v7211_v55  ;;  %v7451_v55 = vld [vmem:[#allocation2 + $0xe4] sm:$0xff] }
  0x8c   : > { %6305 = vmatmul.mubr.msk.f32.gmra.mxu0 %vm303_vm1, %v7384_v35  ;;  %6331 = vmatmul.mubr.msk.f32.vlgmr.msra.gmra.mxu1 %vm303_vm1, %v7228_v59  ;;  %v7465_v59 = vld [vmem:[#allocation2 + $0x10c] sm:$0xff] }
  0x8d   : > { %6307 = vmatprep.mubr.msk.f32.mxu0 %vm303_vm1, %v7386_v36  ;;  %6333 = vmatprep.mubr.msk.f32.mxu1 %vm303_vm1, %v7232_v61  ;;  %v7475_v61 = vld [vmem:[#allocation2 + $0x114] sm:$0xff] }
  0x8e   : > { %6405 = vmatpush3.msra.mxu1 %v7265_v4  ;;  %v7497_v4 = vld [vmem:[#allocation2 + $0x120] sm:$0xff] }
  0x8f   : > { %6480 = vmatprep.subr.mxu1 %v7395_v38 }
  0x90   : > { %6308 = vmatmul.mubr.msk.f32.gmra.mxu0 %vm303_vm1, %v7401_v40  ;;  %6334 = vmatmul.mubr.msk.f32.gmra.mxu1 %vm303_vm1, %v7244_v63  ;;  %v5650_v63 = vld [vmem:[%s8759_s1 + $0x40] sm:$0xff] }
  0x91   : > { %6310 = vmatprep.mubr.msk.f32.mxu0 %vm303_vm1, %v7403_v41  ;;  %6336 = vmatprep.mubr.msk.f32.mxu1 %vm303_vm1, %v7248_v1 }
  0x94   : > { %6311 = vmatmul.mubr.msk.f32.gmra.mxu0 %vm303_vm1, %v7415_v43  ;;  %6337 = vmatmul.mubr.msk.f32.gmra.mxu1 %vm303_vm1, %v7260_v3 }
  0x95   : > { %6313 = vmatprep.mubr.msk.f32.mxu0 %vm303_vm1, %v7417_v44  ;;  %6339 = vmatprep.mubr.msk.f32.mxu1 %vm303_vm1, %v7269_v6 }
  0x98   : > { %6314 = vmatmul.mubr.msk.f32.gmra.mxu0 %vm303_vm1, %v7427_v47  ;;  %6340 = vmatmul.mubr.msk.f32.gmra.mxu1 %vm303_vm1, %v7282_v8 }
  0x99   : > { %6316 = vmatprep.mubr.msk.f32.mxu0 %vm303_vm1, %v7429_v49  ;;  %6342 = vmatprep.mubr.msk.f32.mxu1 %vm303_vm1, %v7286_v10 }
  0x9c   : > { %6317 = vmatmul.mubr.msk.f32.gmra.mxu0 %vm303_vm1, %v7439_v51  ;;  %6343 = vmatmul.mubr.msk.f32.gmra.mxu1 %vm303_vm1, %v7298_v12 }
  0x9d   : > { %6319 = vmatprep.mubr.msk.f32.mxu0 %vm303_vm1, %v7441_v53  ;;  %6345 = vmatprep.mubr.msk.f32.mxu1 %vm303_vm1, %v7302_v14 }
  0xa0   : > { %6320 = vmatmul.mubr.msk.f32.gmra.mxu0 %vm303_vm1, %v7451_v55  ;;  %6346 = vmatmul.mubr.msk.f32.gmra.mxu1 %vm303_vm1, %v7314_v16 }
  0xa1   : > { %6322 = vmatprep.mubr.msk.f32.mxu0 %vm303_vm1, %v7453_v56  ;;  %6348 = vmatprep.mubr.msk.f32.mxu1 %vm303_vm1, %v7316_v17 }
  0xa4   : > { %6323 = vmatmul.mubr.msk.f32.gmra.mxu0 %vm303_vm1, %v7463_v57  ;;  %6349 = vmatmul.mubr.msk.f32.gmra.mxu1 %vm303_vm1, %v7325_v19 }
  0xa5   : > { %6325 = vmatprep.mubr.msk.f32.mxu0 %vm303_vm1, %v7465_v59  ;;  %6351 = vmatprep.mubr.msk.f32.mxu1 %vm303_vm1, %v7327_v21 }
  0xa8   : > { %6326 = vmatmul.mubr.msk.f32.gmra.mxu0 %vm303_vm1, %v7475_v61  ;;  %6352 = vmatmul.mubr.msk.f32.gmra.mxu1 %vm303_vm1, %v7339_v24 }
  0xa9   : > { %6354 = vmatprep.mubr.msk.f32.mxu1 %vm303_vm1, %v7342_v26  ;;  %6368 = vmatprep.mubr.msk.f32.mxu0 %vm303_vm1, %v7189_v46  ;;  %v7507_v46 = vld [vmem:[#allocation2 + $0x128] sm:$0xff] }
  0xac   : > { %6355 = vmatmul.mubr.msk.f32.gmra.mxu1 %vm303_vm1, %v7354_v28  ;;  %6369 = vmatmul.mubr.msk.f32.vlgmr.msra.gmra.mxu0 %vm303_vm1, %v7196_v48  ;;  %v7509_v48 = vld [vmem:[#allocation2 + $0x138] sm:$0xff] }
  0xad   : > { %6443 = vmatpush3.msra.mxu0 %v7332_v23  ;;  %6357 = vmatprep.mubr.msk.f32.mxu1 %vm303_vm1, %v7358_v30  ;;  %v7610_v23 = vld [vmem:[#allocation2 + $0x124] sm:$0xff] }
  0xae   : > { %6371 = vmatprep.mubr.msk.f32.mxu0 %vm303_vm1, %v7199_v50  ;;  %6518 = vmatprep.subr.mxu0 %v5650_v63  ;;  %v7519_v50 = vld [vmem:[#allocation2 + $0x140] sm:$0xff] }
  0xb0   : > { %6358 = vmatmul.mubr.msk.f32.gmra.mxu1 %vm303_vm1, %v7370_v32  ;;  %6372 = vmatmul.mubr.msk.f32.gmra.mxu0 %vm303_vm1, %v7207_v52  ;;  %v7570_v52 = vld [vmem:[#allocation2 + $0x122] sm:$0xff] }
  0xb1   : > { %6360 = vmatprep.mubr.msk.f32.mxu1 %vm303_vm1, %v7497_v4  ;;  %6374 = vmatprep.mubr.msk.f32.mxu0 %vm303_vm1, %v7209_v54 }
  0xb4   : > { %6361 = vmatmul.mubr.msk.f32.gmra.mxu1 %vm303_vm1, %v7507_v46  ;;  %6375 = vmatmul.mubr.msk.f32.gmra.mxu0 %vm303_vm1, %v7226_v58 }
  0xb5   : > { %6363 = vmatprep.mubr.msk.f32.mxu1 %vm303_vm1, %v7509_v48  ;;  %6377 = vmatprep.mubr.msk.f32.mxu0 %vm303_vm1, %v7230_v60 }
  0xb8   : > { %6364 = vmatmul.mubr.msk.f32.gmra.mxu1 %vm303_vm1, %v7519_v50  ;;  %6378 = vmatmul.mubr.msk.f32.gmra.mxu0 %vm303_vm1, %v7242_v62 }
  0xb9   : > { %6380 = vmatprep.mubr.msk.f32.mxu0 %vm303_vm1, %v7246_v0  ;;  %6406 = vmatprep.mubr.msk.f32.mxu1 %vm303_vm1, %v7344_v27 }
  0xbc   : > { %6381 = vmatmul.mubr.msk.f32.gmra.mxu0 %vm303_vm1, %v7258_v2  ;;  %6407 = vmatmul.mubr.msk.f32.vlgmr.msra.gmra.mxu1 %vm303_vm1, %v7356_v29 }
  0xbd   : > { %6383 = vmatprep.mubr.msk.f32.mxu0 %vm303_vm1, %v7267_v5  ;;  %6409 = vmatprep.mubr.msk.f32.mxu1 %vm303_vm1, %v7360_v31 }
  0xbe   : > { %6481 = vmatpush3.msra.mxu1 %v7395_v38 }
  0xc0   : > { %6384 = vmatmul.mubr.msk.f32.gmra.mxu0 %vm303_vm1, %v7280_v7  ;;  %6410 = vmatmul.mubr.msk.f32.gmra.mxu1 %vm303_vm1, %v7372_v33 }
  0xc1   : > { %6386 = vmatprep.mubr.msk.f32.mxu0 %vm303_vm1, %v7284_v9  ;;  %6412 = vmatprep.mubr.msk.f32.mxu1 %vm303_vm1, %v7374_v34 }
  0xc4   : > { %6387 = vmatmul.mubr.msk.f32.gmra.mxu0 %vm303_vm1, %v7296_v11  ;;  %6413 = vmatmul.mubr.msk.f32.gmra.mxu1 %vm303_vm1, %v7384_v35 }
  0xc5   : > { %6389 = vmatprep.mubr.msk.f32.mxu0 %vm303_vm1, %v7300_v13  ;;  %6415 = vmatprep.mubr.msk.f32.mxu1 %vm303_vm1, %v7386_v36 }
  0xc8   : > { %6390 = vmatmul.mubr.msk.f32.gmra.mxu0 %vm303_vm1, %v7312_v15  ;;  %6416 = vmatmul.mubr.msk.f32.gmra.mxu1 %vm303_vm1, %v7401_v40 }
  0xc9   : > { %6392 = vmatprep.mubr.msk.f32.mxu0 %vm303_vm1, %v7118_v37  ;;  %6418 = vmatprep.mubr.msk.f32.mxu1 %vm303_vm1, %v7403_v41 }
  0xcc   : > { %6393 = vmatmul.mubr.msk.f32.gmra.mxu0 %vm303_vm1, %v7168_v39  ;;  %6419 = vmatmul.mubr.msk.f32.gmra.mxu1 %vm303_vm1, %v7415_v43 }
  0xcd   : > { %6395 = vmatprep.mubr.msk.f32.mxu0 %vm303_vm1, %v7176_v42  ;;  %6421 = vmatprep.mubr.msk.f32.mxu1 %vm303_vm1, %v7417_v44 }
  0xd0   : > { %6396 = vmatmul.mubr.msk.f32.gmra.mxu0 %vm303_vm1, %v7185_v45  ;;  %6422 = vmatmul.mubr.msk.f32.gmra.mxu1 %vm303_vm1, %v7427_v47 }
  0xd1   : > { %6398 = vmatprep.mubr.msk.f32.mxu0 %vm303_vm1, %v7570_v52  ;;  %6424 = vmatprep.mubr.msk.f32.mxu1 %vm303_vm1, %v7429_v49 }
  0xd4   : > { %6399 = vmatmul.mubr.msk.f32.gmra.mxu0 %vm303_vm1, %v7580_v18  ;;  %6425 = vmatmul.mubr.msk.f32.gmra.mxu1 %vm303_vm1, %v7439_v51 }
  0xd5   : > { %6401 = vmatprep.mubr.msk.f32.mxu0 %vm303_vm1, %v7582_v20  ;;  %6427 = vmatprep.mubr.msk.f32.mxu1 %vm303_vm1, %v7441_v53 }
  0xd8   : > { %6402 = vmatmul.mubr.msk.f32.gmra.mxu0 %vm303_vm1, %v7592_v22  ;;  %6428 = vmatmul.mubr.msk.f32.gmra.mxu1 %vm303_vm1, %v7451_v55 }
  0xd9   : > { %6430 = vmatprep.mubr.msk.f32.mxu1 %vm303_vm1, %v7453_v56  ;;  %6444 = vmatprep.mubr.msk.f32.mxu0 %vm303_vm1, %v7248_v1  ;;  %v7620_v1 = vld [vmem:[#allocation2 + $0x12c] sm:$0xff] }
  0xdc   : > { %6431 = vmatmul.mubr.msk.f32.gmra.mxu1 %vm303_vm1, %v7463_v57  ;;  %6445 = vmatmul.mubr.msk.f32.vlgmr.msra.gmra.mxu0 %vm303_vm1, %v7260_v3  ;;  %v7622_v3 = vld [vmem:[#allocation2 + $0x13c] sm:$0xff] }
  0xdd   : > { %6519 = vmatpush3.msra.mxu0 %v5650_v63  ;;  %6433 = vmatprep.mubr.msk.f32.mxu1 %vm303_vm1, %v7465_v59 }
  0xde   : > { %6447 = vmatprep.mubr.msk.f32.mxu0 %vm303_vm1, %v7269_v6  ;;  %v7632_v6 = vld [vmem:[#allocation2 + $0x144] sm:$0xff] }
  0xe0   : > { %6434 = vmatmul.mubr.msk.f32.gmra.mxu1 %vm303_vm1, %v7475_v61  ;;  %6448 = vmatmul.mubr.msk.f32.gmra.mxu0 %vm303_vm1, %v7282_v8 }
  0xe1   : > { %6436 = vmatprep.mubr.msk.f32.mxu1 %vm303_vm1, %v7610_v23  ;;  %6450 = vmatprep.mubr.msk.f32.mxu0 %vm303_vm1, %v7286_v10 }
  0xe4   : > { %6437 = vmatmul.mubr.msk.f32.gmra.mxu1 %vm303_vm1, %v7620_v1  ;;  %6451 = vmatmul.mubr.msk.f32.gmra.mxu0 %vm303_vm1, %v7298_v12 }
  0xe5   : > { %6439 = vmatprep.mubr.msk.f32.mxu1 %vm303_vm1, %v7622_v3  ;;  %6453 = vmatprep.mubr.msk.f32.mxu0 %vm303_vm1, %v7302_v14 }
  0xe8   : > { %6440 = vmatmul.mubr.msk.f32.gmra.mxu1 %vm303_vm1, %v7632_v6  ;;  %6454 = vmatmul.mubr.msk.f32.gmra.mxu0 %vm303_vm1, %v7314_v16 }
  0xe9   : > { %6456 = vmatprep.mubr.msk.f32.mxu0 %vm303_vm1, %v7316_v17  ;;  %6482 = vmatprep.mubr.msk.f32.mxu1 %vm303_vm1, %v7209_v54  ;;  %v2206_v54 = vld [vmem:[#allocation2 + $0x150] sm:$0xff] }
  0xec   : > { %6457 = vmatmul.mubr.msk.f32.gmra.mxu0 %vm303_vm1, %v7325_v19  ;;  %6483 = vmatmul.mubr.msk.f32.vlgmr.msra.gmra.mxu1 %vm303_vm1, %v7226_v58  ;;  %v2207_v58 = vld [vmem:[#allocation2 + $0x158] sm:$0xff] }
  0xed   : > { %6459 = vmatprep.mubr.msk.f32.mxu0 %vm303_vm1, %v7327_v21  ;;  %6485 = vmatprep.mubr.msk.f32.mxu1 %vm303_vm1, %v7230_v60  ;;  %v2208_v60 = vld [vmem:[#allocation2 + $0x168] sm:$0xff] }
  0xf0   : > { %6460 = vmatmul.mubr.msk.f32.gmra.mxu0 %vm303_vm1, %v7339_v24  ;;  %6486 = vmatmul.mubr.msk.f32.gmra.mxu1 %vm303_vm1, %v7242_v62  ;;  %v2209_v62 = vld [vmem:[#allocation2 + $0x170] sm:$0xff] }
  0xf1   : > { %6462 = vmatprep.mubr.msk.f32.mxu0 %vm303_vm1, %v7342_v26  ;;  %6488 = vmatprep.mubr.msk.f32.mxu1 %vm303_vm1, %v7246_v0 }
  0xf4   : > { %6463 = vmatmul.mubr.msk.f32.gmra.mxu0 %vm303_vm1, %v7354_v28  ;;  %6489 = vmatmul.mubr.msk.f32.gmra.mxu1 %vm303_vm1, %v7258_v2  ;;  %v2516_v2 = vld [vmem:[#allocation2 + $0x172] sm:$0xff] }
  0xf5   : > { %6465 = vmatprep.mubr.msk.f32.mxu0 %vm303_vm1, %v7358_v30  ;;  %6491 = vmatprep.mubr.msk.f32.mxu1 %vm303_vm1, %v7267_v5 }
  0xf8   : > { %6466 = vmatmul.mubr.msk.f32.gmra.mxu0 %vm303_vm1, %v7370_v32  ;;  %6492 = vmatmul.mubr.msk.f32.gmra.mxu1 %vm303_vm1, %v7280_v7 }
  0xf9   : > { %6468 = vmatprep.mubr.msk.f32.mxu0 %vm303_vm1, %v7497_v4  ;;  %6494 = vmatprep.mubr.msk.f32.mxu1 %vm303_vm1, %v7284_v9 }
  0xfc   : > { %6469 = vmatmul.mubr.msk.f32.gmra.mxu0 %vm303_vm1, %v7507_v46  ;;  %6495 = vmatmul.mubr.msk.f32.gmra.mxu1 %vm303_vm1, %v7296_v11  ;;  %v2822_v46 = vld [vmem:[#allocation2 + $0x16c] sm:$0xff] }
  0xfd   : > { %6471 = vmatprep.mubr.msk.f32.mxu0 %vm303_vm1, %v7509_v48  ;;  %6497 = vmatprep.mubr.msk.f32.mxu1 %vm303_vm1, %v7300_v13 }
 0x100   : > { %6472 = vmatmul.mubr.msk.f32.gmra.mxu0 %vm303_vm1, %v7519_v50  ;;  %6498 = vmatmul.mubr.msk.f32.gmra.mxu1 %vm303_vm1, %v7312_v15 }
 0x101   : > { %6474 = vmatprep.mubr.msk.f32.mxu0 %vm303_vm1, %v2206_v54  ;;  %6500 = vmatprep.mubr.msk.f32.mxu1 %vm303_vm1, %v7118_v37  ;;  %v2513_v37 = vld [vmem:[#allocation2 + $0x152] sm:$0xff] }
 0x104   : > { %6475 = vmatmul.mubr.msk.f32.gmra.mxu0 %vm303_vm1, %v2207_v58  ;;  %6501 = vmatmul.mubr.msk.f32.gmra.mxu1 %vm303_vm1, %v7168_v39  ;;  %v2514_v39 = vld [vmem:[#allocation2 + $0x15a] sm:$0xff] }
 0x105   : > { %6477 = vmatprep.mubr.msk.f32.mxu0 %vm303_vm1, %v2208_v60  ;;  %6503 = vmatprep.mubr.msk.f32.mxu1 %vm303_vm1, %v7176_v42  ;;  %v2515_v42 = vld [vmem:[#allocation2 + $0x16a] sm:$0xff] }
 0x108   : > { %6478 = vmatmul.mubr.msk.f32.gmra.mxu0 %vm303_vm1, %v2209_v62  ;;  %6504 = vmatmul.mubr.msk.f32.gmra.mxu1 %vm303_vm1, %v7185_v45 }
 0x109   : > { %6506 = vmatprep.mubr.msk.f32.mxu1 %vm303_vm1, %v7570_v52  ;;  %6520 = vmatprep.mubr.msk.f32.mxu0 %vm303_vm1, %v7374_v34 }
 0x10c   : > { %6507 = vmatmul.mubr.msk.f32.gmra.mxu1 %vm303_vm1, %v7580_v18  ;;  %6521 = vmatmul.mubr.msk.f32.vlgmr.msra.gmra.mxu0 %vm303_vm1, %v7384_v35 }
 0x10d   : > { %6509 = vmatprep.mubr.msk.f32.mxu1 %vm303_vm1, %v7582_v20  ;;  %6523 = vmatprep.mubr.msk.f32.mxu0 %vm303_vm1, %v7386_v36  ;;  %v2823_v20 = vld [vmem:[#allocation2 + $0x174] sm:$0xff] }
 0x110   : > { %6510 = vmatmul.mubr.msk.f32.gmra.mxu1 %vm303_vm1, %v7592_v22  ;;  %6524 = vmatmul.mubr.msk.f32.gmra.mxu0 %vm303_vm1, %v7401_v40 }
 0x111   : > { %6512 = vmatprep.mubr.msk.f32.mxu1 %vm303_vm1, %v2513_v37  ;;  %6526 = vmatprep.mubr.msk.f32.mxu0 %vm303_vm1, %v7403_v41 }
 0x114   : > { %v6218_v45 = vpop.f32.mrf.mxu0  ;;  %v7717_v0 = vpop.f32.mrf.mxu1  ;;  %6513 = vmatmul.mubr.msk.f32.gmra.mxu1 %vm303_vm1, %v2514_v39  ;;  %6527 = vmatmul.mubr.msk.f32.gmra.mxu0 %vm303_vm1, %v7415_v43 }
 0x115   : > { %6515 = vmatprep.mubr.msk.f32.mxu1 %vm303_vm1, %v2515_v42  ;;  %6529 = vmatprep.mubr.msk.f32.mxu0 %vm303_vm1, %v7417_v44 }
 0x116   : > { %v581_v5 = vpop.f32.mrf.mxu0  ;;  %v7725_v7 = vpop.f32.mrf.mxu1 }
 0x118   : > { %v6221_v8 = vpop.f32.mrf.mxu0  ;;  %v7727_v9 = vpop.f32.mrf.mxu1  ;;  %6516 = vmatmul.mubr.msk.f32.gmra.mxu1 %vm303_vm1, %v2516_v2  ;;  %6530 = vmatmul.mubr.msk.f32.gmra.mxu0 %vm303_vm1, %v7427_v47 }
 0x119   : > { %6532 = vmatprep.mubr.msk.f32.mxu0 %vm303_vm1, %v7429_v49 }
 0x11a   : > { %v591_v10 = vpop.f32.mrf.mxu0  ;;  %v7734_v11 = vpop.f32.mrf.mxu1 }
 0x11c   : > { %v6224_v12 = vpop.f32.mrf.mxu0  ;;  %v6256_v13 = vpop.f32.mrf.mxu1  ;;  %6533 = vmatmul.mubr.msk.f32.gmra.mxu0 %vm303_vm1, %v7439_v51 }
 0x11d   : > { %v7738_v14 = vadd.f32 %v6256_v13, %v6218_v45  ;;  %6535 = vmatprep.mubr.msk.f32.mxu0 %vm303_vm1, %v7441_v53  ;;  %v2820_v53 = vld [vmem:[#allocation2 + $0x154] sm:$0xff] }
 0x11e   : > { %v601_v15 = vpop.f32.mrf.mxu0  ;;  %v838_v16 = vpop.f32.mrf.mxu1 }
 0x11f   : > { %v7742_v17 = vadd.f32 %v838_v16, %v581_v5 }
 0x120   : > { %v6227_v19 = vpop.f32.mrf.mxu0  ;;  %v6259_v21 = vpop.f32.mrf.mxu1  ;;  %6536 = vmatmul.mubr.msk.f32.gmra.mxu0 %vm303_vm1, %v7451_v55 }
 0x121   : > { %v7746_v24 = vadd.f32 %v6259_v21, %v6221_v8  ;;  %6538 = vmatprep.mubr.msk.f32.mxu0 %vm303_vm1, %v7453_v56 }
 0x122   : > { %v611_v25 = vpop.f32.mrf.mxu0  ;;  %v848_v26 = vpop.f32.mrf.mxu1 }
 0x123   : > { %v7750_v27 = vadd.f32 %v848_v26, %v591_v10 }
 0x124   : > { %v6230_v28 = vpop.f32.mrf.mxu0  ;;  %v6262_v29 = vpop.f32.mrf.mxu1  ;;  %6539 = vmatmul.mubr.msk.f32.gmra.mxu0 %vm303_vm1, %v7463_v57 }
 0x125   : > { %v7754_v30 = vadd.f32 %v6262_v29, %v6224_v12  ;;  %6541 = vmatprep.mubr.msk.f32.mxu0 %vm303_vm1, %v7465_v59 }
 0x126   : > { %v621_v31 = vpop.f32.mrf.mxu0  ;;  %v858_v32 = vpop.f32.mrf.mxu1 }
 0x127   : > { %v7758_v33 = vadd.f32 %v858_v32, %v601_v15 }
 0x128   : > { %v6233_v34 = vpop.f32.mrf.mxu0  ;;  %v6265_v35 = vpop.f32.mrf.mxu1  ;;  %6542 = vmatmul.mubr.msk.f32.gmra.mxu0 %vm303_vm1, %v7475_v61  ;;  %v2821_v61 = vld [vmem:[#allocation2 + $0x15c] sm:$0xff] }
 0x129   : > { %v7762_v36 = vadd.f32 %v6265_v35, %v6227_v19  ;;  %6544 = vmatprep.mubr.msk.f32.mxu0 %vm303_vm1, %v7610_v23 }
 0x12a   : > { %v631_v38 = vpop.f32.mrf.mxu0  ;;  %v868_v40 = vpop.f32.mrf.mxu1 }
 0x12b   : > { %v7766_v41 = vadd.f32 %v868_v40, %v611_v25 }
 0x12c   : > { %v6236_v43 = vpop.f32.mrf.mxu0  ;;  %v6268_v44 = vpop.f32.mrf.mxu1  ;;  %6545 = vmatmul.mubr.msk.f32.gmra.mxu0 %vm303_vm1, %v7620_v1 }
 0x12d   : > { %v7770_v47 = vadd.f32 %v6268_v44, %v6230_v28  ;;  %6547 = vmatprep.mubr.msk.f32.mxu0 %vm303_vm1, %v7622_v3 }
 0x12e   : > { %v641_v49 = vpop.f32.mrf.mxu0  ;;  %v878_v51 = vpop.f32.mrf.mxu1 }
 0x12f   : > { %v7774_v55 = vadd.f32 %v878_v51, %v621_v31 }
 0x130   : > { %v6239_v56 = vpop.f32.mrf.mxu0  ;;  %v6271_v57 = vpop.f32.mrf.mxu1  ;;  %6548 = vmatmul.mubr.msk.f32.gmra.mxu0 %vm303_vm1, %v7632_v6 }
 0x131   : > { %v7778_v59 = vadd.f32 %v6271_v57, %v6233_v34  ;;  %6550 = vmatprep.mubr.msk.f32.mxu0 %vm303_vm1, %v2820_v53 }
 0x132   : > { %v651_v63 = vpop.f32.mrf.mxu0  ;;  %v888_v4 = vpop.f32.mrf.mxu1 }
 0x133   : > { %v7781_v48 = vadd.f32 %v888_v4, %v631_v38 }
 0x134   : > { %v6242_v50 = vpop.f32.mrf.mxu0  ;;  %v6274_v52 = vpop.f32.mrf.mxu1  ;;  %6551 = vmatmul.mubr.msk.f32.gmra.mxu0 %vm303_vm1, %v2821_v61 }
 0x135   : > { %v7784_v18 = vadd.f32 %v6274_v52, %v6236_v43  ;;  %6553 = vmatprep.mubr.msk.f32.mxu0 %vm303_vm1, %v2822_v46 }
 0x136   : > { %v661_v22 = vpop.f32.mrf.mxu0  ;;  %v898_v23 = vpop.f32.mrf.mxu1 }
 0x137   : > { %v899_v1 = vadd.f32 %v898_v23, %v641_v49 }
 0x138   : > { %v6245_v3 = vpop.f32.mrf.mxu0  ;;  %v6277_v6 = vpop.f32.mrf.mxu1  ;;  %6554 = vmatmul.mubr.msk.f32.gmra.mxu0 %vm303_vm1, %v2823_v20 }
 0x139   : > { %v914_v54 = vadd.f32 %v6277_v6, %v6239_v56 }
 0x13a   : > { %v671_v58 = vpop.f32.mrf.mxu0  ;;  %v908_v60 = vpop.f32.mrf.mxu1 }
 0x13b   : > { %v7788_v62 = vadd.f32 %v908_v60, %v651_v63 }
 0x13c   : > { %v6280_v37 = vpop.f32.mrf.mxu1  ;;  %v6294_v39 = vpop.f32.mrf.mxu0 }
 0x13d   : > { %v7790_v42 = vadd.f32 %v6280_v37, %v6242_v50  ;;  %v1241_v45 = vadd.f32 %v6294_v39, %v7738_v14 }
 0x13e   : > { %v918_v2 = vpop.f32.mrf.mxu1  ;;  %v1121_v5 = vpop.f32.mrf.mxu0 }
 0x13f   : > { %v7793_v8 = vadd.f32 %v918_v2, %v661_v22  ;;  %v1240_v10 = vadd.f32 %v1121_v5, %v7742_v17 }
 0x140   : > { %v6283_v12 = vpop.f32.mrf.mxu1  ;;  %v6297_v13 = vpop.f32.mrf.mxu0 }
 0x141   : > { %v7796_v15 = vadd.f32 %v6283_v12, %v6245_v3  ;;  %v1243_v16 = vadd.f32 %v6297_v13, %v7746_v24 }
 0x142   : > { %v928_v19 = vpop.f32.mrf.mxu1  ;;  %v1131_v21 = vpop.f32.mrf.mxu0 }
 0x143   : > { %v7799_v25 = vadd.f32 %v928_v19, %v671_v58  ;;  %v1242_v26 = vadd.f32 %v1131_v21, %v7750_v27 }
 0x144   : > { %v6286_v28 = vpop.f32.mrf.mxu1  ;;  %v6300_v14 = vpop.f32.mrf.mxu0 }
 0x145   : > { %v7803_v29 = vadd.f32 %v6286_v28, %v7717_v0  ;;  %v1245_v31 = vadd.f32 %v6300_v14, %v7754_v30 }
 0x146   : > { %v938_v17 = vpop.f32.mrf.mxu1  ;;  %v1141_v32 = vpop.f32.mrf.mxu0 }
 0x147   : > { %v7807_v34 = vadd.f32 %v938_v17, %v7725_v7  ;;  %v1244_v24 = vadd.f32 %v1141_v32, %v7758_v33 }
 0x148   : > { %v6289_v35 = vpop.f32.mrf.mxu1  ;;  %v6303_v38 = vpop.f32.mrf.mxu0 }
 0x149   : > { %v7811_v40 = vadd.f32 %v6289_v35, %v7727_v9  ;;  %v1247_v27 = vadd.f32 %v6303_v38, %v7762_v36 }
 0x14a   : > { %v948_v43 = vpop.f32.mrf.mxu1  ;;  %v1151_v44 = vpop.f32.mrf.mxu0 }
 0x14b   : > { %v7815_v0 = vadd.f32 %v948_v43, %v7734_v11  ;;  %v1246_v30 = vadd.f32 %v1151_v44, %v7766_v41 }
 0x14c   : > { %v6306_v49 = vpop.f32.mrf.mxu0  ;;  %v6332_v51 = vpop.f32.mrf.mxu1 }
 0x14d   : > { %v1249_v7 = vadd.f32 %v6306_v49, %v7770_v47  ;;  %v7819_v53 = vadd.f32 %v6332_v51, %v1241_v45 }
 0x14e   : > { %v1161_v33 = vpop.f32.mrf.mxu0  ;;  %v1429_v56 = vpop.f32.mrf.mxu1 }
 0x14f   : > { %v1248_v9 = vadd.f32 %v1161_v33, %v7774_v55  ;;  %v7822_v57 = vadd.f32 %v1429_v56, %v1240_v10 }
 0x150   : > { %v6309_v36 = vpop.f32.mrf.mxu0  ;;  %v6335_v61 = vpop.f32.mrf.mxu1 }
 0x151   : > { %v1251_v63 = vadd.f32 %v6309_v36, %v7778_v59  ;;  %v7825_v11 = vadd.f32 %v6335_v61, %v1243_v16 }
 0x152   : > { %v1171_v4 = vpop.f32.mrf.mxu0  ;;  %v1439_v41 = vpop.f32.mrf.mxu1 }
 0x153   : > { %v1250_v46 = vadd.f32 %v1171_v4, %v7781_v48  ;;  %v7828_v50 = vadd.f32 %v1439_v41, %v1242_v26 }
 0x154   : > { %v6312_v47 = vpop.f32.mrf.mxu0  ;;  %v6338_v52 = vpop.f32.mrf.mxu1 }
 0x155   : > { %v1253_v20 = vadd.f32 %v6312_v47, %v7784_v18  ;;  %v7831_v22 = vadd.f32 %v6338_v52, %v1245_v31 }
 0x156   : > { %v1181_v55 = vpop.f32.mrf.mxu0  ;;  %v1449_v23 = vpop.f32.mrf.mxu1 }
 0x157   : > { %v1252_v3 = vadd.f32 %v1181_v55, %v899_v1  ;;  %v7833_v6 = vadd.f32 %v1449_v23, %v1244_v24 }
 0x158   : > { %v6315_v59 = vpop.f32.mrf.mxu0  ;;  %v6341_v58 = vpop.f32.mrf.mxu1 }
 0x159   : > { %v1255_v60 = vadd.f32 %v6315_v59, %v914_v54  ;;  %v7835_v37 = vadd.f32 %v6341_v58, %v1247_v27 }
 0x15a   : > { %v1191_v39 = vpop.f32.mrf.mxu0  ;;  %v1459_v48 = vpop.f32.mrf.mxu1 }
 0x15b   : > { %v1254_v45 = vadd.f32 %v1191_v39, %v7788_v62  ;;  %v7838_v2 = vadd.f32 %v1459_v48, %v1246_v30 }
 0x15c   : > { %v6318_v5 = vpop.f32.mrf.mxu0  ;;  %v6344_v18 = vpop.f32.mrf.mxu1 }
 0x15d   : > { %v1257_v10 = vadd.f32 %v6318_v5, %v7790_v42  ;;  %v7841_v12 = vadd.f32 %v6344_v18, %v1249_v7 }
 0x15e   : > { %v1201_v1 = vpop.f32.mrf.mxu0  ;;  %v1469_v13 = vpop.f32.mrf.mxu1 }
 0x15f   : > { %v1256_v16 = vadd.f32 %v1201_v1, %v7793_v8  ;;  %v1556_v19 = vadd.f32 %v1469_v13, %v1248_v9 }
 0x160   : > { %v6321_v54 = vpop.f32.mrf.mxu0  ;;  %v6347_v21 = vpop.f32.mrf.mxu1 }
 0x161   : > { %v1259_v26 = vadd.f32 %v6321_v54, %v7796_v15  ;;  %v1559_v28 = vadd.f32 %v6347_v21, %v1251_v63 }
 0x162   : > { %v1211_v14 = vpop.f32.mrf.mxu0  ;;  %v1479_v62 = vpop.f32.mrf.mxu1 }
 0x163   : > { %v1258_v31 = vadd.f32 %v1211_v14, %v7799_v25  ;;  %v1558_v17 = vadd.f32 %v1479_v62, %v1250_v46 }
 0x164   : > { %v6324_v32 = vpop.f32.mrf.mxu0  ;;  %v6350_v24 = vpop.f32.mrf.mxu1 }
 0x165   : > { %v1261_v42 = vadd.f32 %v6324_v32, %v7803_v29  ;;  %v1561_v35 = vadd.f32 %v6350_v24, %v1253_v20 }
 0x166   : > { %v1221_v38 = vpop.f32.mrf.mxu0  ;;  %v1489_v27 = vpop.f32.mrf.mxu1 }
 0x167   : > { %v1260_v8 = vadd.f32 %v1221_v38, %v7807_v34  ;;  %v1560_v43 = vadd.f32 %v1489_v27, %v1252_v3 }
 0x168   : > { %v6327_v44 = vpop.f32.mrf.mxu0  ;;  %v6353_v30 = vpop.f32.mrf.mxu1 }
 0x169   : > { %v1263_v15 = vadd.f32 %v6327_v44, %v7811_v40  ;;  %v1563_v49 = vadd.f32 %v6353_v30, %v1255_v60 }
 0x16a   : > { %v1231_v51 = vpop.f32.mrf.mxu0  ;;  %v1499_v7 = vpop.f32.mrf.mxu1 }
 0x16b   : > { %v1262_v25 = vadd.f32 %v1231_v51, %v7815_v0  ;;  %v1562_v33 = vadd.f32 %v1499_v7, %v1254_v45 }
 0x16c   : > { %v6356_v56 = vpop.f32.mrf.mxu1  ;;  %v6370_v9 = vpop.f32.mrf.mxu0 }
 0x16d   : > { %v1565_v36 = vadd.f32 %v6356_v56, %v1257_v10  ;;  %v7851_v29 = vadd.f32 %v6370_v9, %v7819_v53 }
 0x16e   : > { %v1509_v61 = vpop.f32.mrf.mxu1  ;;  %v1736_v63 = vpop.f32.mrf.mxu0 }
 0x16f   : > { %v1564_v34 = vadd.f32 %v1509_v61, %v1256_v16  ;;  %v7854_v4 = vadd.f32 %v1736_v63, %v7822_v57 }
 0x170   : > { %v6359_v41 = vpop.f32.mrf.mxu1  ;;  %v6373_v40 = vpop.f32.mrf.mxu0 }
 0x171   : > { %v1567_v46 = vadd.f32 %v6359_v41, %v1259_v26  ;;  %v7857_v47 = vadd.f32 %v6373_v40, %v7825_v11 }
 0x172   : > { %v1519_v0 = vpop.f32.mrf.mxu1  ;;  %v1746_v52 = vpop.f32.mrf.mxu0 }
 0x173   : > { %v1566_v20 = vadd.f32 %v1519_v0, %v1258_v31  ;;  %v7860_v55 = vadd.f32 %v1746_v52, %v7828_v50 }
 0x174   : > { %v6362_v53 = vpop.f32.mrf.mxu1  ;;  %v6376_v23 = vpop.f32.mrf.mxu0 }
 0x175   : > { %v1569_v3 = vadd.f32 %v6362_v53, %v1261_v42  ;;  %v7863_v59 = vadd.f32 %v6376_v23, %v7831_v22 }
 0x176   : > { %v1529_v57 = vpop.f32.mrf.mxu1  ;;  %v1756_v58 = vpop.f32.mrf.mxu0 }
 0x177   : > { %v1568_v60 = vadd.f32 %v1529_v57, %v1260_v8  ;;  %v7866_v39 = vadd.f32 %v1756_v58, %v7833_v6 }
 0x178   : > { %v6365_v11 = vpop.f32.mrf.mxu1  ;;  %v6379_v48 = vpop.f32.mrf.mxu0 }
 0x179   : > { %v1571_v45 = vadd.f32 %v6365_v11, %v1263_v15  ;;  %v7869_v5 = vadd.f32 %v6379_v48, %v7835_v37 }
 0x17a   : > { %v1539_v50 = vpop.f32.mrf.mxu1  ;;  %v1766_v18 = vpop.f32.mrf.mxu0 }
 0x17b   : > { %v1570_v10 = vadd.f32 %v1539_v50, %v1262_v25  ;;  %v7872_v1 = vadd.f32 %v1766_v18, %v7838_v2 }
 0x17c   : > { %v6382_v22 = vpop.f32.mrf.mxu0  ;;  %v7874_v13 = vpop.f32.mrf.mxu1 }
 0x17d   : > { %v7877_v16 = vadd.f32 %v6382_v22, %v7841_v12 }
 0x17e   : > { %v1776_v6 = vpop.f32.mrf.mxu0  ;;  %v7879_v54 = vpop.f32.mrf.mxu1 }
 0x17f   : > { %v7881_v21 = vadd.f32 %v1776_v6, %v1556_v19 }
 0x180   : > { %v6385_v26 = vpop.f32.mrf.mxu0  ;;  %v7883_v37 = vpop.f32.mrf.mxu1 }
 0x181   : > { %v7885_v14 = vadd.f32 %v6385_v26, %v1559_v28 }
 0x182   : > { %v1786_v62 = vpop.f32.mrf.mxu0  ;;  %v7887_v31 = vpop.f32.mrf.mxu1 }
 0x183   : > { %v7889_v2 = vadd.f32 %v1786_v62, %v1558_v17 }
 0x184   : > { %v6388_v32 = vpop.f32.mrf.mxu0  ;;  %v7891_v24 = vpop.f32.mrf.mxu1 }
 0x185   : > { %v7893_v12 = vadd.f32 %v6388_v32, %v1561_v35 }
 0x186   : > { %v1796_v42 = vpop.f32.mrf.mxu0  ;;  %v7895_v38 = vpop.f32.mrf.mxu1 }
 0x187   : > { %v7897_v19 = vadd.f32 %v1796_v42, %v1560_v43 }
 0x188   : > { %v6391_v27 = vpop.f32.mrf.mxu0  ;;  %v7899_v8 = vpop.f32.mrf.mxu1 }
 0x189   : > { %v7901_v28 = vadd.f32 %v6391_v27, %v1563_v49 }
 0x18a   : > { %v1806_v44 = vpop.f32.mrf.mxu0  ;;  %v7903_v30 = vpop.f32.mrf.mxu1 }
 0x18b   : > { %8764 = vst [vmem:[#allocation4_spill] sm:$0xff] %v7901_v28  ;;  %v7905_v17 = vadd.f32 %v1806_v44, %v1562_v33 }
 0x18c   : > { %v6394_v15 = vpop.f32.mrf.mxu0  ;;  %v7907_v51 = vpop.f32.mrf.mxu1 }
 0x18d   : > { %8765 = vst [vmem:[#allocation5_spill] sm:$0xff] %v7905_v17  ;;  %v7909_v35 = vadd.f32 %v6394_v15, %v1565_v36 }
 0x18e   : > { %v1816_v7 = vpop.f32.mrf.mxu0  ;;  %v7911_v25 = vpop.f32.mrf.mxu1 }
 0x18f   : > { %8766 = vst [vmem:[#allocation6_spill] sm:$0xff] %v7909_v35  ;;  %v7913_v43 = vadd.f32 %v1816_v7, %v1564_v34 }
 0x190   : > { %v6397_v56 = vpop.f32.mrf.mxu0  ;;  %v7915_v9 = vpop.f32.mrf.mxu1 }
 0x191   : > { %8767 = vst [vmem:[#allocation7_spill] sm:$0xff] %v7913_v43  ;;  %v7917_v49 = vadd.f32 %v6397_v56, %v1567_v46 }
 0x192   : > { %v1826_v61 = vpop.f32.mrf.mxu0  ;;  %v7919_v63 = vpop.f32.mrf.mxu1 }
 0x193   : > { %8768 = vst [vmem:[#allocation8_spill] sm:$0xff] %v7917_v49  ;;  %v7921_v33 = vadd.f32 %v1826_v61, %v1566_v20 }
 0x194   : > { %v6400_v41 = vpop.f32.mrf.mxu0  ;;  %v7923_v40 = vpop.f32.mrf.mxu1 }
 0x195   : > { %8769 = vst [vmem:[#allocation9_spill] sm:$0xff] %v7921_v33  ;;  %v7925_v36 = vadd.f32 %v6400_v41, %v1569_v3 }
 0x196   : > { %v1836_v0 = vpop.f32.mrf.mxu0  ;;  %v7927_v52 = vpop.f32.mrf.mxu1 }
 0x197   : > { %8770 = vst [vmem:[#allocation10_spill] sm:$0xff] %v7925_v36  ;;  %v7929_v34 = vadd.f32 %v1836_v0, %v1568_v60 }
 0x198   : > { %v6403_v53 = vpop.f32.mrf.mxu0  ;;  %v7931_v23 = vpop.f32.mrf.mxu1 }
 0x199   : > { %8771 = vst [vmem:[#allocation11_spill] sm:$0xff] %v7929_v34  ;;  %8772 = vst [vmem:[#allocation12_spill] sm:$0xff] %v7931_v23  ;;  %v7933_v46 = vadd.f32 %v6403_v53, %v1571_v45 }
 0x19a   : > { %v1846_v57 = vpop.f32.mrf.mxu0  ;;  %v7935_v58 = vpop.f32.mrf.mxu1 }
 0x19b   : > { %8773 = vst [vmem:[#allocation13_spill] sm:$0xff] %v7933_v46  ;;  %8774 = vst [vmem:[#allocation14_spill] sm:$0xff] %v7935_v58  ;;  %v7937_v20 = vadd.f32 %v1846_v57, %v1570_v10 }
 0x19c   : > { %v7939_v11 = vpop.f32.mrf.mxu1  ;;  %v6446_v48 = vpop.f32.mrf.mxu0 }
 0x19d   : > { %8775 = vst [vmem:[#allocation15_spill] sm:$0xff] %v7937_v20  ;;  %8776 = vst [vmem:[#allocation16_spill] sm:$0xff] %v7939_v11 }
 0x19e   : > { %v7941_v3 = vpop.f32.mrf.mxu1  ;;  %v2350_v50 = vpop.f32.mrf.mxu0 }
 0x19f   : > { %8777 = vst [vmem:[#allocation17_spill] sm:$0xff] %v7941_v3 }
 0x1a0   : > { %v7943_v18 = vpop.f32.mrf.mxu1  ;;  %v6449_v60 = vpop.f32.mrf.mxu0 }
 0x1a1   : > { %8778 = vst [vmem:[#allocation18_spill] sm:$0xff] %v7943_v18 }
 0x1a2   : > { %v7945_v22 = vpop.f32.mrf.mxu1  ;;  %v2360_v6 = vpop.f32.mrf.mxu0 }
 0x1a3   : > { %8779 = vst [vmem:[#allocation19_spill] sm:$0xff] %v7945_v22 }
 0x1a4   : > { %v7947_v26 = vpop.f32.mrf.mxu1  ;;  %v6452_v45 = vpop.f32.mrf.mxu0 }
 0x1a5   : > { %8780 = vst [vmem:[#allocation20_spill] sm:$0xff] %v7947_v26 }
 0x1a6   : > { %v7949_v62 = vpop.f32.mrf.mxu1  ;;  %v2370_v32 = vpop.f32.mrf.mxu0 }
 0x1a7   : > { %8781 = vst [vmem:[#allocation21_spill] sm:$0xff] %v7949_v62 }
 0x1a8   : > { %v7951_v10 = vpop.f32.mrf.mxu1  ;;  %v7953_v42 = vpop.f32.mrf.mxu0 }
 0x1a9   : > { %8782 = vst [vmem:[#allocation22_spill] sm:$0xff] %v7951_v10 }
 0x1aa   : > { %v7955_v27 = vpop.f32.mrf.mxu1  ;;  %v7957_v44 = vpop.f32.mrf.mxu0 }
 0x1ab   : > { %8783 = vst [vmem:[#allocation23_spill] sm:$0xff] %v7955_v27 }
 0x1ac   : > { %v7959_v15 = vpop.f32.mrf.mxu0  ;;  %v6484_v7 = vpop.f32.mrf.mxu1 }
 0x1ae   : > { %v7961_v56 = vpop.f32.mrf.mxu0  ;;  %v2657_v61 = vpop.f32.mrf.mxu1 }
 0x1b0   : > { %v7963_v41 = vpop.f32.mrf.mxu0  ;;  %v6487_v0 = vpop.f32.mrf.mxu1 }
 0x1b2   : > { %v7965_v53 = vpop.f32.mrf.mxu0  ;;  %v2667_v57 = vpop.f32.mrf.mxu1 }
 0x1b4   : > { %v7967_v20 = vpop.f32.mrf.mxu0  ;;  %v6490_v10 = vpop.f32.mrf.mxu1 }
 0x1b6   : > { %v7969_v46 = vpop.f32.mrf.mxu0  ;;  %v2677_v27 = vpop.f32.mrf.mxu1 }
 0x1b7   : > { %8784 = vst [vmem:[#allocation24_spill] sm:$0xff] %v7969_v46 }
 0x1b8   : > { %v7971_v62 = vpop.f32.mrf.mxu0  ;;  %v7973_v34 = vpop.f32.mrf.mxu1 }
 0x1b9   : > { %8785 = vst [vmem:[#allocation25_spill] sm:$0xff] %v7971_v62 }
 0x1ba   : > { %v7975_v26 = vpop.f32.mrf.mxu0  ;;  %v7977_v36 = vpop.f32.mrf.mxu1 }
 0x1bb   : > { %8786 = vst [vmem:[#allocation26_spill] sm:$0xff] %v7975_v26 }
 0x1bc   : > { %v7979_v22 = vpop.f32.mrf.mxu0  ;;  %v7981_v33 = vpop.f32.mrf.mxu1 }
 0x1bd   : > { %8787 = vst [vmem:[#allocation27_spill] sm:$0xff] %v7979_v22  ;;  %v2163_v22 = vadd.f32 %v7874_v13, %v7851_v29  ;;  %v8014_v29 = vld [vmem:[%s8761_s3] ss:$0 sm:$0xff]  ;;  %v2164_v13 = vadd.f32 %v7887_v31, %v7860_v55 }
 0x1be   : > { %v7983_v18 = vpop.f32.mrf.mxu0  ;;  %v7985_v49 = vpop.f32.mrf.mxu1 }
 0x1bf   : > { %8788 = vst [vmem:[#allocation28_spill] sm:$0xff] %v7983_v18  ;;  %v2162_v18 = vadd.f32 %v7879_v54, %v7854_v4  ;;  %v2470_v17 = vadd.f32 %v6446_v48, %v2163_v22  ;;  %v2167_v22 = vadd.f32 %v7891_v24, %v7863_v59  ;;  %v2169_v59 = vadd.f32 %v7899_v8, %v7869_v5 }
 0x1c0   : > { %v7987_v3 = vpop.f32.mrf.mxu0  ;;  %v7989_v43 = vpop.f32.mrf.mxu1 }
 0x1c1   : > { %8789 = vst [vmem:[#allocation29_spill] sm:$0xff] %v7987_v3  ;;  %v2777_v23 = vadd.f32 %v6484_v7, %v2470_v17  ;;  %v2166_v7 = vadd.f32 %v7895_v38, %v7866_v39 }
 0x1c2   : > { %v7991_v11 = vpop.f32.mrf.mxu0  ;;  %v7995_v62 = vpop.f32.mrf.mxu1 }
 0x1c3   : > { %8790 = vst [vmem:[#allocation30_spill] sm:$0xff] %v7991_v11  ;;  %v2469_v11 = vadd.f32 %v2350_v50, %v2162_v18  ;;  %v2473_v24 = vadd.f32 %v2370_v32, %v2166_v7 }
 0x1c4   : > { %v7993_v35 = vpop.f32.mrf.mxu0  ;;  %v8005_v3 = vpop.f32.mrf.mxu1 }
 0x1c5   : > { %8791 = vst [vmem:[#allocation31_spill] sm:$0xff] %v7993_v35  ;;  %v2165_v35 = vadd.f32 %v7883_v37, %v7857_v47  ;;  %v2776_v54 = vadd.f32 %v2657_v61, %v2469_v11  ;;  %v2471_v37 = vadd.f32 %v2360_v6, %v2164_v13  ;;  %v2476_v61 = vadd.f32 %v7953_v42, %v2169_v59 }
 0x1c6   : > { %v7997_v26 = vpop.f32.mrf.mxu0  ;;  %v2174_v59 = vadd.f32 %v7927_v52, %v7897_v19 }
 0x1c7   : > { %8792 = vst [vmem:[#allocation32_spill] sm:$0xff] %v7997_v26  ;;  %v2472_v4 = vadd.f32 %v6449_v60, %v2165_v35  ;;  %v2778_v55 = vadd.f32 %v2667_v57, %v2471_v37 }
 0x1c8   : > { %v8001_v58 = vpop.f32.mrf.mxu0 }
 0x1c9   : > { %8793 = vst [vmem:[#allocation33_spill] sm:$0xff] %v8001_v58  ;;  %v2779_v17 = vadd.f32 %v6487_v0, %v2472_v4  ;;  %v2474_v58 = vadd.f32 %v6452_v45, %v2167_v22  ;;  %v2168_v45 = vadd.f32 %v7903_v30, %v7872_v1  ;;  %v2780_v0 = vadd.f32 %v2677_v27, %v2473_v24 }
 0x1ca   : > { %v8007_v46 = vpop.f32.mrf.mxu0  ;;  %v2783_v1 = vadd.f32 %v7973_v34, %v2476_v61  ;;  %v2170_v4 = vadd.f32 %v7911_v25, %v7881_v21  ;;  %v2173_v22 = vadd.f32 %v7915_v9, %v7885_v14 }
 0x1cb   : > { %8794 = vst [vmem:[#allocation34_spill] sm:$0xff] %v8007_v46  ;;  %v8020_v46 = vpop.f32.mrf.mxu1  ;;  %v2781_v60 = vadd.f32 %v6490_v10, %v2474_v58  ;;  %v2171_v58 = vadd.f32 %v7907_v51, %v7877_v16  ;;  %v2475_v10 = vadd.f32 %v7957_v44, %v2168_v45 }
 0x1cc   : > { %v6522_v28 = vpop.f32.mrf.mxu0 }
 0x1cd   : > { %v3084_v48 = vadd.f32 %v6522_v28, %v2777_v23  ;;  %v8028_v23 = vpop.f32.mrf.mxu1  ;;  %v2782_v16 = vadd.f32 %v7977_v36, %v2475_v10 }
 0x1ce   : > { %v2964_v47 = vpop.f32.mrf.mxu0 }
 0x1cf   : > { %v3115_v50 = vadd.f32 %v8014_v29, %v3084_v48  ;;  %v3083_v18 = vadd.f32 %v2964_v47, %v2776_v54  ;;  %v8040_v57 = vpop.f32.mrf.mxu1  ;;  %v2478_v54 = vadd.f32 %v7959_v15, %v2171_v58  ;;  %v2477_v47 = vadd.f32 %v7961_v56, %v2170_v4 }
 0x1d0   : > { %v6525_v26 = vpop.f32.mrf.mxu0 }
 0x1d1   : > { %v3139_v31 = vmax.f32 %v3115_v50, 0.0  ;;  %v3114_v28 = vadd.f32 %v8014_v29, %v3083_v18  ;;  %v3086_v35 = vadd.f32 %v6525_v26, %v2779_v17  ;;  %v8054_v37 = vpop.f32.mrf.mxu1  ;;  %v2785_v21 = vadd.f32 %v7981_v33, %v2478_v54  ;;  %v8803_v54 = vld [vmem:[#allocation26_spill] sm:$0xff] }
 0x1d2   : > { %v2974_v11 = vpop.f32.mrf.mxu0  ;;  %v2172_v50 = vadd.f32 %v7919_v63, %v7889_v2  ;;  %v2480_v18 = vadd.f32 %v7963_v41, %v2173_v22  ;;  %v2784_v14 = vadd.f32 %v7985_v49, %v2477_v47  ;;  %v8804_v47 = vld [vmem:[#allocation7_spill] sm:$0xff] }
 0x1d3   : > { %3187 = vst.msk [vmem:[#allocation3 + $0xa] sm:$0xff] %vm303_vm1, %v3139_v31  ;;  %v3138_v6 = vmax.f32 %v3114_v28, 0.0  ;;  %v3117_v39 = vadd.f32 %v8014_v29, %v3086_v35  ;;  %v3085_v38 = vadd.f32 %v2974_v11, %v2778_v55  ;;  %v2175_v55 = vadd.f32 %v7923_v40, %v7893_v12  ;;  %v2737_v28 = vpop.f32.mrf.mxu1 }
 0x1d4   : > { %v6528_v26 = vpop.f32.mrf.mxu0  ;;  %v2479_v31 = vadd.f32 %v7965_v53, %v2172_v50  ;;  %v2787_v2 = vadd.f32 %v7989_v43, %v2480_v18 }
 0x1d5   : > { %3186 = vst.msk [vmem:[#allocation3 + $0x2] sm:$0xff] %vm303_vm1, %v3138_v6  ;;  %v3141_v5 = vmax.f32 %v3117_v39, 0.0  ;;  %v3116_v8 = vadd.f32 %v8014_v29, %v3085_v38  ;;  %v3088_v32 = vadd.f32 %v6528_v26, %v2781_v60  ;;  %v2482_v24 = vadd.f32 %v7967_v20, %v2175_v55  ;;  %v8795_v60 = vld [vmem:[#allocation4_spill] sm:$0xff]  ;;  %v6511_v61 = vpop.f32.mrf.mxu1 }
 0x1d6   : > { %v2984_v13 = vpop.f32.mrf.mxu0  ;;  %v2786_v12 = vadd.f32 %v7995_v62, %v2479_v31  ;;  %v8796_v6 = vld [vmem:[#allocation12_spill] sm:$0xff] }
 0x1d7   : > { %3189 = vst.msk [vmem:[#allocation3 + $0x22] sm:$0xff] %vm303_vm1, %v3141_v5  ;;  %v3140_v30 = vmax.f32 %v3116_v8, 0.0  ;;  %v3119_v42 = vadd.f32 %v8014_v29, %v3088_v32  ;;  %v3087_v27 = vadd.f32 %v2984_v13, %v2780_v0  ;;  %v2177_v39 = vadd.f32 %v8796_v6, %v8795_v60  ;;  %v8797_v38 = vld [vmem:[#allocation24_spill] sm:$0xff]  ;;  %v8798_v0 = vld [vmem:[#allocation5_spill] sm:$0xff]  ;;  %v8799_v5 = vld [vmem:[#allocation14_spill] sm:$0xff] }
 0x1d8   : > { %v6531_v48 = vpop.f32.mrf.mxu0  ;;  %v2481_v45 = vadd.f32 %v8797_v38, %v2174_v59  ;;  %v2789_v19 = vadd.f32 %v8005_v3, %v2482_v24  ;;  %v2176_v8 = vadd.f32 %v8799_v5, %v8798_v0  ;;  %v8800_v32 = vld [vmem:[#allocation25_spill] sm:$0xff]  ;;  %v8811_v59 = vld [vmem:[#allocation19_spill] sm:$0xff] }
 0x1d9   : > { %3188 = vst.msk [vmem:[#allocation3 + $0x1a] sm:$0xff] %vm303_vm1, %v3140_v30  ;;  %v3143_v51 = vmax.f32 %v3119_v42, 0.0  ;;  %v3118_v44 = vadd.f32 %v8014_v29, %v3087_v27  ;;  %v3090_v34 = vadd.f32 %v6531_v48, %v2783_v1  ;;  %v2484_v58 = vadd.f32 %v8800_v32, %v2177_v39  ;;  %v8801_v42 = vld [vmem:[#allocation6_spill] sm:$0xff]  ;;  %v8802_v27 = vld [vmem:[#allocation16_spill] sm:$0xff]  ;;  %v8816_v5 = vld [vmem:[#allocation11_spill] sm:$0xff] }
 0x1da   : > { %v2994_v17 = vpop.f32.mrf.mxu0  ;;  %v2788_v13 = vadd.f32 %v8020_v46, %v2481_v45  ;;  %v2179_v4 = vadd.f32 %v8802_v27, %v8801_v42  ;;  %v2483_v48 = vadd.f32 %v8803_v54, %v2176_v8  ;;  %v8814_v39 = vld [vmem:[#allocation20_spill] sm:$0xff]  ;;  %v8815_v45 = vld [vmem:[#allocation30_spill] sm:$0xff]  ;;  %v8817_v8 = vld [vmem:[#allocation21_spill] sm:$0xff] }
 0x1db   : > { %3191 = vst.msk [vmem:[#allocation3 + $0x3a] sm:$0xff] %vm303_vm1, %v3143_v51  ;;  %v3142_v25 = vmax.f32 %v3118_v44, 0.0  ;;  %v3121_v36 = vadd.f32 %v8014_v29, %v3090_v34  ;;  %v3089_v15 = vadd.f32 %v2994_v17, %v2782_v16  ;;  %v2747_v16 = vpop.f32.mrf.mxu1  ;;  %v2791_v44 = vadd.f32 %v8028_v23, %v2484_v58  ;;  %v8805_v17 = vld [vmem:[#allocation17_spill] sm:$0xff]  ;;  %v8818_v58 = vld [vmem:[#allocation31_spill] sm:$0xff]  ;;  %v8820_v27 = vld [vmem:[#allocation22_spill] sm:$0xff] }
 0x1dc   : > { %v6534_v7 = vpop.f32.mrf.mxu0  ;;  %v2790_v50 = vadd.f32 %v8040_v57, %v2483_v48  ;;  %v2182_v32 = vadd.f32 %v8817_v8, %v8816_v5  ;;  %v8821_v54 = vld [vmem:[#allocation32_spill] sm:$0xff] }
 0x1dd   : > { %3190 = vst.msk [vmem:[#allocation3 + $0x32] sm:$0xff] %vm303_vm1, %v3142_v25  ;;  %v3145_v9 = vmax.f32 %v3121_v36, 0.0  ;;  %v3120_v56 = vadd.f32 %v8014_v29, %v3089_v15  ;;  %v3092_v33 = vadd.f32 %v6534_v7, %v2785_v21  ;;  %v2178_v21 = vadd.f32 %v8805_v17, %v8804_v47  ;;  %v8806_v25 = vld [vmem:[#allocation27_spill] sm:$0xff]  ;;  %v6514_v31 = vpop.f32.mrf.mxu1 }
 0x1de   : > { %v3004_v35 = vpop.f32.mrf.mxu0  ;;  %v2486_v36 = vadd.f32 %v8806_v25, %v2179_v4  ;;  %v2489_v48 = vadd.f32 %v8821_v54, %v2182_v32  ;;  %v8822_v47 = vld [vmem:[#allocation15_spill] sm:$0xff]  ;;  %v8824_v25 = vld [vmem:[#allocation33_spill] sm:$0xff] }
 0x1df   : > { %3193 = vst.msk [vmem:[#allocation3 + $0x52] sm:$0xff] %vm303_vm1, %v3145_v9  ;;  %v3144_v63 = vmax.f32 %v3120_v56, 0.0  ;;  %v3123_v49 = vadd.f32 %v8014_v29, %v3092_v33  ;;  %v3091_v41 = vadd.f32 %v3004_v35, %v2784_v14  ;;  %v8807_v14 = vld [vmem:[#allocation8_spill] sm:$0xff]  ;;  %v8808_v9 = vld [vmem:[#allocation18_spill] sm:$0xff]  ;;  %v8823_v17 = vld [vmem:[#allocation23_spill] sm:$0xff] }
 0x1e0   : > { %v6537_v11 = vpop.f32.mrf.mxu0  ;;  %v2181_v56 = vadd.f32 %v8808_v9, %v8807_v14  ;;  %v8809_v33 = vld [vmem:[#allocation28_spill] sm:$0xff]  ;;  %v8825_v14 = vld [vmem:[#allocation34_spill] sm:$0xff] }
 0x1e1   : > { %3192 = vst.msk [vmem:[#allocation3 + $0x4a] sm:$0xff] %vm303_vm1, %v3144_v63  ;;  %v3147_v40 = vmax.f32 %v3123_v49, 0.0  ;;  %v3122_v53 = vadd.f32 %v8014_v29, %v3091_v41  ;;  %v3094_v43 = vadd.f32 %v6537_v11, %v2787_v2  ;;  %v2485_v55 = vadd.f32 %v8809_v33, %v2178_v21  ;;  %v8810_v41 = vld [vmem:[#allocation9_spill] sm:$0xff] }
 0x1e2   : > { %v3014_v26 = vpop.f32.mrf.mxu0  ;;  %v2793_v2 = vadd.f32 %v8054_v37, %v2486_v36  ;;  %v2180_v24 = vadd.f32 %v8811_v59, %v8810_v41  ;;  %v8812_v11 = vld [vmem:[#allocation29_spill] sm:$0xff]  ;;  %v8813_v37 = vld [vmem:[#allocation10_spill] sm:$0xff]  ;;  %v2184_v21 = vadd.f32 %v8823_v17, %v8822_v47 }
 0x1e3   : > { %3195 = vst.msk [vmem:[#allocation3 + $0x6a] sm:$0xff] %vm303_vm1, %v3147_v40  ;;  %v3146_v52 = vmax.f32 %v3122_v53, 0.0  ;;  %v3125_v20 = vadd.f32 %v8014_v29, %v3094_v43  ;;  %v3093_v62 = vadd.f32 %v3014_v26, %v2786_v12  ;;  %v2488_v12 = vadd.f32 %v8812_v11, %v2181_v56 }
 0x1e4   : > { %v6540_v10 = vpop.f32.mrf.mxu0  ;;  %v2792_v53 = vadd.f32 %v2737_v28, %v2485_v55  ;;  %v2183_v38 = vadd.f32 %v8814_v39, %v8813_v37  ;;  %v2487_v26 = vadd.f32 %v8815_v45, %v2180_v24  ;;  %v2491_v9 = vadd.f32 %v8825_v14, %v2184_v21 }
 0x1e5   : > { %3194 = vst.msk [vmem:[#allocation3 + $0x62] sm:$0xff] %vm303_vm1, %v3146_v52  ;;  %v3149_v1 = vmax.f32 %v3125_v20, 0.0  ;;  %v3124_v30 = vadd.f32 %v8014_v29, %v3093_v62  ;;  %v3096_v3 = vadd.f32 %v6540_v10, %v2789_v19  ;;  %v2757_v19 = vpop.f32.mrf.mxu1  ;;  %v2795_v20 = vadd.f32 %v6511_v61, %v2488_v12  ;;  %v8819_v61 = vld [vmem:[#allocation13_spill] sm:$0xff] }
 0x1e6   : > { %v3024_v51 = vpop.f32.mrf.mxu0  ;;  %v2490_v10 = vadd.f32 %v8818_v58, %v2183_v38  ;;  %v2185_v4 = vadd.f32 %v8820_v27, %v8819_v61 }
 0x1e7   : > { %3197 = vst.msk [vmem:[#allocation3 + $0x82] sm:$0xff] %vm303_vm1, %v3149_v1  ;;  %v3148_v34 = vmax.f32 %v3124_v30, 0.0  ;;  %v3127_v46 = vadd.f32 %v8014_v29, %v3096_v3  ;;  %v3095_v22 = vadd.f32 %v3024_v51, %v2788_v13  ;;  %v2794_v1 = vadd.f32 %v2747_v16, %v2487_v26  ;;  %v6517_v51 = vpop.f32.mrf.mxu1 }
 0x1e8   : > { %v6543_v15 = vpop.f32.mrf.mxu0  ;;  %v2492_v36 = vadd.f32 %v8824_v25, %v2185_v4 }
 0x1e9   : > { %3196 = vst.msk [vmem:[#allocation3 + $0x7a] sm:$0xff] %vm303_vm1, %v3148_v34  ;;  %v3151_v18 = vmax.f32 %v3127_v46, 0.0  ;;  %v3126_v7 = vadd.f32 %v8014_v29, %v3095_v22  ;;  %v3098_v23 = vadd.f32 %v6543_v15, %v2791_v44  ;;  %v2797_v34 = vadd.f32 %v6514_v31, %v2490_v10  ;;  %v2767_v56 = vpop.f32.mrf.mxu1 }
 0x1ea   : > { %v3034_v35 = vpop.f32.mrf.mxu0  ;;  %v2799_v55 = vadd.f32 %v6517_v51, %v2492_v36 }
 0x1eb   : > { %3199 = vst.msk [vmem:[#allocation3 + $0x9a] sm:$0xff] %vm303_vm1, %v3151_v18  ;;  %v3150_v63 = vmax.f32 %v3126_v7, 0.0  ;;  %v3129_v57 = vadd.f32 %v8014_v29, %v3098_v23  ;;  %v3097_v49 = vadd.f32 %v3034_v35, %v2790_v50  ;;  %v2796_v50 = vadd.f32 %v2757_v19, %v2489_v48 }
 0x1ec   : > { %v6546_v40 = vpop.f32.mrf.mxu0 }
 0x1ed   : > { %3198 = vst.msk [vmem:[#allocation3 + $0x92] sm:$0xff] %vm303_vm1, %v3150_v63  ;;  %v3153_v43 = vmax.f32 %v3129_v57, 0.0  ;;  %v3128_v60 = vadd.f32 %v8014_v29, %v3097_v49  ;;  %v3100_v6 = vadd.f32 %v6546_v40, %v2793_v2  ;;  %v2798_v57 = vadd.f32 %v2767_v56, %v2491_v9 }
 0x1ee   : > { %v3044_v52 = vpop.f32.mrf.mxu0 }
 0x1ef   : > { %3201 = vst.msk [vmem:[#allocation3 + $0xb2] sm:$0xff] %vm303_vm1, %v3153_v43  ;;  %v3152_v62 = vmax.f32 %v3128_v60, 0.0  ;;  %v3131_v0 = vadd.f32 %v8014_v29, %v3100_v6  ;;  %v3099_v28 = vadd.f32 %v3044_v52, %v2792_v53 }
 0x1f0   : > { %v6549_v13 = vpop.f32.mrf.mxu0 }
 0x1f1   : > { %3200 = vst.msk [vmem:[#allocation3 + $0xaa] sm:$0xff] %vm303_vm1, %v3152_v62  ;;  %v3155_v30 = vmax.f32 %v3131_v0, 0.0  ;;  %v3130_v3 = vadd.f32 %v8014_v29, %v3099_v28  ;;  %v3102_v42 = vadd.f32 %v6549_v13, %v2795_v20 }
 0x1f2   : > { %v3054_v44 = vpop.f32.mrf.mxu0 }
 0x1f3   : > { %3203 = vst.msk [vmem:[#allocation3 + $0xca] sm:$0xff] %vm303_vm1, %v3155_v30  ;;  %v3154_v46 = vmax.f32 %v3130_v3, 0.0  ;;  %v3133_v22 = vadd.f32 %v8014_v29, %v3102_v42  ;;  %v3101_v16 = vadd.f32 %v3054_v44, %v2794_v1 }
 0x1f4   : > { %v6552_v15 = vpop.f32.mrf.mxu0 }
 0x1f5   : > { %3202 = vst.msk [vmem:[#allocation3 + $0xc2] sm:$0xff] %vm303_vm1, %v3154_v46  ;;  %v3157_v18 = vmax.f32 %v3133_v22, 0.0  ;;  %v3132_v7 = vadd.f32 %v8014_v29, %v3101_v16  ;;  %v3104_v23 = vadd.f32 %v6552_v15, %v2797_v34 }
 0x1f6   : > { %v3064_v33 = vpop.f32.mrf.mxu0 }
 0x1f7   : > { %3205 = vst.msk [vmem:[#allocation3 + $0xe2] sm:$0xff] %vm303_vm1, %v3157_v18  ;;  %v3156_v31 = vmax.f32 %v3132_v7, 0.0  ;;  %v3135_v35 = vadd.f32 %v8014_v29, %v3104_v23  ;;  %v3103_v2 = vadd.f32 %v3064_v33, %v2796_v50 }
 0x1f8   : > { %v6555_v63 = vpop.f32.mrf.mxu0 }
 0x1f9   : > { %3204 = vst.msk [vmem:[#allocation3 + $0xda] sm:$0xff] %vm303_vm1, %v3156_v31  ;;  %v3159_v49 = vmax.f32 %v3135_v35, 0.0  ;;  %v3134_v41 = vadd.f32 %v8014_v29, %v3103_v2  ;;  %v3106_v59 = vadd.f32 %v6555_v63, %v2799_v55 }
 0x1fa   : > { %v3074_v24 = vpop.f32.mrf.mxu0 }
 0x1fb   : > { %3207 = vst.msk [vmem:[#allocation3 + $0xfa] sm:$0xff] %vm303_vm1, %v3159_v49  ;;  %v3158_v11 = vmax.f32 %v3134_v41, 0.0  ;;  %v3137_v12 = vadd.f32 %v8014_v29, %v3106_v59  ;;  %v3105_v40 = vadd.f32 %v3074_v24, %v2798_v57 }
 0x1fd   : > { %3206 = vst.msk [vmem:[#allocation3 + $0xf2] sm:$0xff] %vm303_vm1, %v3158_v11  ;;  %v3161_v53 = vmax.f32 %v3137_v12, 0.0  ;;  %v3136_v43 = vadd.f32 %v8014_v29, %v3105_v40  ;;  %3212 = sbr.rel (%p5438_p8) target bundleno = 517 (0x205), region = 60 }
 0x1ff   : > { %3209 = vst.msk [vmem:[#allocation3 + $0x112] sm:$0xff] %vm303_vm1, %v3161_v53  ;;  %v3160_v60 = vmax.f32 %v3136_v43, 0.0 }
 0x201   : > { %3208 = vst.msk [vmem:[#allocation3 + $0x10a] sm:$0xff] %vm303_vm1, %v3160_v60 }
 0x202   : > { %v6880_v6 = vmov 0.0  }
 0x203   : > { %3213 = vst.msk [vmem:[#allocation3 + $0x2] sm:$0xff] %vm303_vm1, %v6880_v6  ;;  %3214 = vst.msk [vmem:[#allocation3 + $0xa] sm:$0xff] %vm303_vm1, %v6880_v6 }
 0x204   : > { %3215 = vst.msk [vmem:[#allocation3 + $0x1a] sm:$0xff] %vm303_vm1, %v6880_v6  ;;  %3216 = vst.msk [vmem:[#allocation3 + $0x22] sm:$0xff] %vm303_vm1, %v6880_v6 }
 0x205 PF: > { %3219 = sbr.rel (%p5450_p10) target bundleno = 525 (0x20d), region = 64 }
 0x20a   : > { %v6881_v29 = vmov 0.0  }
 0x20b   : > { %3221 = vst.msk [vmem:[#allocation3 + $0xf2] sm:$0xff] %vm303_vm1, %v6881_v29  ;;  %3222 = vst.msk [vmem:[#allocation3 + $0xfa] sm:$0xff] %vm303_vm1, %v6881_v29 }
 0x20c   : > { %3223 = vst.msk [vmem:[#allocation3 + $0x10a] sm:$0xff] %vm303_vm1, %v6881_v29  ;;  %3224 = vst.msk [vmem:[#allocation3 + $0x112] sm:$0xff] %vm303_vm1, %v6881_v29 }
 0x20d PF: > { %v5678_v37 = vld [vmem:[%s8760_s2 + $0x8] sm:$0xff]  ;;  %v3241_v45 = vld [vmem:[%s8760_s2] sm:$0xff]  ;;  %v8164_v52 = vld [vmem:[#allocation3 + $0x32] sm:$0xff] }
 0x20e   : > { %v3242_v39 = vld [vmem:[#allocation3 + $0x2] sm:$0xff]  ;;  %v3243_v38 = vld [vmem:[#allocation3 + $0xa] sm:$0xff]  ;;  %6556 = vmatprep.subr.mxu1 %v5678_v37  ;;  %v3244_v26 = vld [vmem:[#allocation3 + $0x1a] sm:$0xff] }
 0x20f   : > { %6558 = vmatprep.mubr.msk.f32.mxu1 %vm303_vm1, %v3242_v39  ;;  %6557 = vmatpush3.msra.mxu1 %v5678_v37  ;;  %v3245_v19 = vld [vmem:[#allocation3 + $0x22] sm:$0xff]  ;;  %v5711_v20 = vld [vmem:[%s8760_s2 + $0x10] sm:$0xff]  ;;  %v8173_v0 = vld [vmem:[%s8760_s2 + $0x18] sm:$0xff] }
 0x210   : > { %6559 = vmatmul.mubr.msk.f32.vlgmr.msra.gmra.mxu1 %vm303_vm1, %v3243_v38  ;;  %6582 = vmatprep.subr.mxu1 %v3241_v45  ;;  %v3646_v62 = vld [vmem:[#allocation3 + $0x4] sm:$0xff]  ;;  %v3647_v28 = vld [vmem:[#allocation3 + $0xc] sm:$0xff]  ;;  %v8177_v5 = vld [vmem:[#allocation3 + $0x3a] sm:$0xff] }
 0x211   : > { %6583 = vmatpush3.msra.mxu1 %v3241_v45  ;;  %6561 = vmatprep.mubr.msk.f32.mxu1 %vm303_vm1, %v3244_v26  ;;  %v5745_v8 = vld [vmem:[%s8760_s2 + $0x20] sm:$0xff]  ;;  %v8182_v32 = vld [vmem:[#allocation3 + $0x4a] sm:$0xff]  ;;  %v8191_v13 = vld [vmem:[#allocation3 + $0x52] sm:$0xff] }
 0x212   : > { %6608 = vmatprep.subr.mxu0 %v5711_v20  ;;  %6610 = vmatprep.mubr.msk.f32.mxu0 %vm303_vm1, %v3646_v62  ;;  %v3648_v58 = vld [vmem:[#allocation3 + $0x1c] sm:$0xff]  ;;  %v3649_v10 = vld [vmem:[#allocation3 + $0x24] sm:$0xff]  ;;  %v8194_v1 = vld [vmem:[#allocation3 + $0x34] sm:$0xff] }
 0x213   : > { %6609 = vmatpush3.msra.mxu0 %v5711_v20  ;;  %6634 = vmatprep.subr.mxu1 %v8173_v0  ;;  %v8196_v30 = vld [vmem:[#allocation3 + $0x62] sm:$0xff]  ;;  %v8207_v42 = vld [vmem:[#allocation3 + $0x6a] sm:$0xff]  ;;  %v8211_v27 = vld [vmem:[#allocation3 + $0x7a] sm:$0xff] }
 0x214   : > { %6562 = vmatmul.mubr.msk.f32.gmra.mxu1 %vm303_vm1, %v3245_v19  ;;  %6611 = vmatmul.mubr.msk.f32.vlgmr.msra.gmra.mxu0 %vm303_vm1, %v3647_v28  ;;  %v8203_v3 = vld [vmem:[#allocation3 + $0x3c] sm:$0xff]  ;;  %v8209_v61 = vld [vmem:[#allocation3 + $0x4c] sm:$0xff]  ;;  %v8222_v54 = vld [vmem:[#allocation3 + $0x54] sm:$0xff] }
 0x215   : > { %6564 = vmatprep.mubr.msk.f32.mxu1 %vm303_vm1, %v8164_v52  ;;  %6660 = vmatprep.subr.mxu0 %v5745_v8  ;;  %v5779_v4 = vld [vmem:[%s8760_s2 + $0x30] sm:$0xff]  ;;  %v8226_v48 = vld [vmem:[#allocation3 + $0x82] sm:$0xff]  ;;  %v8242_v46 = vld [vmem:[#allocation3 + $0x9a] sm:$0xff] }
 0x216   : > { %6661 = vmatpush3.msra.mxu0 %v5745_v8  ;;  %6613 = vmatprep.mubr.msk.f32.mxu0 %vm303_vm1, %v3648_v58  ;;  %v8228_v51 = vld [vmem:[#allocation3 + $0x64] sm:$0xff]  ;;  %v8230_v44 = vld [vmem:[#allocation3 + $0x92] sm:$0xff]  ;;  %v8244_v22 = vld [vmem:[#allocation3 + $0x7c] sm:$0xff] }
 0x217   : > { %6712 = vmatprep.subr.mxu0 %v5779_v4  ;;  %v8238_v34 = vld [vmem:[#allocation3 + $0x6c] sm:$0xff]  ;;  %v8254_v47 = vld [vmem:[#allocation3 + $0x84] sm:$0xff]  ;;  %v8260_v21 = vld [vmem:[#allocation3 + $0x94] sm:$0xff] }
 0x218   : > { %6565 = vmatmul.mubr.msk.f32.gmra.mxu1 %vm303_vm1, %v8177_v5  ;;  %6614 = vmatmul.mubr.msk.f32.gmra.mxu0 %vm303_vm1, %v3649_v10  ;;  %v8246_v16 = vld [vmem:[#allocation3 + $0xaa] sm:$0xff]  ;;  %v8258_v17 = vld [vmem:[#allocation3 + $0xb2] sm:$0xff]  ;;  %v3225_v25 = vld [vmem:[#allocation3] sm:$0xff] }
 0x219   : > { %6567 = vmatprep.mubr.msk.f32.mxu1 %vm303_vm1, %v8182_v32  ;;  %6616 = vmatprep.mubr.msk.f32.mxu0 %vm303_vm1, %v8194_v1  ;;  %v8268_v36 = vld [vmem:[#allocation3 + $0x9c] sm:$0xff]  ;;  %v3226_v15 = vld [vmem:[#allocation3 + $0x8] sm:$0xff]  ;;  %v8281_v23 = vld [vmem:[#allocation3 + $0xb4] sm:$0xff] }
 0x21a   : > { %v8271_v50 = vld [vmem:[#allocation3 + $0xac] sm:$0xff]  ;;  %v3227_v18 = vld [vmem:[#allocation3 + $0x18] sm:$0xff]  ;;  %v3228_v14 = vld [vmem:[#allocation3 + $0x20] sm:$0xff] }
 0x21b   : > { %v5762_v7 = vld [vmem:[%s8760_s2 + $0x28] sm:$0xff]  ;;  %v3229_v9 = vld [vmem:[#allocation3 + $0x30] sm:$0xff]  ;;  %v3230_v56 = vld [vmem:[#allocation3 + $0x38] sm:$0xff] }
 0x21c   : > { %6568 = vmatmul.mubr.msk.f32.gmra.mxu1 %vm303_vm1, %v8191_v13  ;;  %6617 = vmatmul.mubr.msk.f32.gmra.mxu0 %vm303_vm1, %v8203_v3  ;;  %v3231_v33 = vld [vmem:[#allocation3 + $0x48] sm:$0xff]  ;;  %v5813_v55 = vld [vmem:[%s8760_s2 + $0x40] sm:$0xff]  ;;  %v3232_v31 = vld [vmem:[#allocation3 + $0x50] sm:$0xff] }
 0x21d   : > { %6570 = vmatprep.mubr.msk.f32.mxu1 %vm303_vm1, %v8196_v30  ;;  %6619 = vmatprep.mubr.msk.f32.mxu0 %vm303_vm1, %v8209_v61  ;;  %v3233_v35 = vld [vmem:[#allocation3 + $0x60] sm:$0xff]  ;;  %v3234_v2 = vld [vmem:[#allocation3 + $0x68] sm:$0xff]  ;;  %v3235_v63 = vld [vmem:[#allocation3 + $0x78] sm:$0xff] }
 0x21e   : > { %v3236_v57 = vld [vmem:[#allocation3 + $0x80] sm:$0xff]  ;;  %v3237_v49 = vld [vmem:[#allocation3 + $0x90] sm:$0xff]  ;;  %v3238_v41 = vld [vmem:[#allocation3 + $0x98] sm:$0xff] }
 0x21f   : > { %v3239_v59 = vld [vmem:[#allocation3 + $0xa8] sm:$0xff]  ;;  %v3240_v24 = vld [vmem:[#allocation3 + $0xb0] sm:$0xff]  ;;  %v8334_v40 = vld [vmem:[#allocation3 + $0xda] sm:$0xff] }
 0x220   : > { %6571 = vmatmul.mubr.msk.f32.gmra.mxu1 %vm303_vm1, %v8207_v42  ;;  %6620 = vmatmul.mubr.msk.f32.gmra.mxu0 %vm303_vm1, %v8222_v54  ;;  %v8324_v11 = vld [vmem:[#allocation3 + $0xc2] sm:$0xff]  ;;  %v8331_v12 = vld [vmem:[#allocation3 + $0xca] sm:$0xff]  ;;  %v5796_v53 = vld [vmem:[%s8760_s2 + $0x38] sm:$0xff] }
 0x221   : > { %6573 = vmatprep.mubr.msk.f32.mxu1 %vm303_vm1, %v8211_v27  ;;  %6622 = vmatprep.mubr.msk.f32.mxu0 %vm303_vm1, %v8228_v51  ;;  %v8344_v43 = vld [vmem:[#allocation3 + $0xe2] sm:$0xff]  ;;  %v3888_v29 = vld [vmem:[#allocation3 + $0xd8] sm:$0xff]  ;;  %v4568_v39 = vld [vmem:[#allocation3 + $0xf0] sm:$0xff] }
 0x222   : > { %v3886_v60 = vld [vmem:[#allocation3 + $0xc0] sm:$0xff]  ;;  %v3887_v6 = vld [vmem:[#allocation3 + $0xc8] sm:$0xff]  ;;  %v4569_v38 = vld [vmem:[#allocation3 + $0xf8] sm:$0xff] }
 0x223   : > { %v3889_v37 = vld [vmem:[#allocation3 + $0xe0] sm:$0xff]  ;;  %v4570_v45 = vld [vmem:[#allocation3 + $0x108] sm:$0xff]  ;;  %v4571_v26 = vld [vmem:[#allocation3 + $0x110] sm:$0xff] }
 0x224   : > { %6574 = vmatmul.mubr.msk.f32.gmra.mxu1 %vm303_vm1, %v8226_v48  ;;  %6623 = vmatmul.mubr.msk.f32.gmra.mxu0 %vm303_vm1, %v8238_v34  ;;  %v4340_v19 = vld [vmem:[#allocation3 + $0xc4] sm:$0xff]  ;;  %v4342_v20 = vld [vmem:[#allocation3 + $0xdc] sm:$0xff]  ;;  %v5025_v8 = vld [vmem:[#allocation3 + $0x114] sm:$0xff] }
 0x225   : > { %6576 = vmatprep.mubr.msk.f32.mxu1 %vm303_vm1, %v8230_v44  ;;  %6625 = vmatprep.mubr.msk.f32.mxu0 %vm303_vm1, %v8244_v22  ;;  %v4343_v62 = vld [vmem:[#allocation3 + $0xe4] sm:$0xff]  ;;  %v5023_v28 = vld [vmem:[#allocation3 + $0xfc] sm:$0xff] }
 0x226   : > { %v4796_v58 = vld [vmem:[#allocation3 + $0xfa] sm:$0xff]  ;;  %v4797_v10 = vld [vmem:[#allocation3 + $0x10a] sm:$0xff] }
 0x228   : > { %6577 = vmatmul.mubr.msk.f32.gmra.mxu1 %vm303_vm1, %v8242_v46  ;;  %6626 = vmatmul.mubr.msk.f32.gmra.mxu0 %vm303_vm1, %v8254_v47 }
 0x229   : > { %6579 = vmatprep.mubr.msk.f32.mxu1 %vm303_vm1, %v8246_v16  ;;  %6628 = vmatprep.mubr.msk.f32.mxu0 %vm303_vm1, %v8260_v21 }
 0x22c   : > { %6580 = vmatmul.mubr.msk.f32.gmra.mxu1 %vm303_vm1, %v8258_v17  ;;  %6629 = vmatmul.mubr.msk.f32.gmra.mxu0 %vm303_vm1, %v8268_v36 }
 0x22d   : > { %6584 = vmatprep.mubr.msk.f32.mxu1 %vm303_vm1, %v3225_v25  ;;  %6631 = vmatprep.mubr.msk.f32.mxu0 %vm303_vm1, %v8271_v50 }
 0x230   : > { %6585 = vmatmul.mubr.msk.f32.vlgmr.msra.gmra.mxu1 %vm303_vm1, %v3226_v15  ;;  %6632 = vmatmul.mubr.msk.f32.gmra.mxu0 %vm303_vm1, %v8281_v23 }
 0x231   : > { %6635 = vmatpush3.msra.mxu1 %v8173_v0  ;;  %6587 = vmatprep.mubr.msk.f32.mxu1 %vm303_vm1, %v3227_v18  ;;  %v5022_v0 = vld [vmem:[#allocation3 + $0xf4] sm:$0xff] }
 0x232   : > { %6686 = vmatprep.subr.mxu1 %v5762_v7  ;;  %6662 = vmatprep.mubr.msk.f32.mxu0 %vm303_vm1, %v8164_v52  ;;  %v4341_v52 = vld [vmem:[#allocation3 + $0xcc] sm:$0xff] }
 0x234   : > { %6588 = vmatmul.mubr.msk.f32.gmra.mxu1 %vm303_vm1, %v3228_v14  ;;  %6663 = vmatmul.mubr.msk.f32.vlgmr.msra.gmra.mxu0 %vm303_vm1, %v8177_v5  ;;  %v5024_v5 = vld [vmem:[#allocation3 + $0x10c] sm:$0xff] }
 0x235   : > { %6590 = vmatprep.mubr.msk.f32.mxu1 %vm303_vm1, %v3229_v9  ;;  %6713 = vmatpush3.msra.mxu0 %v5779_v4 }
 0x236   : > { %6665 = vmatprep.mubr.msk.f32.mxu0 %vm303_vm1, %v8182_v32  ;;  %6764 = vmatprep.subr.mxu0 %v5813_v55  ;;  %v4795_v32 = vld [vmem:[#allocation3 + $0xf2] sm:$0xff] }
 0x238   : > { %6591 = vmatmul.mubr.msk.f32.gmra.mxu1 %vm303_vm1, %v3230_v56  ;;  %6666 = vmatmul.mubr.msk.f32.gmra.mxu0 %vm303_vm1, %v8191_v13  ;;  %v4798_v13 = vld [vmem:[#allocation3 + $0x112] sm:$0xff] }
 0x239   : > { %6593 = vmatprep.mubr.msk.f32.mxu1 %vm303_vm1, %v3231_v33  ;;  %6668 = vmatprep.mubr.msk.f32.mxu0 %vm303_vm1, %v8196_v30 }
 0x23c   : > { %6594 = vmatmul.mubr.msk.f32.gmra.mxu1 %vm303_vm1, %v3232_v31  ;;  %6669 = vmatmul.mubr.msk.f32.gmra.mxu0 %vm303_vm1, %v8207_v42 }
 0x23d   : > { %6596 = vmatprep.mubr.msk.f32.mxu1 %vm303_vm1, %v3233_v35  ;;  %6671 = vmatprep.mubr.msk.f32.mxu0 %vm303_vm1, %v8211_v27 }
 0x240   : > { %6597 = vmatmul.mubr.msk.f32.gmra.mxu1 %vm303_vm1, %v3234_v2  ;;  %6672 = vmatmul.mubr.msk.f32.gmra.mxu0 %vm303_vm1, %v8226_v48 }
 0x241   : > { %6599 = vmatprep.mubr.msk.f32.mxu1 %vm303_vm1, %v3235_v63  ;;  %6674 = vmatprep.mubr.msk.f32.mxu0 %vm303_vm1, %v8230_v44 }
 0x244   : > { %6600 = vmatmul.mubr.msk.f32.gmra.mxu1 %vm303_vm1, %v3236_v57  ;;  %6675 = vmatmul.mubr.msk.f32.gmra.mxu0 %vm303_vm1, %v8242_v46 }
 0x245   : > { %6602 = vmatprep.mubr.msk.f32.mxu1 %vm303_vm1, %v3237_v49  ;;  %6677 = vmatprep.mubr.msk.f32.mxu0 %vm303_vm1, %v8246_v16 }
 0x248   : > { %6603 = vmatmul.mubr.msk.f32.gmra.mxu1 %vm303_vm1, %v3238_v41  ;;  %6678 = vmatmul.mubr.msk.f32.gmra.mxu0 %vm303_vm1, %v8258_v17 }
 0x249   : > { %6605 = vmatprep.mubr.msk.f32.mxu1 %vm303_vm1, %v3239_v59  ;;  %6680 = vmatprep.mubr.msk.f32.mxu0 %vm303_vm1, %v8324_v11 }
 0x24c   : > { %6606 = vmatmul.mubr.msk.f32.gmra.mxu1 %vm303_vm1, %v3240_v24  ;;  %6681 = vmatmul.mubr.msk.f32.gmra.mxu0 %vm303_vm1, %v8331_v12 }
 0x24d   : > { %6636 = vmatprep.mubr.msk.f32.mxu1 %vm303_vm1, %v3229_v9  ;;  %6683 = vmatprep.mubr.msk.f32.mxu0 %vm303_vm1, %v8334_v40 }
 0x250   : > { %6637 = vmatmul.mubr.msk.f32.vlgmr.msra.gmra.mxu1 %vm303_vm1, %v3230_v56  ;;  %6684 = vmatmul.mubr.msk.f32.gmra.mxu0 %vm303_vm1, %v8344_v43 }
 0x251   : > { %6687 = vmatpush3.msra.mxu1 %v5762_v7  ;;  %6639 = vmatprep.mubr.msk.f32.mxu1 %vm303_vm1, %v3231_v33 }
 0x252   : > { %6738 = vmatprep.subr.mxu1 %v5796_v53  ;;  %6714 = vmatprep.mubr.msk.f32.mxu0 %vm303_vm1, %v3233_v35 }
 0x254   : > { %6640 = vmatmul.mubr.msk.f32.gmra.mxu1 %vm303_vm1, %v3232_v31  ;;  %6715 = vmatmul.mubr.msk.f32.vlgmr.msra.gmra.mxu0 %vm303_vm1, %v3234_v2 }
 0x255   : > { %6642 = vmatprep.mubr.msk.f32.mxu1 %vm303_vm1, %v3233_v35  ;;  %6765 = vmatpush3.msra.mxu0 %v5813_v55 }
 0x256   : > { %6717 = vmatprep.mubr.msk.f32.mxu0 %vm303_vm1, %v3235_v63 }
 0x258   : > { %6643 = vmatmul.mubr.msk.f32.gmra.mxu1 %vm303_vm1, %v3234_v2  ;;  %6718 = vmatmul.mubr.msk.f32.gmra.mxu0 %vm303_vm1, %v3236_v57 }
 0x259   : > { %6645 = vmatprep.mubr.msk.f32.mxu1 %vm303_vm1, %v3235_v63  ;;  %6720 = vmatprep.mubr.msk.f32.mxu0 %vm303_vm1, %v3237_v49 }
 0x25c   : > { %6646 = vmatmul.mubr.msk.f32.gmra.mxu1 %vm303_vm1, %v3236_v57  ;;  %6721 = vmatmul.mubr.msk.f32.gmra.mxu0 %vm303_vm1, %v3238_v41 }
 0x25d   : > { %6648 = vmatprep.mubr.msk.f32.mxu1 %vm303_vm1, %v3237_v49  ;;  %6723 = vmatprep.mubr.msk.f32.mxu0 %vm303_vm1, %v3239_v59 }
 0x260   : > { %6649 = vmatmul.mubr.msk.f32.gmra.mxu1 %vm303_vm1, %v3238_v41  ;;  %6724 = vmatmul.mubr.msk.f32.gmra.mxu0 %vm303_vm1, %v3240_v24 }
 0x261   : > { %6651 = vmatprep.mubr.msk.f32.mxu1 %vm303_vm1, %v3239_v59  ;;  %6726 = vmatprep.mubr.msk.f32.mxu0 %vm303_vm1, %v3886_v60 }
 0x264   : > { %6652 = vmatmul.mubr.msk.f32.gmra.mxu1 %vm303_vm1, %v3240_v24  ;;  %6727 = vmatmul.mubr.msk.f32.gmra.mxu0 %vm303_vm1, %v3887_v6 }
 0x265   : > { %6654 = vmatprep.mubr.msk.f32.mxu1 %vm303_vm1, %v3886_v60  ;;  %6729 = vmatprep.mubr.msk.f32.mxu0 %vm303_vm1, %v3888_v29 }
 0x268   : > { %6655 = vmatmul.mubr.msk.f32.gmra.mxu1 %vm303_vm1, %v3887_v6  ;;  %6730 = vmatmul.mubr.msk.f32.gmra.mxu0 %vm303_vm1, %v3889_v37 }
 0x269   : > { %6657 = vmatprep.mubr.msk.f32.mxu1 %vm303_vm1, %v3888_v29  ;;  %6732 = vmatprep.mubr.msk.f32.mxu0 %vm303_vm1, %v4568_v39 }
 0x26c   : > { %6658 = vmatmul.mubr.msk.f32.gmra.mxu1 %vm303_vm1, %v3889_v37  ;;  %6733 = vmatmul.mubr.msk.f32.gmra.mxu0 %vm303_vm1, %v4569_v38 }
 0x26d   : > { %6688 = vmatprep.mubr.msk.f32.mxu1 %vm303_vm1, %v8194_v1  ;;  %6735 = vmatprep.mubr.msk.f32.mxu0 %vm303_vm1, %v4570_v45 }
 0x270   : > { %6689 = vmatmul.mubr.msk.f32.vlgmr.msra.gmra.mxu1 %vm303_vm1, %v8203_v3  ;;  %6736 = vmatmul.mubr.msk.f32.gmra.mxu0 %vm303_vm1, %v4571_v26 }
 0x271   : > { %6739 = vmatpush3.msra.mxu1 %v5796_v53  ;;  %6691 = vmatprep.mubr.msk.f32.mxu1 %vm303_vm1, %v8209_v61 }
 0x272   : > { %6766 = vmatprep.mubr.msk.f32.mxu0 %vm303_vm1, %v8228_v51 }
 0x274   : > { %6692 = vmatmul.mubr.msk.f32.gmra.mxu1 %vm303_vm1, %v8222_v54  ;;  %6767 = vmatmul.mubr.msk.f32.vlgmr.msra.gmra.mxu0 %vm303_vm1, %v8238_v34 }
 0x275   : > { %6694 = vmatprep.mubr.msk.f32.mxu1 %vm303_vm1, %v8228_v51  ;;  %6769 = vmatprep.mubr.msk.f32.mxu0 %vm303_vm1, %v8244_v22 }
 0x278   : > { %6695 = vmatmul.mubr.msk.f32.gmra.mxu1 %vm303_vm1, %v8238_v34  ;;  %6770 = vmatmul.mubr.msk.f32.gmra.mxu0 %vm303_vm1, %v8254_v47 }
 0x279   : > { %6697 = vmatprep.mubr.msk.f32.mxu1 %vm303_vm1, %v8244_v22  ;;  %6772 = vmatprep.mubr.msk.f32.mxu0 %vm303_vm1, %v8260_v21 }
 0x27c   : > { %6698 = vmatmul.mubr.msk.f32.gmra.mxu1 %vm303_vm1, %v8254_v47  ;;  %6773 = vmatmul.mubr.msk.f32.gmra.mxu0 %vm303_vm1, %v8268_v36 }
 0x27d   : > { %6700 = vmatprep.mubr.msk.f32.mxu1 %vm303_vm1, %v8260_v21  ;;  %6775 = vmatprep.mubr.msk.f32.mxu0 %vm303_vm1, %v8271_v50 }
 0x280   : > { %6701 = vmatmul.mubr.msk.f32.gmra.mxu1 %vm303_vm1, %v8268_v36  ;;  %6776 = vmatmul.mubr.msk.f32.gmra.mxu0 %vm303_vm1, %v8281_v23 }
 0x281   : > { %6703 = vmatprep.mubr.msk.f32.mxu1 %vm303_vm1, %v8271_v50  ;;  %6778 = vmatprep.mubr.msk.f32.mxu0 %vm303_vm1, %v4340_v19 }
 0x284   : > { %6704 = vmatmul.mubr.msk.f32.gmra.mxu1 %vm303_vm1, %v8281_v23  ;;  %6779 = vmatmul.mubr.msk.f32.gmra.mxu0 %vm303_vm1, %v4341_v52 }
 0x285   : > { %6706 = vmatprep.mubr.msk.f32.mxu1 %vm303_vm1, %v4340_v19  ;;  %6781 = vmatprep.mubr.msk.f32.mxu0 %vm303_vm1, %v4342_v20 }
 0x288   : > { %6707 = vmatmul.mubr.msk.f32.gmra.mxu1 %vm303_vm1, %v4341_v52  ;;  %6782 = vmatmul.mubr.msk.f32.gmra.mxu0 %vm303_vm1, %v4343_v62 }
 0x289   : > { %6709 = vmatprep.mubr.msk.f32.mxu1 %vm303_vm1, %v4342_v20  ;;  %6784 = vmatprep.mubr.msk.f32.mxu0 %vm303_vm1, %v5022_v0 }
 0x28c   : > { %6710 = vmatmul.mubr.msk.f32.gmra.mxu1 %vm303_vm1, %v4343_v62  ;;  %6785 = vmatmul.mubr.msk.f32.gmra.mxu0 %vm303_vm1, %v5023_v28 }
 0x28d   : > { %6740 = vmatprep.mubr.msk.f32.mxu1 %vm303_vm1, %v8196_v30  ;;  %6787 = vmatprep.mubr.msk.f32.mxu0 %vm303_vm1, %v5024_v5 }
 0x290   : > { %6741 = vmatmul.mubr.msk.f32.vlgmr.msra.gmra.mxu1 %vm303_vm1, %v8207_v42  ;;  %6788 = vmatmul.mubr.msk.f32.gmra.mxu0 %vm303_vm1, %v5025_v8 }
 0x291   : > { %6743 = vmatprep.mubr.msk.f32.mxu1 %vm303_vm1, %v8211_v27 }
 0x294   : > { %6744 = vmatmul.mubr.msk.f32.gmra.mxu1 %vm303_vm1, %v8226_v48 }
 0x295   : > { %6746 = vmatprep.mubr.msk.f32.mxu1 %vm303_vm1, %v8230_v44 }
 0x298   : > { %6747 = vmatmul.mubr.msk.f32.gmra.mxu1 %vm303_vm1, %v8242_v46 }
 0x299   : > { %6749 = vmatprep.mubr.msk.f32.mxu1 %vm303_vm1, %v8246_v16 }
 0x29c   : > { %6750 = vmatmul.mubr.msk.f32.gmra.mxu1 %vm303_vm1, %v8258_v17 }
 0x29d   : > { %6752 = vmatprep.mubr.msk.f32.mxu1 %vm303_vm1, %v8324_v11 }
 0x2a0   : > { %6753 = vmatmul.mubr.msk.f32.gmra.mxu1 %vm303_vm1, %v8331_v12 }
 0x2a1   : > { %6755 = vmatprep.mubr.msk.f32.mxu1 %vm303_vm1, %v8334_v40 }
 0x2a4   : > { %6756 = vmatmul.mubr.msk.f32.gmra.mxu1 %vm303_vm1, %v8344_v43 }
 0x2a5   : > { %6758 = vmatprep.mubr.msk.f32.mxu1 %vm303_vm1, %v4795_v32 }
 0x2a8   : > { %6759 = vmatmul.mubr.msk.f32.gmra.mxu1 %vm303_vm1, %v4796_v58 }
 0x2a9   : > { %6761 = vmatprep.mubr.msk.f32.mxu1 %vm303_vm1, %v4797_v10 }
 0x2ac   : > { %6762 = vmatmul.mubr.msk.f32.gmra.mxu1 %vm303_vm1, %v4798_v13 }
 0x2d0   : > { %v6560_v1 = vpop.f32.mrf.mxu1 }
 0x2d2   : > { %v3374_v30 = vpop.f32.mrf.mxu1 }
 0x2d4   : > { %v6563_v3 = vpop.f32.mrf.mxu1  ;;  %v6612_v61 = vpop.f32.mrf.mxu0 }
 0x2d6   : > { %v3384_v42 = vpop.f32.mrf.mxu1  ;;  %v3778_v4 = vpop.f32.mrf.mxu0 }
 0x2d8   : > { %v6566_v27 = vpop.f32.mrf.mxu1  ;;  %v6615_v48 = vpop.f32.mrf.mxu0 }
 0x2da   : > { %v3394_v54 = vpop.f32.mrf.mxu1  ;;  %v3788_v44 = vpop.f32.mrf.mxu0 }
 0x2dc   : > { %v6569_v51 = vpop.f32.mrf.mxu1  ;;  %v6618_v46 = vpop.f32.mrf.mxu0 }
 0x2de   : > { %v3404_v34 = vpop.f32.mrf.mxu1  ;;  %v3798_v16 = vpop.f32.mrf.mxu0 }
 0x2e0   : > { %v6572_v22 = vpop.f32.mrf.mxu1  ;;  %v6621_v17 = vpop.f32.mrf.mxu0 }
 0x2e2   : > { %v3414_v47 = vpop.f32.mrf.mxu1  ;;  %v3808_v25 = vpop.f32.mrf.mxu0 }
 0x2e4   : > { %v6575_v21 = vpop.f32.mrf.mxu1  ;;  %v6624_v15 = vpop.f32.mrf.mxu0 }
 0x2e6   : > { %v3424_v36 = vpop.f32.mrf.mxu1  ;;  %v3818_v18 = vpop.f32.mrf.mxu0 }
 0x2e8   : > { %v6578_v50 = vpop.f32.mrf.mxu1  ;;  %v6627_v23 = vpop.f32.mrf.mxu0 }
 0x2ea   : > { %v3434_v7 = vpop.f32.mrf.mxu1  ;;  %v3828_v9 = vpop.f32.mrf.mxu0 }
 0x2ec   : > { %v6581_v14 = vpop.f32.mrf.mxu1  ;;  %v6630_v33 = vpop.f32.mrf.mxu0 }
 0x2ee   : > { %v8458_v56 = vpop.f32.mrf.mxu1  ;;  %v3838_v35 = vpop.f32.mrf.mxu0 }
 0x2f0   : > { %v6586_v55 = vpop.f32.mrf.mxu1  ;;  %v6633_v49 = vpop.f32.mrf.mxu0 }
 0x2f1   : > { %v3573_v31 = vadd.f32 %v6586_v55, %v6560_v1 }
 0x2f2   : > { %v3567_v2 = vpop.f32.mrf.mxu1  ;;  %v3848_v11 = vpop.f32.mrf.mxu0 }
 0x2f3   : > { %v8460_v63 = vadd.f32 %v6612_v61, %v3573_v31  ;;  %v3568_v57 = vadd.f32 %v3567_v2, %v3374_v30 }
 0x2f4   : > { %v6589_v41 = vpop.f32.mrf.mxu1  ;;  %v8466_v43 = vpop.f32.mrf.mxu0 }
 0x2f5   : > { %v8462_v59 = vadd.f32 %v3778_v4, %v3568_v57  ;;  %v3583_v24 = vadd.f32 %v6589_v41, %v6563_v3 }
 0x2f6   : > { %v3577_v12 = vpop.f32.mrf.mxu1  ;;  %v8470_v37 = vpop.f32.mrf.mxu0 }
 0x2f7   : > { %v8464_v40 = vadd.f32 %v6615_v48, %v3583_v24  ;;  %v3578_v53 = vadd.f32 %v3577_v12, %v3384_v42 }
 0x2f8   : > { %v6592_v60 = vpop.f32.mrf.mxu1  ;;  %v8474_v26 = vpop.f32.mrf.mxu0 }
 0x2f9   : > { %v8468_v6 = vadd.f32 %v3788_v44, %v3578_v53  ;;  %v3593_v29 = vadd.f32 %v6592_v60, %v6566_v27 }
 0x2fa   : > { %v3587_v39 = vpop.f32.mrf.mxu1  ;;  %v8478_v62 = vpop.f32.mrf.mxu0 }
 0x2fb   : > { %v8472_v38 = vadd.f32 %v6618_v46, %v3593_v29  ;;  %v3588_v45 = vadd.f32 %v3587_v39, %v3394_v54 }
 0x2fc   : > { %v6595_v19 = vpop.f32.mrf.mxu1  ;;  %v8482_v8 = vpop.f32.mrf.mxu0 }
 0x2fd   : > { %v8476_v52 = vadd.f32 %v3798_v16, %v3588_v45  ;;  %v3603_v20 = vadd.f32 %v6595_v19, %v6569_v51 }
 0x2fe   : > { %v3597_v0 = vpop.f32.mrf.mxu1  ;;  %v8486_v13 = vpop.f32.mrf.mxu0 }
 0x2ff   : > { %v8480_v28 = vadd.f32 %v6621_v17, %v3603_v20  ;;  %v3598_v5 = vadd.f32 %v3597_v0, %v3404_v34 }
 0x300   : > { %v6598_v32 = vpop.f32.mrf.mxu1  ;;  %v8490_v42 = vpop.f32.mrf.mxu0 }
 0x301   : > { %v8484_v58 = vadd.f32 %v3808_v25, %v3598_v5  ;;  %v3613_v10 = vadd.f32 %v6598_v32, %v6572_v22 }
 0x302   : > { %v3607_v1 = vpop.f32.mrf.mxu1  ;;  %v8494_v54 = vpop.f32.mrf.mxu0 }
 0x303   : > { %v8488_v30 = vadd.f32 %v6624_v15, %v3613_v10  ;;  %v3608_v3 = vadd.f32 %v3607_v1, %v3414_v47 }
 0x304   : > { %v6601_v61 = vpop.f32.mrf.mxu1  ;;  %v8498_v34 = vpop.f32.mrf.mxu0 }
 0x305   : > { %v8492_v27 = vadd.f32 %v3818_v18, %v3608_v3  ;;  %v3623_v4 = vadd.f32 %v6601_v61, %v6575_v21 }
 0x306   : > { %v3617_v48 = vpop.f32.mrf.mxu1  ;;  %v8502_v17 = vpop.f32.mrf.mxu0 }
 0x307   : > { %v8496_v51 = vadd.f32 %v6627_v23, %v3623_v4  ;;  %v3618_v44 = vadd.f32 %v3617_v48, %v3424_v36 }
 0x308   : > { %v6604_v46 = vpop.f32.mrf.mxu1  ;;  %v8506_v18 = vpop.f32.mrf.mxu0 }
 0x309   : > { %v8500_v22 = vadd.f32 %v3828_v9, %v3618_v44  ;;  %v3633_v16 = vadd.f32 %v6604_v46, %v6578_v50 }
 0x30a   : > { %v3627_v47 = vpop.f32.mrf.mxu1  ;;  %v8510_v31 = vpop.f32.mrf.mxu0 }
 0x30b   : > { %v8504_v25 = vadd.f32 %v6630_v33, %v3633_v16  ;;  %v3628_v15 = vadd.f32 %v3627_v47, %v3434_v7  ;;  %8826 = vst [vmem:[#allocation4_spill] sm:$0xff] %v8510_v31 }
 0x30c   : > { %v6607_v21 = vpop.f32.mrf.mxu1  ;;  %v8515_v50 = vpop.f32.mrf.mxu0 }
 0x30d   : > { %v8508_v55 = vadd.f32 %v3838_v35, %v3628_v15  ;;  %v3643_v23 = vadd.f32 %v6607_v21, %v6581_v14  ;;  %8828 = vst [vmem:[#allocation24_spill] sm:$0xff] %v8515_v50 }
 0x30e   : > { %v3637_v36 = vpop.f32.mrf.mxu1  ;;  %v8519_v33 = vpop.f32.mrf.mxu0 }
 0x30f   : > { %v8512_v2 = vadd.f32 %v6633_v49, %v3643_v23  ;;  %v3638_v9 = vadd.f32 %v3637_v36, %v8458_v56  ;;  %8830 = vst [vmem:[#allocation14_spill] sm:$0xff] %v8519_v33 }
 0x310   : > { %v6638_v57 = vpop.f32.mrf.mxu1  ;;  %v8521_v24 = vpop.f32.mrf.mxu0 }
 0x311   : > { %8827 = vst [vmem:[#allocation12_spill] sm:$0xff] %v8512_v2  ;;  %v8517_v41 = vadd.f32 %v3848_v11, %v3638_v9  ;;  %8831 = vst [vmem:[#allocation25_spill] sm:$0xff] %v8521_v24 }
 0x312   : > { %v4006_v7 = vpop.f32.mrf.mxu1  ;;  %v8523_v12 = vpop.f32.mrf.mxu0 }
 0x313   : > { %8829 = vst [vmem:[#allocation5_spill] sm:$0xff] %v8517_v41  ;;  %8832 = vst [vmem:[#allocation6_spill] sm:$0xff] %v8523_v12  ;;  %v4085_v31 = vadd.f32 %v4006_v7, %v8462_v59 }
 0x314   : > { %v6641_v35 = vpop.f32.mrf.mxu1  ;;  %v8525_v53 = vpop.f32.mrf.mxu0 }
 0x316   : > { %v4016_v14 = vpop.f32.mrf.mxu1  ;;  %v8527_v60 = vpop.f32.mrf.mxu0 }
 0x318   : > { %v6644_v49 = vpop.f32.mrf.mxu1  ;;  %v8529_v29 = vpop.f32.mrf.mxu0 }
 0x31a   : > { %v4026_v56 = vpop.f32.mrf.mxu1  ;;  %v8531_v11 = vpop.f32.mrf.mxu0 }
 0x31c   : > { %v6647_v39 = vpop.f32.mrf.mxu1  ;;  %v8533_v19 = vpop.f32.mrf.mxu0 }
 0x31d   : > { %8833 = vst [vmem:[#allocation16_spill] sm:$0xff] %v8533_v19 }
 0x31e   : > { %v4036_v45 = vpop.f32.mrf.mxu1  ;;  %v8535_v0 = vpop.f32.mrf.mxu0 }
 0x31f   : > { %8834 = vst [vmem:[#allocation26_spill] sm:$0xff] %v8535_v0 }
 0x320   : > { %v6650_v20 = vpop.f32.mrf.mxu1  ;;  %v8537_v32 = vpop.f32.mrf.mxu0 }
 0x321   : > { %8835 = vst [vmem:[#allocation7_spill] sm:$0xff] %v8537_v32 }
 0x322   : > { %v4046_v5 = vpop.f32.mrf.mxu1  ;;  %v8541_v1 = vpop.f32.mrf.mxu0 }
 0x323   : > { %8836 = vst [vmem:[#allocation17_spill] sm:$0xff] %v8541_v1 }
 0x324   : > { %v8539_v10 = vpop.f32.mrf.mxu1  ;;  %v8545_v61 = vpop.f32.mrf.mxu0 }
 0x325   : > { %8837 = vst [vmem:[#allocation27_spill] sm:$0xff] %v8545_v61 }
 0x326   : > { %v8543_v3 = vpop.f32.mrf.mxu1  ;;  %v8549_v48 = vpop.f32.mrf.mxu0 }
 0x327   : > { %8838 = vst [vmem:[#allocation8_spill] sm:$0xff] %v8549_v48 }
 0x328   : > { %v8547_v4 = vpop.f32.mrf.mxu1  ;;  %v8553_v46 = vpop.f32.mrf.mxu0 }
 0x329   : > { %8839 = vst [vmem:[#allocation18_spill] sm:$0xff] %v8553_v46 }
 0x32a   : > { %v8551_v44 = vpop.f32.mrf.mxu1  ;;  %v8557_v47 = vpop.f32.mrf.mxu0 }
 0x32b   : > { %8841 = vst [vmem:[#allocation9_spill] sm:$0xff] %v8557_v47 }
 0x32c   : > { %v8555_v16 = vpop.f32.mrf.mxu1  ;;  %v8561_v21 = vpop.f32.mrf.mxu0 }
 0x32d   : > { %8840 = vst [vmem:[#allocation28_spill] sm:$0xff] %v8555_v16  ;;  %8843 = vst [vmem:[#allocation29_spill] sm:$0xff] %v8561_v21 }
 0x32e   : > { %v8559_v15 = vpop.f32.mrf.mxu1  ;;  %v8563_v36 = vpop.f32.mrf.mxu0 }
 0x32f   : > { %8842 = vst [vmem:[#allocation19_spill] sm:$0xff] %v8559_v15  ;;  %8844 = vst [vmem:[#allocation10_spill] sm:$0xff] %v8563_v36 }
 0x330   : > { %v6690_v23 = vpop.f32.mrf.mxu1  ;;  %v8565_v12 = vpop.f32.mrf.mxu0 }
 0x331   : > { %8845 = vst [vmem:[#allocation20_spill] sm:$0xff] %v8565_v12 }
 0x332   : > { %v4460_v9 = vpop.f32.mrf.mxu1  ;;  %v8567_v48 = vpop.f32.mrf.mxu0 }
 0x333   : > { %8846 = vst [vmem:[#allocation30_spill] sm:$0xff] %v8567_v48  ;;  %v4086_v48 = vadd.f32 %v6638_v57, %v8460_v63 }
 0x334   : > { %v6693_v24 = vpop.f32.mrf.mxu1  ;;  %v6768_v2 = vpop.f32.mrf.mxu0 }
 0x336   : > { %v4470_v41 = vpop.f32.mrf.mxu1  ;;  %v5142_v61 = vpop.f32.mrf.mxu0 }
 0x338   : > { %v6696_v46 = vpop.f32.mrf.mxu1  ;;  %v8569_v47 = vpop.f32.mrf.mxu0 }
 0x33a   : > { %v4480_v16 = vpop.f32.mrf.mxu1  ;;  %v8575_v33 = vpop.f32.mrf.mxu0 }
 0x33b   : > { %8849 = vst [vmem:[#allocation31_spill] sm:$0xff] %v8575_v33  ;;  %v4088_v33 = vadd.f32 %v6641_v35, %v8464_v40  ;;  %v4092_v40 = vadd.f32 %v6647_v39, %v8480_v28 }
 0x33c   : > { %v6699_v1 = vpop.f32.mrf.mxu1  ;;  %v8581_v50 = vpop.f32.mrf.mxu0 }
 0x33d   : > { %8852 = vst [vmem:[#allocation32_spill] sm:$0xff] %v8581_v50  ;;  %v4315_v59 = vadd.f32 %v8474_v26, %v4088_v33  ;;  %v4093_v26 = vadd.f32 %v4046_v5, %v8492_v27 }
 0x33e   : > { %v8571_v15 = vpop.f32.mrf.mxu1  ;;  %v8589_v19 = vpop.f32.mrf.mxu0 }
 0x33f   : > { %8847 = vst [vmem:[#allocation11_spill] sm:$0xff] %v8571_v15 }
 0x340   : > { %v8573_v21 = vpop.f32.mrf.mxu1  ;;  %v8599_v57 = vpop.f32.mrf.mxu0 }
 0x341   : > { %8848 = vst [vmem:[#allocation21_spill] sm:$0xff] %v8573_v21  ;;  %v4313_v21 = vadd.f32 %v8466_v43, %v4086_v48  ;;  %v4089_v43 = vadd.f32 %v4026_v56, %v8476_v52  ;;  %v4094_v48 = vadd.f32 %v6650_v20, %v8488_v30  ;;  %v8623_v30 = vld [vmem:[%s8762_s4] ss:$0 sm:$0xff] }
 0x342   : > { %v8577_v36 = vpop.f32.mrf.mxu1 }
 0x343   : > { %8850 = vst [vmem:[#allocation13_spill] sm:$0xff] %v8577_v36  ;;  %v4087_v36 = vadd.f32 %v4016_v14, %v8468_v6  ;;  %v4540_v50 = vadd.f32 %v6690_v23, %v4313_v21  ;;  %v4091_v6 = vadd.f32 %v4036_v45, %v8484_v58  ;;  %v4542_v14 = vadd.f32 %v6693_v24, %v4315_v59 }
 0x344   : > { %v8579_v12 = vpop.f32.mrf.mxu1  ;;  %v4319_v58 = vadd.f32 %v8490_v42, %v4092_v40  ;;  %v4097_v23 = vadd.f32 %v8551_v44, %v8508_v55  ;;  %v8857_v40 = vld [vmem:[#allocation31_spill] sm:$0xff] }
 0x345   : > { %8851 = vst [vmem:[#allocation22_spill] sm:$0xff] %v8579_v12  ;;  %v4312_v12 = vadd.f32 %v8470_v37, %v4085_v31  ;;  %v4314_v37 = vadd.f32 %v8478_v62, %v4087_v36  ;;  %v4768_v31 = vadd.f32 %v8525_v53, %v4540_v50  ;;  %v4316_v62 = vadd.f32 %v8486_v13, %v4089_v43  ;;  %v8859_v55 = vld [vmem:[#allocation7_spill] sm:$0xff] }
 0x346   : > { %v8584_v32 = vpop.f32.mrf.mxu1  ;;  %v4096_v50 = vadd.f32 %v8539_v10, %v8496_v51  ;;  %v4318_v24 = vadd.f32 %v8494_v54, %v4091_v6  ;;  %v4320_v13 = vadd.f32 %v8502_v17, %v4093_v26  ;;  %v5261_v51 = vld [vmem:[%s7026_s10 + $0x8] sm:$0xff]  ;;  %v4098_v17 = vadd.f32 %v8547_v4, %v8504_v25  ;;  %v5260_v10 = vld [vmem:[%s7026_s10] sm:$0xff]  ;;  %v5262_v26 = vld [vmem:[%s7026_s10 + $0x10] sm:$0xff] }
 0x347   : > { %v4539_v7 = vadd.f32 %v4460_v9, %v4312_v12  ;;  %v8612_v12 = vpop.f32.mrf.mxu0  ;;  %v4541_v52 = vadd.f32 %v4470_v41, %v4314_v37  ;;  %v4770_v41 = vadd.f32 %v8529_v29, %v4542_v14  ;;  %v4543_v56 = vadd.f32 %v4480_v16, %v4316_v62  ;;  %v8855_v9 = vld [vmem:[#allocation26_spill] sm:$0xff]  ;;  %v8858_v6 = vld [vmem:[#allocation4_spill] sm:$0xff] }
 0x348   : > { %v8587_v0 = vpop.f32.mrf.mxu1  ;;  %v4546_v5 = vadd.f32 %v6699_v1, %v4319_v58  ;;  %v5263_v1 = vld [vmem:[%s7026_s10 + $0x18] sm:$0xff]  ;;  %v8860_v14 = vld [vmem:[#allocation21_spill] sm:$0xff]  ;;  %v8861_v58 = vld [vmem:[#allocation24_spill] sm:$0xff] }
 0x349   : > { %8853 = vst [vmem:[#allocation15_spill] sm:$0xff] %v8587_v0  ;;  %v4090_v0 = vadd.f32 %v6644_v49, %v8472_v38  ;;  %v4767_v38 = vadd.f32 %v8527_v60, %v4539_v7  ;;  %v8630_v45 = vpop.f32.mrf.mxu0  ;;  %v4769_v20 = vadd.f32 %v8531_v11, %v4541_v52 }
 0x34a   : > { %v8593_v15 = vpop.f32.mrf.mxu1  ;;  %v4774_v44 = vadd.f32 %v8859_v55, %v4546_v5 }
 0x34b   : > { %v4317_v49 = vadd.f32 %v8482_v8, %v4090_v0  ;;  %v4321_v8 = vadd.f32 %v8498_v34, %v4094_v48  ;;  %v4095_v34 = vadd.f32 %v8543_v3, %v8500_v22  ;;  %v4771_v22 = vadd.f32 %v8855_v9, %v4543_v56  ;;  %v8856_v3 = vld [vmem:[#allocation11_spill] sm:$0xff]  ;;  %v8648_v59 = vpop.f32.mrf.mxu0  ;;  %v8869_v9 = vld [vmem:[#allocation28_spill] sm:$0xff] }
 0x34c   : > { %v8597_v63 = vpop.f32.mrf.mxu1  ;;  %v4545_v25 = vadd.f32 %v8856_v3, %v4318_v24  ;;  %v8870_v3 = vld [vmem:[#allocation5_spill] sm:$0xff] }
 0x34d   : > { %v4544_v42 = vadd.f32 %v6696_v46, %v4317_v49  ;;  %v4548_v48 = vadd.f32 %v8860_v14, %v4321_v8  ;;  %v6783_v56 = vpop.f32.mrf.mxu0 }
 0x34e   : > { %v8605_v35 = vpop.f32.mrf.mxu1 }
 0x350   : > { %v6742_v33 = vpop.f32.mrf.mxu1 }
 0x351   : > { %v4995_v28 = vadd.f32 %v6742_v33, %v4768_v31  ;;  %v4322_v31 = vadd.f32 %v8858_v6, %v4095_v34  ;;  %v8872_v6 = vld [vmem:[#allocation8_spill] sm:$0xff] }
 0x352   : > { %v4915_v27 = vpop.f32.mrf.mxu1 }
 0x353   : > { %v5222_v53 = vadd.f32 %v6768_v2, %v4995_v28  ;;  %v4994_v60 = vadd.f32 %v4915_v27, %v4767_v38  ;;  %v4323_v2 = vadd.f32 %v8506_v18, %v4096_v50  ;;  %v8854_v18 = vld [vmem:[#allocation16_spill] sm:$0xff]  ;;  %v4325_v50 = vadd.f32 %v8861_v58, %v4098_v17  ;;  %v8862_v27 = vld [vmem:[#allocation14_spill] sm:$0xff]  ;;  %v8866_v17 = vld [vmem:[#allocation13_spill] sm:$0xff] }
 0x354   : > { %v6745_v39 = vpop.f32.mrf.mxu1  ;;  %v4772_v36 = vadd.f32 %v8854_v18, %v4544_v42  ;;  %v4324_v24 = vadd.f32 %v8862_v27, %v4097_v23  ;;  %v4547_v5 = vadd.f32 %v8866_v17, %v4320_v13  ;;  %v8871_v13 = vld [vmem:[#allocation19_spill] sm:$0xff]  ;;  %v5269_v27 = vld [vmem:[%s7026_s10 + $0x48] sm:$0xff] }
 0x355   : > { %v5245_v0 = vadd.f32 %v8623_v30, %v5222_v53  ;;  %v5221_v54 = vadd.f32 %v5142_v61, %v4994_v60  ;;  %v4997_v29 = vadd.f32 %v6745_v39, %v4770_v41  ;;  %v8863_v41 = vld [vmem:[#allocation17_spill] sm:$0xff]  ;;  %v8864_v60 = vld [vmem:[#allocation32_spill] sm:$0xff] }
 0x356   : > { %v4925_v46 = vpop.f32.mrf.mxu1  ;;  %v4773_v53 = vadd.f32 %v8863_v41, %v4545_v25  ;;  %v4549_v25 = vadd.f32 %v8584_v32, %v4322_v31  ;;  %v4775_v55 = vadd.f32 %v8872_v6, %v4547_v5  ;;  %v5268_v5 = vld [vmem:[%s7026_s10 + $0x40] sm:$0xff] }
 0x357   : > { %v5277_v16 = vadd.f32 %v5261_v51, %v5245_v0  ;;  %v5244_v21 = vadd.f32 %v8623_v30, %v5221_v54  ;;  %v5224_v11 = vadd.f32 %v8569_v47, %v4997_v29  ;;  %v4996_v61 = vadd.f32 %v4925_v46, %v4769_v20  ;;  %v5265_v20 = vld [vmem:[%s7026_s10 + $0x28] sm:$0xff]  ;;  %v8865_v29 = vld [vmem:[#allocation27_spill] sm:$0xff] }
 0x358   : > { %v6748_v4 = vpop.f32.mrf.mxu1  ;;  %v4776_v34 = vadd.f32 %v8865_v29, %v4548_v48  ;;  %v8874_v48 = vld [vmem:[#allocation15_spill] sm:$0xff] }
 0x359   : > { %v5293_v7 = vmax.f32 %v5277_v16, 0.0  ;;  %v5276_v43 = vadd.f32 %v5260_v10, %v5244_v21  ;;  %v5247_v47 = vadd.f32 %v8623_v30, %v5224_v11  ;;  %v5223_v37 = vadd.f32 %v8857_v40, %v4996_v61  ;;  %v8867_v10 = vld [vmem:[#allocation22_spill] sm:$0xff]  ;;  %v5264_v21 = vld [vmem:[%s7026_s10 + $0x20] sm:$0xff] }
 0x35a   : > { %v4999_v33 = vadd.f32 %v6748_v4, %v4772_v36  ;;  %v4935_v38 = vpop.f32.mrf.mxu1  ;;  %v4550_v46 = vadd.f32 %v8867_v10, %v4323_v2  ;;  %v8868_v36 = vld [vmem:[#allocation12_spill] sm:$0xff]  ;;  %v4099_v2 = vadd.f32 %v8871_v13, %v8870_v3  ;;  %v5267_v4 = vld [vmem:[%s7026_s10 + $0x38] sm:$0xff]  ;;  %v4552_v32 = vadd.f32 %v8874_v48, %v4325_v50  ;;  %v5270_v13 = vld [vmem:[%s7026_s10 + $0x50] sm:$0xff] }
 0x35b   : > { %5309 = vst.msk [vmem:[%s7034_s14 + $0x8] sm:$0xff] %vm303_vm1, %v5293_v7  ;;  %v5292_v52 = vmax.f32 %v5276_v43, 0.0  ;;  %v5279_v28 = vadd.f32 %v5263_v1, %v5247_v47  ;;  %v5246_v49 = vadd.f32 %v8623_v30, %v5223_v37  ;;  %v4998_v62 = vadd.f32 %v4935_v38, %v4771_v22  ;;  %v5192_v43 = vpop.f32.mrf.mxu0 }
 0x35c   : > { %v5226_v8 = vadd.f32 %v8864_v60, %v4999_v33  ;;  %v6751_v42 = vpop.f32.mrf.mxu1  ;;  %v4100_v22 = vadd.f32 %v8869_v9, %v8868_v36 }
 0x35d   : > { %5308 = vst.msk [vmem:[%s7034_s14] sm:$0xff] %vm303_vm1, %v5292_v52  ;;  %v5295_v51 = vmax.f32 %v5279_v28, 0.0  ;;  %v5278_v39 = vadd.f32 %v5262_v26, %v5246_v49  ;;  %v5225_v0 = vadd.f32 %v8589_v19, %v4998_v62  ;;  %v5001_v54 = vadd.f32 %v6751_v42, %v4774_v44  ;;  %v8873_v44 = vld [vmem:[#allocation18_spill] sm:$0xff]  ;;  %v8875_v62 = vld [vmem:[#allocation9_spill] sm:$0xff] }
 0x35e   : > { %v5249_v16 = vadd.f32 %v8623_v30, %v5226_v8  ;;  %v4945_v11 = vpop.f32.mrf.mxu1  ;;  %v4778_v14 = vadd.f32 %v8873_v44, %v4550_v46  ;;  %v5266_v26 = vld [vmem:[%s7026_s10 + $0x30] sm:$0xff]  ;;  %v4777_v58 = vadd.f32 %v8875_v62, %v4549_v25 }
 0x35f   : > { %5311 = vst.msk [vmem:[%s7034_s14 + $0x18] sm:$0xff] %vm303_vm1, %v5295_v51  ;;  %v5294_v61 = vmax.f32 %v5278_v39, 0.0  ;;  %v5248_v23 = vadd.f32 %v8623_v30, %v5225_v0  ;;  %v5228_v19 = vadd.f32 %v8599_v57, %v5001_v54  ;;  %v5000_v18 = vadd.f32 %v4945_v11, %v4773_v53  ;;  %v6786_v53 = vpop.f32.mrf.mxu0 }
 0x360   : > { %v5281_v1 = vadd.f32 %v5265_v20, %v5249_v16  ;;  %v6754_v7 = vpop.f32.mrf.mxu1  ;;  %v8877_v20 = vld [vmem:[#allocation6_spill] sm:$0xff] }
 0x361   : > { %5310 = vst.msk [vmem:[%s7034_s14 + $0x10] sm:$0xff] %vm303_vm1, %v5294_v61  ;;  %v5280_v47 = vadd.f32 %v5264_v21, %v5248_v23  ;;  %v5251_v57 = vadd.f32 %v8623_v30, %v5228_v19  ;;  %v5227_v40 = vadd.f32 %v8612_v12, %v5000_v18  ;;  %v5003_v37 = vadd.f32 %v6754_v7, %v4776_v34  ;;  %v8879_v16 = vld [vmem:[#allocation10_spill] sm:$0xff]  ;;  %v5271_v19 = vld [vmem:[%s7026_s10 + $0x58] sm:$0xff]  ;;  %v5202_v18 = vpop.f32.mrf.mxu0 }
 0x362   : > { %v5297_v31 = vmax.f32 %v5281_v1, 0.0  ;;  %v4955_v33 = vpop.f32.mrf.mxu1  ;;  %v4551_v12 = vadd.f32 %v8593_v15, %v4324_v24  ;;  %v4326_v15 = vadd.f32 %v8877_v20, %v4099_v2  ;;  %v8878_v24 = vld [vmem:[#allocation29_spill] sm:$0xff] }
 0x363   : > { %v5296_v38 = vmax.f32 %v5280_v47, 0.0  ;;  %v5283_v52 = vadd.f32 %v5267_v4, %v5251_v57  ;;  %v5250_v28 = vadd.f32 %v8623_v30, %v5227_v40  ;;  %v5230_v49 = vadd.f32 %v8630_v45, %v5003_v37  ;;  %v8876_v45 = vld [vmem:[#allocation25_spill] sm:$0xff]  ;;  %v8880_v4 = vld [vmem:[#allocation20_spill] sm:$0xff]  ;;  %v8881_v47 = vld [vmem:[#allocation30_spill] sm:$0xff]  ;;  %v6789_v6 = vpop.f32.mrf.mxu0 }
 0x364   : > { %5313 = vst.msk [vmem:[%s7034_s14 + $0x28] sm:$0xff] %vm303_vm1, %v5297_v31  ;;  %v5002_v41 = vadd.f32 %v4955_v33, %v4775_v55  ;;  %v6757_v50 = vpop.f32.mrf.mxu1  ;;  %v4327_v39 = vadd.f32 %v8876_v45, %v4100_v22  ;;  %v4780_v0 = vadd.f32 %v8878_v24, %v4552_v32  ;;  %v4779_v21 = vadd.f32 %v8879_v16, %v4551_v12  ;;  %v5272_v32 = vld [vmem:[%s7026_s10 + $0x60] sm:$0xff] }
 0x365   : > { %5312 = vst.msk [vmem:[%s7034_s14 + $0x20] sm:$0xff] %vm303_vm1, %v5296_v38  ;;  %v5299_v60 = vmax.f32 %v5283_v52, 0.0  ;;  %v5282_v8 = vadd.f32 %v5266_v26, %v5250_v28  ;;  %v5253_v42 = vadd.f32 %v8623_v30, %v5230_v49  ;;  %v5005_v51 = vadd.f32 %v6757_v50, %v4778_v14  ;;  %v5212_v62 = vpop.f32.mrf.mxu0 }
 0x366   : > { %v5229_v54 = vadd.f32 %v8648_v59, %v5002_v41  ;;  %v4965_v29 = vpop.f32.mrf.mxu1  ;;  %v4554_v11 = vadd.f32 %v8597_v63, %v4327_v39  ;;  %v4553_v61 = vadd.f32 %v8605_v35, %v4326_v15 }
 0x367   : > { %5315 = vst.msk [vmem:[%s7034_s14 + $0x38] sm:$0xff] %vm303_vm1, %v5299_v60  ;;  %v5298_v34 = vmax.f32 %v5282_v8, 0.0  ;;  %v5285_v17 = vadd.f32 %v5269_v27, %v5253_v42  ;;  %v5232_v10 = vadd.f32 %v6783_v56, %v5005_v51  ;;  %v5004_v46 = vadd.f32 %v4965_v29, %v4777_v58  ;;  %v5275_v27 = vld [vmem:[%s7026_s10 + $0x78] sm:$0xff] }
 0x368   : > { %v5252_v23 = vadd.f32 %v8623_v30, %v5229_v54  ;;  %v6760_v59 = vpop.f32.mrf.mxu1  ;;  %v4782_v7 = vadd.f32 %v8880_v4, %v4554_v11  ;;  %v4781_v57 = vadd.f32 %v8881_v47, %v4553_v61 }
 0x369   : > { %5314 = vst.msk [vmem:[%s7034_s14 + $0x30] sm:$0xff] %vm303_vm1, %v5298_v34  ;;  %v5301_v36 = vmax.f32 %v5285_v17, 0.0  ;;  %v5255_v9 = vadd.f32 %v8623_v30, %v5232_v10  ;;  %v5231_v56 = vadd.f32 %v5192_v43, %v5004_v46  ;;  %v5007_v22 = vadd.f32 %v6760_v59, %v4780_v0  ;;  %v5273_v43 = vld [vmem:[%s7026_s10 + $0x68] sm:$0xff] }
 0x36a   : > { %v5284_v3 = vadd.f32 %v5268_v5, %v5252_v23  ;;  %v4975_v2 = vpop.f32.mrf.mxu1 }
 0x36b   : > { %5317 = vst.msk [vmem:[%s7034_s14 + $0x48] sm:$0xff] %vm303_vm1, %v5301_v36  ;;  %v5287_v63 = vadd.f32 %v5271_v19, %v5255_v9  ;;  %v5254_v35 = vadd.f32 %v8623_v30, %v5231_v56  ;;  %v5234_v25 = vadd.f32 %v6786_v53, %v5007_v22  ;;  %v5006_v1 = vadd.f32 %v4975_v2, %v4779_v21  ;;  %v5274_v53 = vld [vmem:[%s7026_s10 + $0x70] sm:$0xff] }
 0x36c   : > { %v5300_v40 = vmax.f32 %v5284_v3, 0.0  ;;  %v6763_v37 = vpop.f32.mrf.mxu1 }
 0x36d   : > { %v5303_v55 = vmax.f32 %v5287_v63, 0.0  ;;  %v5286_v44 = vadd.f32 %v5270_v13, %v5254_v35  ;;  %v5257_v14 = vadd.f32 %v8623_v30, %v5234_v25  ;;  %v5233_v48 = vadd.f32 %v5202_v18, %v5006_v1 }
 0x36e   : > { %5316 = vst.msk [vmem:[%s7034_s14 + $0x40] sm:$0xff] %vm303_vm1, %v5300_v40  ;;  %v5009_v31 = vadd.f32 %v6763_v37, %v4782_v7  ;;  %v4985_v26 = vpop.f32.mrf.mxu1 }
 0x36f   : > { %5319 = vst.msk [vmem:[%s7034_s14 + $0x58] sm:$0xff] %vm303_vm1, %v5303_v55  ;;  %v5302_v33 = vmax.f32 %v5286_v44, 0.0  ;;  %v5289_v38 = vadd.f32 %v5273_v43, %v5257_v14  ;;  %v5256_v52 = vadd.f32 %v8623_v30, %v5233_v48  ;;  %v5008_v28 = vadd.f32 %v4985_v26, %v4781_v57 }
 0x370   : > { %v5236_v49 = vadd.f32 %v6789_v6, %v5009_v31 }
 0x371   : > { %5318 = vst.msk [vmem:[%s7034_s14 + $0x50] sm:$0xff] %vm303_vm1, %v5302_v33  ;;  %v5305_v58 = vmax.f32 %v5289_v38, 0.0  ;;  %v5288_v12 = vadd.f32 %v5272_v32, %v5256_v52  ;;  %v5235_v41 = vadd.f32 %v5212_v62, %v5008_v28 }
 0x372   : > { %v5259_v50 = vadd.f32 %v8623_v30, %v5236_v49 }
 0x373   : > { %5321 = vst.msk [vmem:[%s7034_s14 + $0x68] sm:$0xff] %vm303_vm1, %v5305_v58  ;;  %v5304_v60 = vmax.f32 %v5288_v12, 0.0  ;;  %v5258_v8 = vadd.f32 %v8623_v30, %v5235_v41 }
 0x374   : > { %v5291_v42 = vadd.f32 %v5275_v27, %v5259_v50 }
 0x375   : > { %5320 = vst.msk [vmem:[%s7034_s14 + $0x60] sm:$0xff] %vm303_vm1, %v5304_v60  ;;  %v5290_v51 = vadd.f32 %v5274_v53, %v5258_v8 }
 0x376   : > { %v5307_v45 = vmax.f32 %v5291_v42, 0.0 }
 0x377   : > { %v5306_v39 = vmax.f32 %v5290_v51, 0.0 }
 0x378   : > { %5323 = vst.msk [vmem:[%s7034_s14 + $0x78] sm:$0xff] %vm303_vm1, %v5307_v45 }
 0x379   : > { %5322 = vst.msk [vmem:[%s7034_s14 + $0x70] sm:$0xff] %vm303_vm1, %v5306_v39 }
 0x37a PF: > { %s15_s22 = sadd.s32 1, %s6875_s22   ;;  %s8882_s18 = smov %s6867_s20 }
 0x37b   : > { %p12_p11 = scmp.ge.s32.totalorder %s15_s22, 6   ;;  %s8883_s19 = smov %s6871_s21 }
 0x37c   : > { %s8884_s20 = smov %s8887_s23  ;;  %s8885_s21 = smov %s8891_s24 }
 0x37d   :  { %14 = sbr.rel (!%p12_p11) target bundleno = 3 (0x3), region = 120 }

</bundles_post_ra>
